<compile_context>
chip_gen: v6e
topology: v6e:2x2x1
jax: 0.10.0
libtpu: 0.0.40
codegen_flags: <defaults>
</compile_context>

<pallas_src>
import functools

import jax
import jax.numpy as jnp
import numpy as np
from jax import lax
from jax.experimental import pallas as pl
from jax.experimental.pallas import tpu as pltpu


# ------------------------------- helpers ------------------------------------

def _round_up(x, m):
    return (x + m - 1) // m * m


def _pick_time_chunk(T, Bp, D, Hp, budget_bytes=6 << 20, max_chunk=16):
    """Largest divisor of T that keeps the streamed/scratch VMEM per chunk small.

    Per timestep of a chunk we hold: double-buffered x block (D), double-buffered
    out block (Hp), and the precomputed-gate scratch (3Hp), all fp32.
    """
    per_step = Bp * (2 * D + 2 * Hp + 3 * Hp) * 4
    cap = int(max(1, min(max_chunk, budget_bytes // max(per_step, 1), T)))
    chunk = 1
    for c in range(1, cap + 1):
        if T % c == 0:
            chunk = c
    return chunk


# ----------------------------- Pallas kernels -------------------------------

def _gru_recurrence(x_ref, wih_ref, whh_ref, bih_ref, bhh_ref, h_ref, gi_ref,
                    out_ref=None):
    """Run the GRU recurrence over one time chunk.

    x_ref:   (Tc, Bp, D)      input chunk (time-major, batch padded to 8)
    wih_ref: (D, 3Hp)         W_ih^T, gate order [r, z, n], lane-padded gates
    whh_ref: (Hp, 3Hp)        W_hh^T
    bih_ref: (1, 3Hp)         b_ih
    bhh_ref: (1, 3Hp)         b_hh
    h_ref:   (Bp, Hp)         hidden-state carry (VMEM scratch, persists across grid)
    gi_ref:  (Tc*Bp, 3Hp)     scratch for the hoisted input projection
    out_ref: (Tc, Bp, Hp)     per-timestep hidden output (None for the fused last layer)
    """
    Tc, Bp, D = x_ref.shape
    Hp = whh_ref.shape[0]

    @pl.when(pl.program_id(0) == 0)
    def _():
        h_ref[...] = jnp.zeros_like(h_ref)          # h0 = 0 (PyTorch semantics)

    # ---- Hoisted input projection: ONE MXU matmul for the whole chunk. ----
    x_flat = x_ref[...].reshape(Tc * Bp, D)
    gi_ref[...] = (jnp.dot(x_flat, wih_ref[...],
                           preferred_element_type=jnp.float32)
                   + bih_ref[...])

    # ---- Serial recurrence: only h @ W_hh per step stays on the chain. ----
    def step(t, h):
        row = pl.multiple_of(t * Bp, Bp)            # Bp is a multiple of 8
        gi_t = gi_ref[pl.ds(row, Bp), :]            # (Bp, 3Hp)
        gh = jnp.dot(h, whh_ref[...],
                     preferred_element_type=jnp.float32) + bhh_ref[...]
        r = jax.nn.sigmoid(gi_t[:, :Hp] + gh[:, :Hp])
        z = jax.nn.sigmoid(gi_t[:, Hp:2 * Hp] + gh[:, Hp:2 * Hp])
        n = jnp.tanh(gi_t[:, 2 * Hp:] + r * gh[:, 2 * Hp:])
        h_new = (1.0 - z) * n + z * h
        if out_ref is not None:
            out_ref[t] = h_new
        return h_new

    h_final = lax.fori_loop(0, Tc, step, h_ref[...], unroll=True)
    h_ref[...] = h_final
    return h_final


def gru_layer_kernel(x_ref, wih_ref, whh_ref, bih_ref, bhh_ref,
                     out_ref, h_ref, gi_ref):
    """Intermediate GRU layer: writes hidden states for every timestep."""
    _gru_recurrence(x_ref, wih_ref, whh_ref, bih_ref, bhh_ref,
                    h_ref, gi_ref, out_ref=out_ref)


def gru_last_layer_fc_kernel(x_ref, wih_ref, whh_ref, bih_ref, bhh_ref,
                             wfc_ref, bfc_ref, out_ref, h_ref, gi_ref):
    """Last GRU layer fused with the FC head: writes only (Bp, Cp) logits."""
    h_final = _gru_recurrence(x_ref, wih_ref, whh_ref, bih_ref, bhh_ref,
                              h_ref, gi_ref, out_ref=None)

    @pl.when(pl.program_id(0) == pl.num_programs(0) - 1)
    def _():
        out_ref[...] = (jnp.dot(h_final, wfc_ref[...],
                                preferred_element_type=jnp.float32)
                        + bfc_ref[...])


# ------------------------------ JAX wrappers ---------------------------------

def _gru_layer_call(x_tbd, lp, *, last=False, fc_w=None, fc_b=None):
    """One pallas_call for one GRU layer (optionally fused with the FC head)."""
    T, Bp, D = x_tbd.shape
    Hp = lp["whh"].shape[0]
    chunk = _pick_time_chunk(T, Bp, D, Hp)
    grid = (T // chunk,)
    full2d = lambda t: (0, 0)

    in_specs = [
        pl.BlockSpec((chunk, Bp, D), lambda t: (t, 0, 0)),   # streamed input chunk
        pl.BlockSpec((D, 3 * Hp), full2d),                   # W_ih^T (VMEM-resident)
        pl.BlockSpec((Hp, 3 * Hp), full2d),                  # W_hh^T
        pl.BlockSpec((1, 3 * Hp), full2d),                   # b_ih
        pl.BlockSpec((1, 3 * Hp), full2d),                   # b_hh
    ]
    scratch = [
        pltpu.VMEM((Bp, Hp), jnp.float32),                   # hidden-state carry
        pltpu.VMEM((chunk * Bp, 3 * Hp), jnp.float32),       # hoisted gi for the chunk
    ]

    if last:
        Cp = fc_w.shape[1]
        in_specs += [pl.BlockSpec((Hp, Cp), full2d),         # W_fc^T
                     pl.BlockSpec((1, Cp), full2d)]          # b_fc
        out_specs = pl.BlockSpec((Bp, Cp), full2d)           # same block across grid
        out_shape = jax.ShapeDtypeStruct((Bp, Cp), jnp.float32)
        kernel = gru_last_layer_fc_kernel
        args = (x_tbd, lp["wih"], lp["whh"], lp["bih"], lp["bhh"], fc_w, fc_b)
    else:
        out_specs = pl.BlockSpec((chunk, Bp, Hp), lambda t: (t, 0, 0))
        out_shape = jax.ShapeDtypeStruct((T, Bp, Hp), jnp.float32)
        kernel = gru_layer_kernel
        args = (x_tbd, lp["wih"], lp["whh"], lp["bih"], lp["bhh"])

    return pl.pallas_call(
        kernel,
        out_shape=out_shape,
        grid_spec=pltpu.PrefetchScalarGridSpec(
            num_scalar_prefetch=0,
            grid=grid,
            in_specs=in_specs,
            out_specs=out_specs,
            scratch_shapes=scratch,
        ),
        compiler_params=pltpu.CompilerParams(
            dimension_semantics=("arbitrary",)),   # time axis is a sequential recurrence
    )(*args)


@functools.partial(jax.jit, static_argnames=("num_classes",))
def gru_classifier_forward(x_btd, kparams, *, num_classes):
    """Equivalent of GRUClassifier.forward (h0 = zeros, batch_first input)."""
    B = x_btd.shape[0]
    Bp = _round_up(B, 8)                              # fp32 sublane alignment
    h = jnp.transpose(x_btd, (1, 0, 2))               # (B, T, D) -> (T, B, D)
    if Bp != B:
        h = jnp.pad(h, ((0, 0), (0, Bp - B), (0, 0)))
    layers = kparams["gru"]
    for lp in layers[:-1]:
        h = _gru_layer_call(h, lp)
    logits_p = _gru_layer_call(h, layers[-1], last=True,
                               fc_w=kparams["fc_w"], fc_b=kparams["fc_b"])
    return logits_p[:B, :num_classes]


# ---------------------- parameters & kernel-layout prep ----------------------

def init_params(key, input_dim, hidden_dim, num_layers, num_classes):
    """Deterministic init matching nn.GRU / nn.Linear parameter shapes."""
    bound = 1.0 / np.sqrt(hidden_dim)
    keys = jax.random.split(key, 4 * num_layers + 2)
    gru = []
    for l in range(num_layers):
        d_in = input_dim if l == 0 else hidden_dim
        w_ih = jax.random.uniform(keys[4 * l + 0], (3 * hidden_dim, d_in),
                                  jnp.float32, -bound, bound)
        w_hh = jax.random.uniform(keys[4 * l + 1], (3 * hidden_dim, hidden_dim),
                                  jnp.float32, -bound, bound)
        b_ih = jax.random.uniform(keys[4 * l + 2], (3 * hidden_dim,),
                                  jnp.float32, -bound, bound)
        b_hh = jax.random.uniform(keys[4 * l + 3], (3 * hidden_dim,),
                                  jnp.float32, -bound, bound)
        gru.append((w_ih, w_hh, b_ih, b_hh))
    fc_bound = 1.0 / np.sqrt(hidden_dim)
    fc_w = jax.random.uniform(keys[-2], (num_classes, hidden_dim),
                              jnp.float32, -fc_bound, fc_bound)
    fc_b = jax.random.uniform(keys[-1], (num_classes,),
                              jnp.float32, -fc_bound, fc_bound)
    return {"gru": gru, "fc_w": fc_w, "fc_b": fc_b}


def prepare_params(params, hidden_dim, num_classes):
    """One-time layout prep: transpose weights and pad H, C to lane multiples.

    Padded gate columns carry zero weights/biases, so the padded hidden lanes
    stay exactly zero through the recurrence and never affect real outputs.
    """
    H = hidden_dim
    Hp = _round_up(H, 128)
    Cp = _round_up(num_classes, 128)

    def pad_gate_rows(w):               # (3H, d) -> (3Hp, d), per-gate padding
        w3 = w.reshape(3, H, w.shape[1])
        w3 = jnp.pad(w3, ((0, 0), (0, Hp - H), (0, 0)))
        return w3.reshape(3 * Hp, w.shape[1])

    def pad_gate_bias(b):               # (3H,) -> (1, 3Hp)
        b3 = jnp.pad(b.reshape(3, H), ((0, 0), (0, Hp - H)))
        return b3.reshape(1, 3 * Hp)

    layers = []
    for li, (w_ih, w_hh, b_ih, b_hh) in enumerate(params["gru"]):
        wih_p = pad_gate_rows(w_ih)                              # (3Hp, d_in)
        if li > 0:                                               # deeper layers eat padded hidden
            wih_p = jnp.pad(wih_p, ((0, 0), (0, Hp - H)))
        whh_p = jnp.pad(pad_gate_rows(w_hh), ((0, 0), (0, Hp - H)))  # (3Hp, Hp)
        layers.append({
            "wih": jnp.asarray(wih_p.T),                         # (d_in[_p], 3Hp)
            "whh": jnp.asarray(whh_p.T),                         # (Hp, 3Hp)
            "bih": pad_gate_bias(b_ih),                          # (1, 3Hp)
            "bhh": pad_gate_bias(b_hh),                          # (1, 3Hp)
        })

    fc_w_p = jnp.pad(params["fc_w"],
                     ((0, Cp - num_classes), (0, Hp - H))).T     # (Hp, Cp)
    fc_b_p = jnp.pad(params["fc_b"], (0, Cp - num_classes))[None, :]  # (1, Cp)
    return {"gru": layers, "fc_w": fc_w_p, "fc_b": fc_b_p}


# --------------------------- pure-JAX reference ------------------------------

def reference_forward(x_btd, params):
    """Pure-JAX reference (mirrors torch.nn.GRU equations, gate order r,z,n)."""
    B = x_btd.shape[0]
    seq = jnp.transpose(x_btd, (1, 0, 2))
    for (w_ih, w_hh, b_ih, b_hh) in params["gru"]:
        H = w_hh.shape[1]
        h = jnp.zeros((B, H), jnp.float32)
        outs = []
        for t in range(seq.shape[0]):
            gi = seq[t] @ w_ih.T + b_ih
            gh = h @ w_hh.T + b_hh
            r = jax.nn.sigmoid(gi[:, 0:H] + gh[:, 0:H])
            z = jax.nn.sigmoid(gi[:, H:2 * H] + gh[:, H:2 * H])
            n = jnp.tanh(gi[:, 2 * H:] + r * gh[:, 2 * H:])
            h = (1.0 - z) * n + z * h
            outs.append(h)
        seq = jnp.stack(outs, axis=0)
    return seq[-1] @ params["fc_w"].T + params["fc_b"]


# ---------------------------------- main --------------------------------------

if __name__ == "__main__":
    batch, seq_len, input_dim = 2, 8, 16
    hidden_dim, num_layers, num_classes = 32, 2, 4

    key = jax.random.PRNGKey(0)
    k_x, k_p = jax.random.split(key)
    x = jax.random.normal(k_x, (batch, seq_len, input_dim), jnp.float32)
    params = init_params(k_p, input_dim, hidden_dim, num_layers, num_classes)
    kparams = prepare_params(params, hidden_dim, num_classes)   # one-time layout prep

    out = gru_classifier_forward(x, kparams, num_classes=num_classes)
    out = jax.block_until_ready(out)

    ref = reference_forward(x, params)
    assert out.shape == (batch, num_classes)
    np.testing.assert_allclose(np.asarray(out), np.asarray(ref),
                               rtol=1e-4, atol=1e-4)
    print("KERNEL_OK")
</pallas_src>

<mosaic_0001>
module attributes {stable_mosaic.version = 11 : i64} {
  func.func @gru_last_layer_fc_kernel(%arg0: i32, %arg1: memref<8x8x128xf32, #tpu.memory_space<vmem>>, %arg2: memref<128x384xf32, #tpu.memory_space<vmem>>, %arg3: memref<128x384xf32, #tpu.memory_space<vmem>>, %arg4: memref<1x384xf32, #tpu.memory_space<vmem>>, %arg5: memref<1x384xf32, #tpu.memory_space<vmem>>, %arg6: memref<128x128xf32, #tpu.memory_space<vmem>>, %arg7: memref<1x128xf32, #tpu.memory_space<vmem>>, %arg8: memref<8x128xf32, #tpu.memory_space<vmem>>, %arg9: memref<8x128xf32, #tpu.memory_space<vmem>>, %arg10: memref<64x384xf32, #tpu.memory_space<vmem>>) attributes {dimension_semantics = [#tpu.dimension_semantics<arbitrary>], iteration_bounds = array<i64: 1>, scalar_prefetch = 0 : i64, scratch_operands = 2 : i64, tpu.core_type = #tpu.core_type<tc>, window_params = [{transform_indices = @transform_0, window_bounds = array<i64: 8, 8, 128>}, {pipeline_mode = #tpu.pipeline_mode<synchronous>, transform_indices = @transform_1, window_bounds = array<i64: 128, 384>}, {pipeline_mode = #tpu.pipeline_mode<synchronous>, transform_indices = @transform_2, window_bounds = array<i64: 128, 384>}, {pipeline_mode = #tpu.pipeline_mode<synchronous>, transform_indices = @transform_3, window_bounds = array<i64: 1, 384>}, {pipeline_mode = #tpu.pipeline_mode<synchronous>, transform_indices = @transform_4, window_bounds = array<i64: 1, 384>}, {pipeline_mode = #tpu.pipeline_mode<synchronous>, transform_indices = @transform_5, window_bounds = array<i64: 128, 128>}, {pipeline_mode = #tpu.pipeline_mode<synchronous>, transform_indices = @transform_6, window_bounds = array<i64: 1, 128>}, {pipeline_mode = #tpu.pipeline_mode<synchronous>, transform_indices = @transform_7, window_bounds = array<i64: 8, 128>}]} {
    %c0_i32 = arith.constant 0 : i32
    %0 = arith.cmpi eq, %arg0, %c0_i32 : i32
    %1 = arith.extui %0 : i1 to i32
    %c0_i32_0 = arith.constant 0 : i32
    %2 = arith.cmpi ne, %1, %c0_i32_0 : i32
    scf.if %2 {
      %cst_96 = arith.constant 0.000000e+00 : f32
      %296 = vector.broadcast %cst_96 : f32 to vector<8x128xf32>
      %c0_97 = arith.constant 0 : index
      %c0_98 = arith.constant 0 : index
      %297 = vector.load %arg9[%c0_97, %c0_98] : memref<8x128xf32, #tpu.memory_space<vmem>>, vector<8x128xf32>
      tpu.vector_store %arg9[%c0_97, %c0_98], %296 {strides = array<i32>} : memref<8x128xf32, #tpu.memory_space<vmem>>, vector<8x128xf32>,
    } else {
    }
    %c0 = arith.constant 0 : index
    %c0_1 = arith.constant 0 : index
    %c0_2 = arith.constant 0 : index
    %3 = vector.load %arg1[%c0, %c0_1, %c0_2] : memref<8x8x128xf32, #tpu.memory_space<vmem>>, vector<8x8x128xf32>
    %4 = vector.shape_cast %3 : vector<8x8x128xf32> to vector<64x128xf32>
    %c0_3 = arith.constant 0 : index
    %c0_4 = arith.constant 0 : index
    %5 = vector.load %arg2[%c0_3, %c0_4] : memref<128x384xf32, #tpu.memory_space<vmem>>, vector<128x384xf32>
    %cst = arith.constant dense<0.000000e+00> : vector<64x384xf32>
    %6 = tpu.matmul %4, %5, %cst {dimension_numbers = #tpu.dot_dimension_numbers<[1], [0], [0], [1], [0, 0, 1, 1], [], []>} : vector<64x128xf32>, vector<128x384xf32>, vector<64x384xf32> -> vector<64x384xf32>
    %c0_5 = arith.constant 0 : index
    %c0_6 = arith.constant 0 : index
    %7 = vector.load %arg4[%c0_5, %c0_6] : memref<1x384xf32, #tpu.memory_space<vmem>>, vector<1x384xf32>
    %8 = vector.broadcast %7 : vector<1x384xf32> to vector<64x384xf32>
    %9 = arith.addf %6, %8 : vector<64x384xf32>
    %c0_7 = arith.constant 0 : index
    %c0_8 = arith.constant 0 : index
    %10 = vector.load %arg10[%c0_7, %c0_8] : memref<64x384xf32, #tpu.memory_space<vmem>>, vector<64x384xf32>
    tpu.vector_store %arg10[%c0_7, %c0_8], %9 {strides = array<i32>} : memref<64x384xf32, #tpu.memory_space<vmem>>, vector<64x384xf32>,
    %c0_9 = arith.constant 0 : index
    %c0_10 = arith.constant 0 : index
    %11 = vector.load %arg9[%c0_9, %c0_10] : memref<8x128xf32, #tpu.memory_space<vmem>>, vector<8x128xf32>
    %c0_i32_11 = arith.constant 0 : i32
    %c8_i32 = arith.constant 8 : i32
    %12 = arith.muli %c0_i32_11, %c8_i32 : i32
    %13 = tpu.assume_multiple %12, 8 : i32
    %14 = arith.index_cast %13 : i32 to index
    %c0_12 = arith.constant 0 : index
    %15 = vector.load %arg10[%14, %c0_12] : memref<64x384xf32, #tpu.memory_space<vmem>>, vector<8x384xf32>
    %c0_13 = arith.constant 0 : index
    %c0_14 = arith.constant 0 : index
    %16 = vector.load %arg3[%c0_13, %c0_14] : memref<128x384xf32, #tpu.memory_space<vmem>>, vector<128x384xf32>
    %cst_15 = arith.constant dense<0.000000e+00> : vector<8x384xf32>
    %17 = tpu.matmul %11, %16, %cst_15 {dimension_numbers = #tpu.dot_dimension_numbers<[1], [0], [0], [1], [0, 0, 1, 1], [], []>} : vector<8x128xf32>, vector<128x384xf32>, vector<8x384xf32> -> vector<8x384xf32>
    %c0_16 = arith.constant 0 : index
    %c0_17 = arith.constant 0 : index
    %18 = vector.load %arg5[%c0_16, %c0_17] : memref<1x384xf32, #tpu.memory_space<vmem>>, vector<1x384xf32>
    %19 = vector.broadcast %18 : vector<1x384xf32> to vector<8x384xf32>
    %20 = arith.addf %17, %19 : vector<8x384xf32>
    %21 = vector.extract_strided_slice %15 {offsets = [0, 0], sizes = [8, 128], strides = [1, 1]} : vector<8x384xf32> to vector<8x128xf32>
    %22 = vector.extract_strided_slice %20 {offsets = [0, 0], sizes = [8, 128], strides = [1, 1]} : vector<8x384xf32> to vector<8x128xf32>
    %23 = arith.addf %21, %22 : vector<8x128xf32>
    %24 = arith.negf %23 : vector<8x128xf32>
    %25 = math.exp %24 : vector<8x128xf32>
    %cst_18 = arith.constant 1.000000e+00 : f32
    %26 = vector.broadcast %cst_18 : f32 to vector<8x128xf32>
    %27 = arith.addf %26, %25 : vector<8x128xf32>
    %28 = arith.divf %26, %27 : vector<8x128xf32>
    %29 = vector.extract_strided_slice %15 {offsets = [0, 128], sizes = [8, 128], strides = [1, 1]} : vector<8x384xf32> to vector<8x128xf32>
    %30 = vector.extract_strided_slice %20 {offsets = [0, 128], sizes = [8, 128], strides = [1, 1]} : vector<8x384xf32> to vector<8x128xf32>
    %31 = arith.addf %29, %30 : vector<8x128xf32>
    %32 = arith.negf %31 : vector<8x128xf32>
    %33 = math.exp %32 : vector<8x128xf32>
    %cst_19 = arith.constant 1.000000e+00 : f32
    %34 = vector.broadcast %cst_19 : f32 to vector<8x128xf32>
    %35 = arith.addf %34, %33 : vector<8x128xf32>
    %36 = arith.divf %34, %35 : vector<8x128xf32>
    %37 = vector.extract_strided_slice %15 {offsets = [0, 256], sizes = [8, 128], strides = [1, 1]} : vector<8x384xf32> to vector<8x128xf32>
    %38 = vector.extract_strided_slice %20 {offsets = [0, 256], sizes = [8, 128], strides = [1, 1]} : vector<8x384xf32> to vector<8x128xf32>
    %39 = arith.mulf %28, %38 : vector<8x128xf32>
    %40 = arith.addf %37, %39 : vector<8x128xf32>
    %41 = math.tanh %40 : vector<8x128xf32>
    %cst_20 = arith.constant 1.000000e+00 : f32
    %42 = vector.broadcast %cst_20 : f32 to vector<8x128xf32>
    %43 = arith.subf %42, %36 : vector<8x128xf32>
    %44 = arith.mulf %43, %41 : vector<8x128xf32>
    %45 = arith.mulf %36, %11 : vector<8x128xf32>
    %46 = arith.addf %44, %45 : vector<8x128xf32>
    %c1_i32 = arith.constant 1 : i32
    %c8_i32_21 = arith.constant 8 : i32
    %47 = arith.muli %c1_i32, %c8_i32_21 : i32
    %48 = tpu.assume_multiple %47, 8 : i32
    %49 = arith.index_cast %48 : i32 to index
    %c0_22 = arith.constant 0 : index
    %50 = vector.load %arg10[%49, %c0_22] : memref<64x384xf32, #tpu.memory_space<vmem>>, vector<8x384xf32>
    %c0_23 = arith.constant 0 : index
    %c0_24 = arith.constant 0 : index
    %51 = vector.load %arg3[%c0_23, %c0_24] : memref<128x384xf32, #tpu.memory_space<vmem>>, vector<128x384xf32>
    %cst_25 = arith.constant dense<0.000000e+00> : vector<8x384xf32>
    %52 = tpu.matmul %46, %51, %cst_25 {dimension_numbers = #tpu.dot_dimension_numbers<[1], [0], [0], [1], [0, 0, 1, 1], [], []>} : vector<8x128xf32>, vector<128x384xf32>, vector<8x384xf32> -> vector<8x384xf32>
    %c0_26 = arith.constant 0 : index
    %c0_27 = arith.constant 0 : index
    %53 = vector.load %arg5[%c0_26, %c0_27] : memref<1x384xf32, #tpu.memory_space<vmem>>, vector<1x384xf32>
    %54 = vector.broadcast %53 : vector<1x384xf32> to vector<8x384xf32>
    %55 = arith.addf %52, %54 : vector<8x384xf32>
    %56 = vector.extract_strided_slice %50 {offsets = [0, 0], sizes = [8, 128], strides = [1, 1]} : vector<8x384xf32> to vector<8x128xf32>
    %57 = vector.extract_strided_slice %55 {offsets = [0, 0], sizes = [8, 128], strides = [1, 1]} : vector<8x384xf32> to vector<8x128xf32>
    %58 = arith.addf %56, %57 : vector<8x128xf32>
    %59 = arith.negf %58 : vector<8x128xf32>
    %60 = math.exp %59 : vector<8x128xf32>
    %cst_28 = arith.constant 1.000000e+00 : f32
    %61 = vector.broadcast %cst_28 : f32 to vector<8x128xf32>
    %62 = arith.addf %61, %60 : vector<8x128xf32>
    %63 = arith.divf %61, %62 : vector<8x128xf32>
    %64 = vector.extract_strided_slice %50 {offsets = [0, 128], sizes = [8, 128], strides = [1, 1]} : vector<8x384xf32> to vector<8x128xf32>
    %65 = vector.extract_strided_slice %55 {offsets = [0, 128], sizes = [8, 128], strides = [1, 1]} : vector<8x384xf32> to vector<8x128xf32>
    %66 = arith.addf %64, %65 : vector<8x128xf32>
    %67 = arith.negf %66 : vector<8x128xf32>
    %68 = math.exp %67 : vector<8x128xf32>
    %cst_29 = arith.constant 1.000000e+00 : f32
    %69 = vector.broadcast %cst_29 : f32 to vector<8x128xf32>
    %70 = arith.addf %69, %68 : vector<8x128xf32>
    %71 = arith.divf %69, %70 : vector<8x128xf32>
    %72 = vector.extract_strided_slice %50 {offsets = [0, 256], sizes = [8, 128], strides = [1, 1]} : vector<8x384xf32> to vector<8x128xf32>
    %73 = vector.extract_strided_slice %55 {offsets = [0, 256], sizes = [8, 128], strides = [1, 1]} : vector<8x384xf32> to vector<8x128xf32>
    %74 = arith.mulf %63, %73 : vector<8x128xf32>
    %75 = arith.addf %72, %74 : vector<8x128xf32>
    %76 = math.tanh %75 : vector<8x128xf32>
    %cst_30 = arith.constant 1.000000e+00 : f32
    %77 = vector.broadcast %cst_30 : f32 to vector<8x128xf32>
    %78 = arith.subf %77, %71 : vector<8x128xf32>
    %79 = arith.mulf %78, %76 : vector<8x128xf32>
    %80 = arith.mulf %71, %46 : vector<8x128xf32>
    %81 = arith.addf %79, %80 : vector<8x128xf32>
    %c2_i32 = arith.constant 2 : i32
    %c8_i32_31 = arith.constant 8 : i32
    %82 = arith.muli %c2_i32, %c8_i32_31 : i32
    %83 = tpu.assume_multiple %82, 8 : i32
    %84 = arith.index_cast %83 : i32 to index
    %c0_32 = arith.constant 0 : index
    %85 = vector.load %arg10[%84, %c0_32] : memref<64x384xf32, #tpu.memory_space<vmem>>, vector<8x384xf32>
    %c0_33 = arith.constant 0 : index
    %c0_34 = arith.constant 0 : index
    %86 = vector.load %arg3[%c0_33, %c0_34] : memref<128x384xf32, #tpu.memory_space<vmem>>, vector<128x384xf32>
    %cst_35 = arith.constant dense<0.000000e+00> : vector<8x384xf32>
    %87 = tpu.matmul %81, %86, %cst_35 {dimension_numbers = #tpu.dot_dimension_numbers<[1], [0], [0], [1], [0, 0, 1, 1], [], []>} : vector<8x128xf32>, vector<128x384xf32>, vector<8x384xf32> -> vector<8x384xf32>
    %c0_36 = arith.constant 0 : index
    %c0_37 = arith.constant 0 : index
    %88 = vector.load %arg5[%c0_36, %c0_37] : memref<1x384xf32, #tpu.memory_space<vmem>>, vector<1x384xf32>
    %89 = vector.broadcast %88 : vector<1x384xf32> to vector<8x384xf32>
    %90 = arith.addf %87, %89 : vector<8x384xf32>
    %91 = vector.extract_strided_slice %85 {offsets = [0, 0], sizes = [8, 128], strides = [1, 1]} : vector<8x384xf32> to vector<8x128xf32>
    %92 = vector.extract_strided_slice %90 {offsets = [0, 0], sizes = [8, 128], strides = [1, 1]} : vector<8x384xf32> to vector<8x128xf32>
    %93 = arith.addf %91, %92 : vector<8x128xf32>
    %94 = arith.negf %93 : vector<8x128xf32>
    %95 = math.exp %94 : vector<8x128xf32>
    %cst_38 = arith.constant 1.000000e+00 : f32
    %96 = vector.broadcast %cst_38 : f32 to vector<8x128xf32>
    %97 = arith.addf %96, %95 : vector<8x128xf32>
    %98 = arith.divf %96, %97 : vector<8x128xf32>
    %99 = vector.extract_strided_slice %85 {offsets = [0, 128], sizes = [8, 128], strides = [1, 1]} : vector<8x384xf32> to vector<8x128xf32>
    %100 = vector.extract_strided_slice %90 {offsets = [0, 128], sizes = [8, 128], strides = [1, 1]} : vector<8x384xf32> to vector<8x128xf32>
    %101 = arith.addf %99, %100 : vector<8x128xf32>
    %102 = arith.negf %101 : vector<8x128xf32>
    %103 = math.exp %102 : vector<8x128xf32>
    %cst_39 = arith.constant 1.000000e+00 : f32
    %104 = vector.broadcast %cst_39 : f32 to vector<8x128xf32>
    %105 = arith.addf %104, %103 : vector<8x128xf32>
    %106 = arith.divf %104, %105 : vector<8x128xf32>
    %107 = vector.extract_strided_slice %85 {offsets = [0, 256], sizes = [8, 128], strides = [1, 1]} : vector<8x384xf32> to vector<8x128xf32>
    %108 = vector.extract_strided_slice %90 {offsets = [0, 256], sizes = [8, 128], strides = [1, 1]} : vector<8x384xf32> to vector<8x128xf32>
    %109 = arith.mulf %98, %108 : vector<8x128xf32>
    %110 = arith.addf %107, %109 : vector<8x128xf32>
    %111 = math.tanh %110 : vector<8x128xf32>
    %cst_40 = arith.constant 1.000000e+00 : f32
    %112 = vector.broadcast %cst_40 : f32 to vector<8x128xf32>
    %113 = arith.subf %112, %106 : vector<8x128xf32>
    %114 = arith.mulf %113, %111 : vector<8x128xf32>
    %115 = arith.mulf %106, %81 : vector<8x128xf32>
    %116 = arith.addf %114, %115 : vector<8x128xf32>
    %c3_i32 = arith.constant 3 : i32
    %c8_i32_41 = arith.constant 8 : i32
    %117 = arith.muli %c3_i32, %c8_i32_41 : i32
    %118 = tpu.assume_multiple %117, 8 : i32
    %119 = arith.index_cast %118 : i32 to index
    %c0_42 = arith.constant 0 : index
    %120 = vector.load %arg10[%119, %c0_42] : memref<64x384xf32, #tpu.memory_space<vmem>>, vector<8x384xf32>
    %c0_43 = arith.constant 0 : index
    %c0_44 = arith.constant 0 : index
    %121 = vector.load %arg3[%c0_43, %c0_44] : memref<128x384xf32, #tpu.memory_space<vmem>>, vector<128x384xf32>
    %cst_45 = arith.constant dense<0.000000e+00> : vector<8x384xf32>
    %122 = tpu.matmul %116, %121, %cst_45 {dimension_numbers = #tpu.dot_dimension_numbers<[1], [0], [0], [1], [0, 0, 1, 1], [], []>} : vector<8x128xf32>, vector<128x384xf32>, vector<8x384xf32> -> vector<8x384xf32>
    %c0_46 = arith.constant 0 : index
    %c0_47 = arith.constant 0 : index
    %123 = vector.load %arg5[%c0_46, %c0_47] : memref<1x384xf32, #tpu.memory_space<vmem>>, vector<1x384xf32>
    %124 = vector.broadcast %123 : vector<1x384xf32> to vector<8x384xf32>
    %125 = arith.addf %122, %124 : vector<8x384xf32>
    %126 = vector.extract_strided_slice %120 {offsets = [0, 0], sizes = [8, 128], strides = [1, 1]} : vector<8x384xf32> to vector<8x128xf32>
    %127 = vector.extract_strided_slice %125 {offsets = [0, 0], sizes = [8, 128], strides = [1, 1]} : vector<8x384xf32> to vector<8x128xf32>
    %128 = arith.addf %126, %127 : vector<8x128xf32>
    %129 = arith.negf %128 : vector<8x128xf32>
    %130 = math.exp %129 : vector<8x128xf32>
    %cst_48 = arith.constant 1.000000e+00 : f32
    %131 = vector.broadcast %cst_48 : f32 to vector<8x128xf32>
    %132 = arith.addf %131, %130 : vector<8x128xf32>
    %133 = arith.divf %131, %132 : vector<8x128xf32>
    %134 = vector.extract_strided_slice %120 {offsets = [0, 128], sizes = [8, 128], strides = [1, 1]} : vector<8x384xf32> to vector<8x128xf32>
    %135 = vector.extract_strided_slice %125 {offsets = [0, 128], sizes = [8, 128], strides = [1, 1]} : vector<8x384xf32> to vector<8x128xf32>
    %136 = arith.addf %134, %135 : vector<8x128xf32>
    %137 = arith.negf %136 : vector<8x128xf32>
    %138 = math.exp %137 : vector<8x128xf32>
    %cst_49 = arith.constant 1.000000e+00 : f32
    %139 = vector.broadcast %cst_49 : f32 to vector<8x128xf32>
    %140 = arith.addf %139, %138 : vector<8x128xf32>
    %141 = arith.divf %139, %140 : vector<8x128xf32>
    %142 = vector.extract_strided_slice %120 {offsets = [0, 256], sizes = [8, 128], strides = [1, 1]} : vector<8x384xf32> to vector<8x128xf32>
    %143 = vector.extract_strided_slice %125 {offsets = [0, 256], sizes = [8, 128], strides = [1, 1]} : vector<8x384xf32> to vector<8x128xf32>
    %144 = arith.mulf %133, %143 : vector<8x128xf32>
    %145 = arith.addf %142, %144 : vector<8x128xf32>
    %146 = math.tanh %145 : vector<8x128xf32>
    %cst_50 = arith.constant 1.000000e+00 : f32
    %147 = vector.broadcast %cst_50 : f32 to vector<8x128xf32>
    %148 = arith.subf %147, %141 : vector<8x128xf32>
    %149 = arith.mulf %148, %146 : vector<8x128xf32>
    %150 = arith.mulf %141, %116 : vector<8x128xf32>
    %151 = arith.addf %149, %150 : vector<8x128xf32>
    %c4_i32 = arith.constant 4 : i32
    %c8_i32_51 = arith.constant 8 : i32
    %152 = arith.muli %c4_i32, %c8_i32_51 : i32
    %153 = tpu.assume_multiple %152, 8 : i32
    %154 = arith.index_cast %153 : i32 to index
    %c0_52 = arith.constant 0 : index
    %155 = vector.load %arg10[%154, %c0_52] : memref<64x384xf32, #tpu.memory_space<vmem>>, vector<8x384xf32>
    %c0_53 = arith.constant 0 : index
    %c0_54 = arith.constant 0 : index
    %156 = vector.load %arg3[%c0_53, %c0_54] : memref<128x384xf32, #tpu.memory_space<vmem>>, vector<128x384xf32>
    %cst_55 = arith.constant dense<0.000000e+00> : vector<8x384xf32>
    %157 = tpu.matmul %151, %156, %cst_55 {dimension_numbers = #tpu.dot_dimension_numbers<[1], [0], [0], [1], [0, 0, 1, 1], [], []>} : vector<8x128xf32>, vector<128x384xf32>, vector<8x384xf32> -> vector<8x384xf32>
    %c0_56 = arith.constant 0 : index
    %c0_57 = arith.constant 0 : index
    %158 = vector.load %arg5[%c0_56, %c0_57] : memref<1x384xf32, #tpu.memory_space<vmem>>, vector<1x384xf32>
    %159 = vector.broadcast %158 : vector<1x384xf32> to vector<8x384xf32>
    %160 = arith.addf %157, %159 : vector<8x384xf32>
    %161 = vector.extract_strided_slice %155 {offsets = [0, 0], sizes = [8, 128], strides = [1, 1]} : vector<8x384xf32> to vector<8x128xf32>
    %162 = vector.extract_strided_slice %160 {offsets = [0, 0], sizes = [8, 128], strides = [1, 1]} : vector<8x384xf32> to vector<8x128xf32>
    %163 = arith.addf %161, %162 : vector<8x128xf32>
    %164 = arith.negf %163 : vector<8x128xf32>
    %165 = math.exp %164 : vector<8x128xf32>
    %cst_58 = arith.constant 1.000000e+00 : f32
    %166 = vector.broadcast %cst_58 : f32 to vector<8x128xf32>
    %167 = arith.addf %166, %165 : vector<8x128xf32>
    %168 = arith.divf %166, %167 : vector<8x128xf32>
    %169 = vector.extract_strided_slice %155 {offsets = [0, 128], sizes = [8, 128], strides = [1, 1]} : vector<8x384xf32> to vector<8x128xf32>
    %170 = vector.extract_strided_slice %160 {offsets = [0, 128], sizes = [8, 128], strides = [1, 1]} : vector<8x384xf32> to vector<8x128xf32>
    %171 = arith.addf %169, %170 : vector<8x128xf32>
    %172 = arith.negf %171 : vector<8x128xf32>
    %173 = math.exp %172 : vector<8x128xf32>
    %cst_59 = arith.constant 1.000000e+00 : f32
    %174 = vector.broadcast %cst_59 : f32 to vector<8x128xf32>
    %175 = arith.addf %174, %173 : vector<8x128xf32>
    %176 = arith.divf %174, %175 : vector<8x128xf32>
    %177 = vector.extract_strided_slice %155 {offsets = [0, 256], sizes = [8, 128], strides = [1, 1]} : vector<8x384xf32> to vector<8x128xf32>
    %178 = vector.extract_strided_slice %160 {offsets = [0, 256], sizes = [8, 128], strides = [1, 1]} : vector<8x384xf32> to vector<8x128xf32>
    %179 = arith.mulf %168, %178 : vector<8x128xf32>
    %180 = arith.addf %177, %179 : vector<8x128xf32>
    %181 = math.tanh %180 : vector<8x128xf32>
    %cst_60 = arith.constant 1.000000e+00 : f32
    %182 = vector.broadcast %cst_60 : f32 to vector<8x128xf32>
    %183 = arith.subf %182, %176 : vector<8x128xf32>
    %184 = arith.mulf %183, %181 : vector<8x128xf32>
    %185 = arith.mulf %176, %151 : vector<8x128xf32>
    %186 = arith.addf %184, %185 : vector<8x128xf32>
    %c5_i32 = arith.constant 5 : i32
    %c8_i32_61 = arith.constant 8 : i32
    %187 = arith.muli %c5_i32, %c8_i32_61 : i32
    %188 = tpu.assume_multiple %187, 8 : i32
    %189 = arith.index_cast %188 : i32 to index
    %c0_62 = arith.constant 0 : index
    %190 = vector.load %arg10[%189, %c0_62] : memref<64x384xf32, #tpu.memory_space<vmem>>, vector<8x384xf32>
    %c0_63 = arith.constant 0 : index
    %c0_64 = arith.constant 0 : index
    %191 = vector.load %arg3[%c0_63, %c0_64] : memref<128x384xf32, #tpu.memory_space<vmem>>, vector<128x384xf32>
    %cst_65 = arith.constant dense<0.000000e+00> : vector<8x384xf32>
    %192 = tpu.matmul %186, %191, %cst_65 {dimension_numbers = #tpu.dot_dimension_numbers<[1], [0], [0], [1], [0, 0, 1, 1], [], []>} : vector<8x128xf32>, vector<128x384xf32>, vector<8x384xf32> -> vector<8x384xf32>
    %c0_66 = arith.constant 0 : index
    %c0_67 = arith.constant 0 : index
    %193 = vector.load %arg5[%c0_66, %c0_67] : memref<1x384xf32, #tpu.memory_space<vmem>>, vector<1x384xf32>
    %194 = vector.broadcast %193 : vector<1x384xf32> to vector<8x384xf32>
    %195 = arith.addf %192, %194 : vector<8x384xf32>
    %196 = vector.extract_strided_slice %190 {offsets = [0, 0], sizes = [8, 128], strides = [1, 1]} : vector<8x384xf32> to vector<8x128xf32>
    %197 = vector.extract_strided_slice %195 {offsets = [0, 0], sizes = [8, 128], strides = [1, 1]} : vector<8x384xf32> to vector<8x128xf32>
    %198 = arith.addf %196, %197 : vector<8x128xf32>
    %199 = arith.negf %198 : vector<8x128xf32>
    %200 = math.exp %199 : vector<8x128xf32>
    %cst_68 = arith.constant 1.000000e+00 : f32
    %201 = vector.broadcast %cst_68 : f32 to vector<8x128xf32>
    %202 = arith.addf %201, %200 : vector<8x128xf32>
    %203 = arith.divf %201, %202 : vector<8x128xf32>
    %204 = vector.extract_strided_slice %190 {offsets = [0, 128], sizes = [8, 128], strides = [1, 1]} : vector<8x384xf32> to vector<8x128xf32>
    %205 = vector.extract_strided_slice %195 {offsets = [0, 128], sizes = [8, 128], strides = [1, 1]} : vector<8x384xf32> to vector<8x128xf32>
    %206 = arith.addf %204, %205 : vector<8x128xf32>
    %207 = arith.negf %206 : vector<8x128xf32>
    %208 = math.exp %207 : vector<8x128xf32>
    %cst_69 = arith.constant 1.000000e+00 : f32
    %209 = vector.broadcast %cst_69 : f32 to vector<8x128xf32>
    %210 = arith.addf %209, %208 : vector<8x128xf32>
    %211 = arith.divf %209, %210 : vector<8x128xf32>
    %212 = vector.extract_strided_slice %190 {offsets = [0, 256], sizes = [8, 128], strides = [1, 1]} : vector<8x384xf32> to vector<8x128xf32>
    %213 = vector.extract_strided_slice %195 {offsets = [0, 256], sizes = [8, 128], strides = [1, 1]} : vector<8x384xf32> to vector<8x128xf32>
    %214 = arith.mulf %203, %213 : vector<8x128xf32>
    %215 = arith.addf %212, %214 : vector<8x128xf32>
    %216 = math.tanh %215 : vector<8x128xf32>
    %cst_70 = arith.constant 1.000000e+00 : f32
    %217 = vector.broadcast %cst_70 : f32 to vector<8x128xf32>
    %218 = arith.subf %217, %211 : vector<8x128xf32>
    %219 = arith.mulf %218, %216 : vector<8x128xf32>
    %220 = arith.mulf %211, %186 : vector<8x128xf32>
    %221 = arith.addf %219, %220 : vector<8x128xf32>
    %c6_i32 = arith.constant 6 : i32
    %c8_i32_71 = arith.constant 8 : i32
    %222 = arith.muli %c6_i32, %c8_i32_71 : i32
    %223 = tpu.assume_multiple %222, 8 : i32
    %224 = arith.index_cast %223 : i32 to index
    %c0_72 = arith.constant 0 : index
    %225 = vector.load %arg10[%224, %c0_72] : memref<64x384xf32, #tpu.memory_space<vmem>>, vector<8x384xf32>
    %c0_73 = arith.constant 0 : index
    %c0_74 = arith.constant 0 : index
    %226 = vector.load %arg3[%c0_73, %c0_74] : memref<128x384xf32, #tpu.memory_space<vmem>>, vector<128x384xf32>
    %cst_75 = arith.constant dense<0.000000e+00> : vector<8x384xf32>
    %227 = tpu.matmul %221, %226, %cst_75 {dimension_numbers = #tpu.dot_dimension_numbers<[1], [0], [0], [1], [0, 0, 1, 1], [], []>} : vector<8x128xf32>, vector<128x384xf32>, vector<8x384xf32> -> vector<8x384xf32>
    %c0_76 = arith.constant 0 : index
    %c0_77 = arith.constant 0 : index
    %228 = vector.load %arg5[%c0_76, %c0_77] : memref<1x384xf32, #tpu.memory_space<vmem>>, vector<1x384xf32>
    %229 = vector.broadcast %228 : vector<1x384xf32> to vector<8x384xf32>
    %230 = arith.addf %227, %229 : vector<8x384xf32>
    %231 = vector.extract_strided_slice %225 {offsets = [0, 0], sizes = [8, 128], strides = [1, 1]} : vector<8x384xf32> to vector<8x128xf32>
    %232 = vector.extract_strided_slice %230 {offsets = [0, 0], sizes = [8, 128], strides = [1, 1]} : vector<8x384xf32> to vector<8x128xf32>
    %233 = arith.addf %231, %232 : vector<8x128xf32>
    %234 = arith.negf %233 : vector<8x128xf32>
    %235 = math.exp %234 : vector<8x128xf32>
    %cst_78 = arith.constant 1.000000e+00 : f32
    %236 = vector.broadcast %cst_78 : f32 to vector<8x128xf32>
    %237 = arith.addf %236, %235 : vector<8x128xf32>
    %238 = arith.divf %236, %237 : vector<8x128xf32>
    %239 = vector.extract_strided_slice %225 {offsets = [0, 128], sizes = [8, 128], strides = [1, 1]} : vector<8x384xf32> to vector<8x128xf32>
    %240 = vector.extract_strided_slice %230 {offsets = [0, 128], sizes = [8, 128], strides = [1, 1]} : vector<8x384xf32> to vector<8x128xf32>
    %241 = arith.addf %239, %240 : vector<8x128xf32>
    %242 = arith.negf %241 : vector<8x128xf32>
    %243 = math.exp %242 : vector<8x128xf32>
    %cst_79 = arith.constant 1.000000e+00 : f32
    %244 = vector.broadcast %cst_79 : f32 to vector<8x128xf32>
    %245 = arith.addf %244, %243 : vector<8x128xf32>
    %246 = arith.divf %244, %245 : vector<8x128xf32>
    %247 = vector.extract_strided_slice %225 {offsets = [0, 256], sizes = [8, 128], strides = [1, 1]} : vector<8x384xf32> to vector<8x128xf32>
    %248 = vector.extract_strided_slice %230 {offsets = [0, 256], sizes = [8, 128], strides = [1, 1]} : vector<8x384xf32> to vector<8x128xf32>
    %249 = arith.mulf %238, %248 : vector<8x128xf32>
    %250 = arith.addf %247, %249 : vector<8x128xf32>
    %251 = math.tanh %250 : vector<8x128xf32>
    %cst_80 = arith.constant 1.000000e+00 : f32
    %252 = vector.broadcast %cst_80 : f32 to vector<8x128xf32>
    %253 = arith.subf %252, %246 : vector<8x128xf32>
    %254 = arith.mulf %253, %251 : vector<8x128xf32>
    %255 = arith.mulf %246, %221 : vector<8x128xf32>
    %256 = arith.addf %254, %255 : vector<8x128xf32>
    %c7_i32 = arith.constant 7 : i32
    %c8_i32_81 = arith.constant 8 : i32
    %257 = arith.muli %c7_i32, %c8_i32_81 : i32
    %258 = tpu.assume_multiple %257, 8 : i32
    %259 = arith.index_cast %258 : i32 to index
    %c0_82 = arith.constant 0 : index
    %260 = vector.load %arg10[%259, %c0_82] : memref<64x384xf32, #tpu.memory_space<vmem>>, vector<8x384xf32>
    %c0_83 = arith.constant 0 : index
    %c0_84 = arith.constant 0 : index
    %261 = vector.load %arg3[%c0_83, %c0_84] : memref<128x384xf32, #tpu.memory_space<vmem>>, vector<128x384xf32>
    %cst_85 = arith.constant dense<0.000000e+00> : vector<8x384xf32>
    %262 = tpu.matmul %256, %261, %cst_85 {dimension_numbers = #tpu.dot_dimension_numbers<[1], [0], [0], [1], [0, 0, 1, 1], [], []>} : vector<8x128xf32>, vector<128x384xf32>, vector<8x384xf32> -> vector<8x384xf32>
    %c0_86 = arith.constant 0 : index
    %c0_87 = arith.constant 0 : index
    %263 = vector.load %arg5[%c0_86, %c0_87] : memref<1x384xf32, #tpu.memory_space<vmem>>, vector<1x384xf32>
    %264 = vector.broadcast %263 : vector<1x384xf32> to vector<8x384xf32>
    %265 = arith.addf %262, %264 : vector<8x384xf32>
    %266 = vector.extract_strided_slice %260 {offsets = [0, 0], sizes = [8, 128], strides = [1, 1]} : vector<8x384xf32> to vector<8x128xf32>
    %267 = vector.extract_strided_slice %265 {offsets = [0, 0], sizes = [8, 128], strides = [1, 1]} : vector<8x384xf32> to vector<8x128xf32>
    %268 = arith.addf %266, %267 : vector<8x128xf32>
    %269 = arith.negf %268 : vector<8x128xf32>
    %270 = math.exp %269 : vector<8x128xf32>
    %cst_88 = arith.constant 1.000000e+00 : f32
    %271 = vector.broadcast %cst_88 : f32 to vector<8x128xf32>
    %272 = arith.addf %271, %270 : vector<8x128xf32>
    %273 = arith.divf %271, %272 : vector<8x128xf32>
    %274 = vector.extract_strided_slice %260 {offsets = [0, 128], sizes = [8, 128], strides = [1, 1]} : vector<8x384xf32> to vector<8x128xf32>
    %275 = vector.extract_strided_slice %265 {offsets = [0, 128], sizes = [8, 128], strides = [1, 1]} : vector<8x384xf32> to vector<8x128xf32>
    %276 = arith.addf %274, %275 : vector<8x128xf32>
    %277 = arith.negf %276 : vector<8x128xf32>
    %278 = math.exp %277 : vector<8x128xf32>
    %cst_89 = arith.constant 1.000000e+00 : f32
    %279 = vector.broadcast %cst_89 : f32 to vector<8x128xf32>
    %280 = arith.addf %279, %278 : vector<8x128xf32>
    %281 = arith.divf %279, %280 : vector<8x128xf32>
    %282 = vector.extract_strided_slice %260 {offsets = [0, 256], sizes = [8, 128], strides = [1, 1]} : vector<8x384xf32> to vector<8x128xf32>
    %283 = vector.extract_strided_slice %265 {offsets = [0, 256], sizes = [8, 128], strides = [1, 1]} : vector<8x384xf32> to vector<8x128xf32>
    %284 = arith.mulf %273, %283 : vector<8x128xf32>
    %285 = arith.addf %282, %284 : vector<8x128xf32>
    %286 = math.tanh %285 : vector<8x128xf32>
    %cst_90 = arith.constant 1.000000e+00 : f32
    %287 = vector.broadcast %cst_90 : f32 to vector<8x128xf32>
    %288 = arith.subf %287, %281 : vector<8x128xf32>
    %289 = arith.mulf %288, %286 : vector<8x128xf32>
    %290 = arith.mulf %281, %256 : vector<8x128xf32>
    %291 = arith.addf %289, %290 : vector<8x128xf32>
    %c8_i32_91 = arith.constant 8 : i32
    %c0_92 = arith.constant 0 : index
    %c0_93 = arith.constant 0 : index
    %292 = vector.load %arg9[%c0_92, %c0_93] : memref<8x128xf32, #tpu.memory_space<vmem>>, vector<8x128xf32>
    tpu.vector_store %arg9[%c0_92, %c0_93], %291 {strides = array<i32>} : memref<8x128xf32, #tpu.memory_space<vmem>>, vector<8x128xf32>,
    %c0_i32_94 = arith.constant 0 : i32
    %293 = arith.cmpi eq, %arg0, %c0_i32_94 : i32
    %294 = arith.extui %293 : i1 to i32
    %c0_i32_95 = arith.constant 0 : i32
    %295 = arith.cmpi ne, %294, %c0_i32_95 : i32
    scf.if %295 {
      %c0_96 = arith.constant 0 : index
      %c0_97 = arith.constant 0 : index
      %296 = vector.load %arg6[%c0_96, %c0_97] : memref<128x128xf32, #tpu.memory_space<vmem>>, vector<128x128xf32>
      %cst_98 = arith.constant dense<0.000000e+00> : vector<8x128xf32>
      %297 = tpu.matmul %291, %296, %cst_98 {dimension_numbers = #tpu.dot_dimension_numbers<[1], [0], [0], [1], [0, 0, 1, 1], [], []>} : vector<8x128xf32>, vector<128x128xf32>, vector<8x128xf32> -> vector<8x128xf32>
      %c0_99 = arith.constant 0 : index
      %c0_100 = arith.constant 0 : index
      %298 = vector.load %arg7[%c0_99, %c0_100] : memref<1x128xf32, #tpu.memory_space<vmem>>, vector<1x128xf32>
      %299 = vector.broadcast %298 : vector<1x128xf32> to vector<8x128xf32>
      %300 = arith.addf %297, %299 : vector<8x128xf32>
      %c0_101 = arith.constant 0 : index
      %c0_102 = arith.constant 0 : index
      %301 = vector.load %arg8[%c0_101, %c0_102] : memref<8x128xf32, #tpu.memory_space<vmem>>, vector<8x128xf32>
      tpu.vector_store %arg8[%c0_101, %c0_102], %300 {strides = array<i32>} : memref<8x128xf32, #tpu.memory_space<vmem>>, vector<8x128xf32>,
    } else {
    }
    return
  }
  func.func @transform_0(%arg0: i32) -> (i32, i32, i32) {
    %c0_i32 = arith.constant 0 : i32
    %c0_i32_0 = arith.constant 0 : i32
    %c0_i32_1 = arith.constant 0 : i32
    return %arg0, %c0_i32, %c0_i32_0 : i32, i32, i32
  }
  func.func @transform_1(%arg0: i32) -> (i32, i32) {
    %c0_i32 = arith.constant 0 : i32
    %c0_i32_0 = arith.constant 0 : i32
    %c0_i32_1 = arith.constant 0 : i32
    return %c0_i32, %c0_i32_0 : i32, i32
  }
  func.func @transform_2(%arg0: i32) -> (i32, i32) {
    %c0_i32 = arith.constant 0 : i32
    %c0_i32_0 = arith.constant 0 : i32
    %c0_i32_1 = arith.constant 0 : i32
    return %c0_i32, %c0_i32_0 : i32, i32
  }
  func.func @transform_3(%arg0: i32) -> (i32, i32) {
    %c0_i32 = arith.constant 0 : i32
    %c0_i32_0 = arith.constant 0 : i32
    %c0_i32_1 = arith.constant 0 : i32
    return %c0_i32, %c0_i32_0 : i32, i32
  }
  func.func @transform_4(%arg0: i32) -> (i32, i32) {
    %c0_i32 = arith.constant 0 : i32
    %c0_i32_0 = arith.constant 0 : i32
    %c0_i32_1 = arith.constant 0 : i32
    return %c0_i32, %c0_i32_0 : i32, i32
  }
  func.func @transform_5(%arg0: i32) -> (i32, i32) {
    %c0_i32 = arith.constant 0 : i32
    %c0_i32_0 = arith.constant 0 : i32
    %c0_i32_1 = arith.constant 0 : i32
    return %c0_i32, %c0_i32_0 : i32, i32
  }
  func.func @transform_6(%arg0: i32) -> (i32, i32) {
    %c0_i32 = arith.constant 0 : i32
    %c0_i32_0 = arith.constant 0 : i32
    %c0_i32_1 = arith.constant 0 : i32
    return %c0_i32, %c0_i32_0 : i32, i32
  }
  func.func @transform_7(%arg0: i32) -> (i32, i32) {
    %c0_i32 = arith.constant 0 : i32
    %c0_i32_0 = arith.constant 0 : i32
    %c0_i32_1 = arith.constant 0 : i32
    return %c0_i32, %c0_i32_0 : i32, i32
  }
}

module attributes {stable_mosaic.version = 11 : i64} {
  func.func @gru_layer_kernel(%arg0: i32, %arg1: memref<8x8x16xf32, #tpu.memory_space<vmem>>, %arg2: memref<16x384xf32, #tpu.memory_space<vmem>>, %arg3: memref<128x384xf32, #tpu.memory_space<vmem>>, %arg4: memref<1x384xf32, #tpu.memory_space<vmem>>, %arg5: memref<1x384xf32, #tpu.memory_space<vmem>>, %arg6: memref<8x8x128xf32, #tpu.memory_space<vmem>>, %arg7: memref<8x128xf32, #tpu.memory_space<vmem>>, %arg8: memref<64x384xf32, #tpu.memory_space<vmem>>) attributes {dimension_semantics = [#tpu.dimension_semantics<arbitrary>], iteration_bounds = array<i64: 1>, scalar_prefetch = 0 : i64, scratch_operands = 2 : i64, tpu.core_type = #tpu.core_type<tc>, window_params = [{transform_indices = @transform_0, window_bounds = array<i64: 8, 8, 16>}, {pipeline_mode = #tpu.pipeline_mode<synchronous>, transform_indices = @transform_1, window_bounds = array<i64: 16, 384>}, {pipeline_mode = #tpu.pipeline_mode<synchronous>, transform_indices = @transform_2, window_bounds = array<i64: 128, 384>}, {pipeline_mode = #tpu.pipeline_mode<synchronous>, transform_indices = @transform_3, window_bounds = array<i64: 1, 384>}, {pipeline_mode = #tpu.pipeline_mode<synchronous>, transform_indices = @transform_4, window_bounds = array<i64: 1, 384>}, {transform_indices = @transform_5, window_bounds = array<i64: 8, 8, 128>}]} {
    %c0_i32 = arith.constant 0 : i32
    %0 = arith.cmpi eq, %arg0, %c0_i32 : i32
    %1 = arith.extui %0 : i1 to i32
    %c0_i32_0 = arith.constant 0 : i32
    %2 = arith.cmpi ne, %1, %c0_i32_0 : i32
    scf.if %2 {
      %cst_110 = arith.constant 0.000000e+00 : f32
      %325 = vector.broadcast %cst_110 : f32 to vector<8x128xf32>
      %c0_111 = arith.constant 0 : index
      %c0_112 = arith.constant 0 : index
      %326 = vector.load %arg7[%c0_111, %c0_112] : memref<8x128xf32, #tpu.memory_space<vmem>>, vector<8x128xf32>
      tpu.vector_store %arg7[%c0_111, %c0_112], %325 {strides = array<i32>} : memref<8x128xf32, #tpu.memory_space<vmem>>, vector<8x128xf32>,
    } else {
    }
    %c0 = arith.constant 0 : index
    %c0_1 = arith.constant 0 : index
    %c0_2 = arith.constant 0 : index
    %3 = vector.load %arg1[%c0, %c0_1, %c0_2] : memref<8x8x16xf32, #tpu.memory_space<vmem>>, vector<8x8x16xf32>
    %4 = vector.shape_cast %3 : vector<8x8x16xf32> to vector<64x16xf32>
    %c0_3 = arith.constant 0 : index
    %c0_4 = arith.constant 0 : index
    %5 = vector.load %arg2[%c0_3, %c0_4] : memref<16x384xf32, #tpu.memory_space<vmem>>, vector<16x384xf32>
    %cst = arith.constant dense<0.000000e+00> : vector<64x384xf32>
    %6 = tpu.matmul %4, %5, %cst {dimension_numbers = #tpu.dot_dimension_numbers<[1], [0], [0], [1], [0, 0, 1, 1], [], []>} : vector<64x16xf32>, vector<16x384xf32>, vector<64x384xf32> -> vector<64x384xf32>
    %c0_5 = arith.constant 0 : index
    %c0_6 = arith.constant 0 : index
    %7 = vector.load %arg4[%c0_5, %c0_6] : memref<1x384xf32, #tpu.memory_space<vmem>>, vector<1x384xf32>
    %8 = vector.broadcast %7 : vector<1x384xf32> to vector<64x384xf32>
    %9 = arith.addf %6, %8 : vector<64x384xf32>
    %c0_7 = arith.constant 0 : index
    %c0_8 = arith.constant 0 : index
    %10 = vector.load %arg8[%c0_7, %c0_8] : memref<64x384xf32, #tpu.memory_space<vmem>>, vector<64x384xf32>
    tpu.vector_store %arg8[%c0_7, %c0_8], %9 {strides = array<i32>} : memref<64x384xf32, #tpu.memory_space<vmem>>, vector<64x384xf32>,
    %c0_9 = arith.constant 0 : index
    %c0_10 = arith.constant 0 : index
    %11 = vector.load %arg7[%c0_9, %c0_10] : memref<8x128xf32, #tpu.memory_space<vmem>>, vector<8x128xf32>
    %c0_i32_11 = arith.constant 0 : i32
    %c8_i32 = arith.constant 8 : i32
    %12 = arith.muli %c0_i32_11, %c8_i32 : i32
    %13 = tpu.assume_multiple %12, 8 : i32
    %14 = arith.index_cast %13 : i32 to index
    %c0_12 = arith.constant 0 : index
    %15 = vector.load %arg8[%14, %c0_12] : memref<64x384xf32, #tpu.memory_space<vmem>>, vector<8x384xf32>
    %c0_13 = arith.constant 0 : index
    %c0_14 = arith.constant 0 : index
    %16 = vector.load %arg3[%c0_13, %c0_14] : memref<128x384xf32, #tpu.memory_space<vmem>>, vector<128x384xf32>
    %cst_15 = arith.constant dense<0.000000e+00> : vector<8x384xf32>
    %17 = tpu.matmul %11, %16, %cst_15 {dimension_numbers = #tpu.dot_dimension_numbers<[1], [0], [0], [1], [0, 0, 1, 1], [], []>} : vector<8x128xf32>, vector<128x384xf32>, vector<8x384xf32> -> vector<8x384xf32>
    %c0_16 = arith.constant 0 : index
    %c0_17 = arith.constant 0 : index
    %18 = vector.load %arg5[%c0_16, %c0_17] : memref<1x384xf32, #tpu.memory_space<vmem>>, vector<1x384xf32>
    %19 = vector.broadcast %18 : vector<1x384xf32> to vector<8x384xf32>
    %20 = arith.addf %17, %19 : vector<8x384xf32>
    %21 = vector.extract_strided_slice %15 {offsets = [0, 0], sizes = [8, 128], strides = [1, 1]} : vector<8x384xf32> to vector<8x128xf32>
    %22 = vector.extract_strided_slice %20 {offsets = [0, 0], sizes = [8, 128], strides = [1, 1]} : vector<8x384xf32> to vector<8x128xf32>
    %23 = arith.addf %21, %22 : vector<8x128xf32>
    %24 = arith.negf %23 : vector<8x128xf32>
    %25 = math.exp %24 : vector<8x128xf32>
    %cst_18 = arith.constant 1.000000e+00 : f32
    %26 = vector.broadcast %cst_18 : f32 to vector<8x128xf32>
    %27 = arith.addf %26, %25 : vector<8x128xf32>
    %28 = arith.divf %26, %27 : vector<8x128xf32>
    %29 = vector.extract_strided_slice %15 {offsets = [0, 128], sizes = [8, 128], strides = [1, 1]} : vector<8x384xf32> to vector<8x128xf32>
    %30 = vector.extract_strided_slice %20 {offsets = [0, 128], sizes = [8, 128], strides = [1, 1]} : vector<8x384xf32> to vector<8x128xf32>
    %31 = arith.addf %29, %30 : vector<8x128xf32>
    %32 = arith.negf %31 : vector<8x128xf32>
    %33 = math.exp %32 : vector<8x128xf32>
    %cst_19 = arith.constant 1.000000e+00 : f32
    %34 = vector.broadcast %cst_19 : f32 to vector<8x128xf32>
    %35 = arith.addf %34, %33 : vector<8x128xf32>
    %36 = arith.divf %34, %35 : vector<8x128xf32>
    %37 = vector.extract_strided_slice %15 {offsets = [0, 256], sizes = [8, 128], strides = [1, 1]} : vector<8x384xf32> to vector<8x128xf32>
    %38 = vector.extract_strided_slice %20 {offsets = [0, 256], sizes = [8, 128], strides = [1, 1]} : vector<8x384xf32> to vector<8x128xf32>
    %39 = arith.mulf %28, %38 : vector<8x128xf32>
    %40 = arith.addf %37, %39 : vector<8x128xf32>
    %41 = math.tanh %40 : vector<8x128xf32>
    %cst_20 = arith.constant 1.000000e+00 : f32
    %42 = vector.broadcast %cst_20 : f32 to vector<8x128xf32>
    %43 = arith.subf %42, %36 : vector<8x128xf32>
    %44 = arith.mulf %43, %41 : vector<8x128xf32>
    %45 = arith.mulf %36, %11 : vector<8x128xf32>
    %46 = arith.addf %44, %45 : vector<8x128xf32>
    %47 = arith.index_cast %c0_i32_11 : i32 to index
    %c0_21 = arith.constant 0 : index
    %c0_22 = arith.constant 0 : index
    %48 = vector.load %arg6[%47, %c0_21, %c0_22] : memref<8x8x128xf32, #tpu.memory_space<vmem>>, vector<1x8x128xf32>
    %49 = vector.shape_cast %48 : vector<1x8x128xf32> to vector<8x128xf32>
    %50 = vector.shape_cast %46 : vector<8x128xf32> to vector<1x8x128xf32>
    tpu.vector_store %arg6[%47, %c0_21, %c0_22], %50 {strides = array<i32>} : memref<8x8x128xf32, #tpu.memory_space<vmem>>, vector<1x8x128xf32>,
    %c1_i32 = arith.constant 1 : i32
    %c8_i32_23 = arith.constant 8 : i32
    %51 = arith.muli %c1_i32, %c8_i32_23 : i32
    %52 = tpu.assume_multiple %51, 8 : i32
    %53 = arith.index_cast %52 : i32 to index
    %c0_24 = arith.constant 0 : index
    %54 = vector.load %arg8[%53, %c0_24] : memref<64x384xf32, #tpu.memory_space<vmem>>, vector<8x384xf32>
    %c0_25 = arith.constant 0 : index
    %c0_26 = arith.constant 0 : index
    %55 = vector.load %arg3[%c0_25, %c0_26] : memref<128x384xf32, #tpu.memory_space<vmem>>, vector<128x384xf32>
    %cst_27 = arith.constant dense<0.000000e+00> : vector<8x384xf32>
    %56 = tpu.matmul %46, %55, %cst_27 {dimension_numbers = #tpu.dot_dimension_numbers<[1], [0], [0], [1], [0, 0, 1, 1], [], []>} : vector<8x128xf32>, vector<128x384xf32>, vector<8x384xf32> -> vector<8x384xf32>
    %c0_28 = arith.constant 0 : index
    %c0_29 = arith.constant 0 : index
    %57 = vector.load %arg5[%c0_28, %c0_29] : memref<1x384xf32, #tpu.memory_space<vmem>>, vector<1x384xf32>
    %58 = vector.broadcast %57 : vector<1x384xf32> to vector<8x384xf32>
    %59 = arith.addf %56, %58 : vector<8x384xf32>
    %60 = vector.extract_strided_slice %54 {offsets = [0, 0], sizes = [8, 128], strides = [1, 1]} : vector<8x384xf32> to vector<8x128xf32>
    %61 = vector.extract_strided_slice %59 {offsets = [0, 0], sizes = [8, 128], strides = [1, 1]} : vector<8x384xf32> to vector<8x128xf32>
    %62 = arith.addf %60, %61 : vector<8x128xf32>
    %63 = arith.negf %62 : vector<8x128xf32>
    %64 = math.exp %63 : vector<8x128xf32>
    %cst_30 = arith.constant 1.000000e+00 : f32
    %65 = vector.broadcast %cst_30 : f32 to vector<8x128xf32>
    %66 = arith.addf %65, %64 : vector<8x128xf32>
    %67 = arith.divf %65, %66 : vector<8x128xf32>
    %68 = vector.extract_strided_slice %54 {offsets = [0, 128], sizes = [8, 128], strides = [1, 1]} : vector<8x384xf32> to vector<8x128xf32>
    %69 = vector.extract_strided_slice %59 {offsets = [0, 128], sizes = [8, 128], strides = [1, 1]} : vector<8x384xf32> to vector<8x128xf32>
    %70 = arith.addf %68, %69 : vector<8x128xf32>
    %71 = arith.negf %70 : vector<8x128xf32>
    %72 = math.exp %71 : vector<8x128xf32>
    %cst_31 = arith.constant 1.000000e+00 : f32
    %73 = vector.broadcast %cst_31 : f32 to vector<8x128xf32>
    %74 = arith.addf %73, %72 : vector<8x128xf32>
    %75 = arith.divf %73, %74 : vector<8x128xf32>
    %76 = vector.extract_strided_slice %54 {offsets = [0, 256], sizes = [8, 128], strides = [1, 1]} : vector<8x384xf32> to vector<8x128xf32>
    %77 = vector.extract_strided_slice %59 {offsets = [0, 256], sizes = [8, 128], strides = [1, 1]} : vector<8x384xf32> to vector<8x128xf32>
    %78 = arith.mulf %67, %77 : vector<8x128xf32>
    %79 = arith.addf %76, %78 : vector<8x128xf32>
    %80 = math.tanh %79 : vector<8x128xf32>
    %cst_32 = arith.constant 1.000000e+00 : f32
    %81 = vector.broadcast %cst_32 : f32 to vector<8x128xf32>
    %82 = arith.subf %81, %75 : vector<8x128xf32>
    %83 = arith.mulf %82, %80 : vector<8x128xf32>
    %84 = arith.mulf %75, %46 : vector<8x128xf32>
    %85 = arith.addf %83, %84 : vector<8x128xf32>
    %86 = arith.index_cast %c1_i32 : i32 to index
    %c0_33 = arith.constant 0 : index
    %c0_34 = arith.constant 0 : index
    %87 = vector.load %arg6[%86, %c0_33, %c0_34] : memref<8x8x128xf32, #tpu.memory_space<vmem>>, vector<1x8x128xf32>
    %88 = vector.shape_cast %87 : vector<1x8x128xf32> to vector<8x128xf32>
    %89 = vector.shape_cast %85 : vector<8x128xf32> to vector<1x8x128xf32>
    tpu.vector_store %arg6[%86, %c0_33, %c0_34], %89 {strides = array<i32>} : memref<8x8x128xf32, #tpu.memory_space<vmem>>, vector<1x8x128xf32>,
    %c2_i32 = arith.constant 2 : i32
    %c8_i32_35 = arith.constant 8 : i32
    %90 = arith.muli %c2_i32, %c8_i32_35 : i32
    %91 = tpu.assume_multiple %90, 8 : i32
    %92 = arith.index_cast %91 : i32 to index
    %c0_36 = arith.constant 0 : index
    %93 = vector.load %arg8[%92, %c0_36] : memref<64x384xf32, #tpu.memory_space<vmem>>, vector<8x384xf32>
    %c0_37 = arith.constant 0 : index
    %c0_38 = arith.constant 0 : index
    %94 = vector.load %arg3[%c0_37, %c0_38] : memref<128x384xf32, #tpu.memory_space<vmem>>, vector<128x384xf32>
    %cst_39 = arith.constant dense<0.000000e+00> : vector<8x384xf32>
    %95 = tpu.matmul %85, %94, %cst_39 {dimension_numbers = #tpu.dot_dimension_numbers<[1], [0], [0], [1], [0, 0, 1, 1], [], []>} : vector<8x128xf32>, vector<128x384xf32>, vector<8x384xf32> -> vector<8x384xf32>
    %c0_40 = arith.constant 0 : index
    %c0_41 = arith.constant 0 : index
    %96 = vector.load %arg5[%c0_40, %c0_41] : memref<1x384xf32, #tpu.memory_space<vmem>>, vector<1x384xf32>
    %97 = vector.broadcast %96 : vector<1x384xf32> to vector<8x384xf32>
    %98 = arith.addf %95, %97 : vector<8x384xf32>
    %99 = vector.extract_strided_slice %93 {offsets = [0, 0], sizes = [8, 128], strides = [1, 1]} : vector<8x384xf32> to vector<8x128xf32>
    %100 = vector.extract_strided_slice %98 {offsets = [0, 0], sizes = [8, 128], strides = [1, 1]} : vector<8x384xf32> to vector<8x128xf32>
    %101 = arith.addf %99, %100 : vector<8x128xf32>
    %102 = arith.negf %101 : vector<8x128xf32>
    %103 = math.exp %102 : vector<8x128xf32>
    %cst_42 = arith.constant 1.000000e+00 : f32
    %104 = vector.broadcast %cst_42 : f32 to vector<8x128xf32>
    %105 = arith.addf %104, %103 : vector<8x128xf32>
    %106 = arith.divf %104, %105 : vector<8x128xf32>
    %107 = vector.extract_strided_slice %93 {offsets = [0, 128], sizes = [8, 128], strides = [1, 1]} : vector<8x384xf32> to vector<8x128xf32>
    %108 = vector.extract_strided_slice %98 {offsets = [0, 128], sizes = [8, 128], strides = [1, 1]} : vector<8x384xf32> to vector<8x128xf32>
    %109 = arith.addf %107, %108 : vector<8x128xf32>
    %110 = arith.negf %109 : vector<8x128xf32>
    %111 = math.exp %110 : vector<8x128xf32>
    %cst_43 = arith.constant 1.000000e+00 : f32
    %112 = vector.broadcast %cst_43 : f32 to vector<8x128xf32>
    %113 = arith.addf %112, %111 : vector<8x128xf32>
    %114 = arith.divf %112, %113 : vector<8x128xf32>
    %115 = vector.extract_strided_slice %93 {offsets = [0, 256], sizes = [8, 128], strides = [1, 1]} : vector<8x384xf32> to vector<8x128xf32>
    %116 = vector.extract_strided_slice %98 {offsets = [0, 256], sizes = [8, 128], strides = [1, 1]} : vector<8x384xf32> to vector<8x128xf32>
    %117 = arith.mulf %106, %116 : vector<8x128xf32>
    %118 = arith.addf %115, %117 : vector<8x128xf32>
    %119 = math.tanh %118 : vector<8x128xf32>
    %cst_44 = arith.constant 1.000000e+00 : f32
    %120 = vector.broadcast %cst_44 : f32 to vector<8x128xf32>
    %121 = arith.subf %120, %114 : vector<8x128xf32>
    %122 = arith.mulf %121, %119 : vector<8x128xf32>
    %123 = arith.mulf %114, %85 : vector<8x128xf32>
    %124 = arith.addf %122, %123 : vector<8x128xf32>
    %125 = arith.index_cast %c2_i32 : i32 to index
    %c0_45 = arith.constant 0 : index
    %c0_46 = arith.constant 0 : index
    %126 = vector.load %arg6[%125, %c0_45, %c0_46] : memref<8x8x128xf32, #tpu.memory_space<vmem>>, vector<1x8x128xf32>
    %127 = vector.shape_cast %126 : vector<1x8x128xf32> to vector<8x128xf32>
    %128 = vector.shape_cast %124 : vector<8x128xf32> to vector<1x8x128xf32>
    tpu.vector_store %arg6[%125, %c0_45, %c0_46], %128 {strides = array<i32>} : memref<8x8x128xf32, #tpu.memory_space<vmem>>, vector<1x8x128xf32>,
    %c3_i32 = arith.constant 3 : i32
    %c8_i32_47 = arith.constant 8 : i32
    %129 = arith.muli %c3_i32, %c8_i32_47 : i32
    %130 = tpu.assume_multiple %129, 8 : i32
    %131 = arith.index_cast %130 : i32 to index
    %c0_48 = arith.constant 0 : index
    %132 = vector.load %arg8[%131, %c0_48] : memref<64x384xf32, #tpu.memory_space<vmem>>, vector<8x384xf32>
    %c0_49 = arith.constant 0 : index
    %c0_50 = arith.constant 0 : index
    %133 = vector.load %arg3[%c0_49, %c0_50] : memref<128x384xf32, #tpu.memory_space<vmem>>, vector<128x384xf32>
    %cst_51 = arith.constant dense<0.000000e+00> : vector<8x384xf32>
    %134 = tpu.matmul %124, %133, %cst_51 {dimension_numbers = #tpu.dot_dimension_numbers<[1], [0], [0], [1], [0, 0, 1, 1], [], []>} : vector<8x128xf32>, vector<128x384xf32>, vector<8x384xf32> -> vector<8x384xf32>
    %c0_52 = arith.constant 0 : index
    %c0_53 = arith.constant 0 : index
    %135 = vector.load %arg5[%c0_52, %c0_53] : memref<1x384xf32, #tpu.memory_space<vmem>>, vector<1x384xf32>
    %136 = vector.broadcast %135 : vector<1x384xf32> to vector<8x384xf32>
    %137 = arith.addf %134, %136 : vector<8x384xf32>
    %138 = vector.extract_strided_slice %132 {offsets = [0, 0], sizes = [8, 128], strides = [1, 1]} : vector<8x384xf32> to vector<8x128xf32>
    %139 = vector.extract_strided_slice %137 {offsets = [0, 0], sizes = [8, 128], strides = [1, 1]} : vector<8x384xf32> to vector<8x128xf32>
    %140 = arith.addf %138, %139 : vector<8x128xf32>
    %141 = arith.negf %140 : vector<8x128xf32>
    %142 = math.exp %141 : vector<8x128xf32>
    %cst_54 = arith.constant 1.000000e+00 : f32
    %143 = vector.broadcast %cst_54 : f32 to vector<8x128xf32>
    %144 = arith.addf %143, %142 : vector<8x128xf32>
    %145 = arith.divf %143, %144 : vector<8x128xf32>
    %146 = vector.extract_strided_slice %132 {offsets = [0, 128], sizes = [8, 128], strides = [1, 1]} : vector<8x384xf32> to vector<8x128xf32>
    %147 = vector.extract_strided_slice %137 {offsets = [0, 128], sizes = [8, 128], strides = [1, 1]} : vector<8x384xf32> to vector<8x128xf32>
    %148 = arith.addf %146, %147 : vector<8x128xf32>
    %149 = arith.negf %148 : vector<8x128xf32>
    %150 = math.exp %149 : vector<8x128xf32>
    %cst_55 = arith.constant 1.000000e+00 : f32
    %151 = vector.broadcast %cst_55 : f32 to vector<8x128xf32>
    %152 = arith.addf %151, %150 : vector<8x128xf32>
    %153 = arith.divf %151, %152 : vector<8x128xf32>
    %154 = vector.extract_strided_slice %132 {offsets = [0, 256], sizes = [8, 128], strides = [1, 1]} : vector<8x384xf32> to vector<8x128xf32>
    %155 = vector.extract_strided_slice %137 {offsets = [0, 256], sizes = [8, 128], strides = [1, 1]} : vector<8x384xf32> to vector<8x128xf32>
    %156 = arith.mulf %145, %155 : vector<8x128xf32>
    %157 = arith.addf %154, %156 : vector<8x128xf32>
    %158 = math.tanh %157 : vector<8x128xf32>
    %cst_56 = arith.constant 1.000000e+00 : f32
    %159 = vector.broadcast %cst_56 : f32 to vector<8x128xf32>
    %160 = arith.subf %159, %153 : vector<8x128xf32>
    %161 = arith.mulf %160, %158 : vector<8x128xf32>
    %162 = arith.mulf %153, %124 : vector<8x128xf32>
    %163 = arith.addf %161, %162 : vector<8x128xf32>
    %164 = arith.index_cast %c3_i32 : i32 to index
    %c0_57 = arith.constant 0 : index
    %c0_58 = arith.constant 0 : index
    %165 = vector.load %arg6[%164, %c0_57, %c0_58] : memref<8x8x128xf32, #tpu.memory_space<vmem>>, vector<1x8x128xf32>
    %166 = vector.shape_cast %165 : vector<1x8x128xf32> to vector<8x128xf32>
    %167 = vector.shape_cast %163 : vector<8x128xf32> to vector<1x8x128xf32>
    tpu.vector_store %arg6[%164, %c0_57, %c0_58], %167 {strides = array<i32>} : memref<8x8x128xf32, #tpu.memory_space<vmem>>, vector<1x8x128xf32>,
    %c4_i32 = arith.constant 4 : i32
    %c8_i32_59 = arith.constant 8 : i32
    %168 = arith.muli %c4_i32, %c8_i32_59 : i32
    %169 = tpu.assume_multiple %168, 8 : i32
    %170 = arith.index_cast %169 : i32 to index
    %c0_60 = arith.constant 0 : index
    %171 = vector.load %arg8[%170, %c0_60] : memref<64x384xf32, #tpu.memory_space<vmem>>, vector<8x384xf32>
    %c0_61 = arith.constant 0 : index
    %c0_62 = arith.constant 0 : index
    %172 = vector.load %arg3[%c0_61, %c0_62] : memref<128x384xf32, #tpu.memory_space<vmem>>, vector<128x384xf32>
    %cst_63 = arith.constant dense<0.000000e+00> : vector<8x384xf32>
    %173 = tpu.matmul %163, %172, %cst_63 {dimension_numbers = #tpu.dot_dimension_numbers<[1], [0], [0], [1], [0, 0, 1, 1], [], []>} : vector<8x128xf32>, vector<128x384xf32>, vector<8x384xf32> -> vector<8x384xf32>
    %c0_64 = arith.constant 0 : index
    %c0_65 = arith.constant 0 : index
    %174 = vector.load %arg5[%c0_64, %c0_65] : memref<1x384xf32, #tpu.memory_space<vmem>>, vector<1x384xf32>
    %175 = vector.broadcast %174 : vector<1x384xf32> to vector<8x384xf32>
    %176 = arith.addf %173, %175 : vector<8x384xf32>
    %177 = vector.extract_strided_slice %171 {offsets = [0, 0], sizes = [8, 128], strides = [1, 1]} : vector<8x384xf32> to vector<8x128xf32>
    %178 = vector.extract_strided_slice %176 {offsets = [0, 0], sizes = [8, 128], strides = [1, 1]} : vector<8x384xf32> to vector<8x128xf32>
    %179 = arith.addf %177, %178 : vector<8x128xf32>
    %180 = arith.negf %179 : vector<8x128xf32>
    %181 = math.exp %180 : vector<8x128xf32>
    %cst_66 = arith.constant 1.000000e+00 : f32
    %182 = vector.broadcast %cst_66 : f32 to vector<8x128xf32>
    %183 = arith.addf %182, %181 : vector<8x128xf32>
    %184 = arith.divf %182, %183 : vector<8x128xf32>
    %185 = vector.extract_strided_slice %171 {offsets = [0, 128], sizes = [8, 128], strides = [1, 1]} : vector<8x384xf32> to vector<8x128xf32>
    %186 = vector.extract_strided_slice %176 {offsets = [0, 128], sizes = [8, 128], strides = [1, 1]} : vector<8x384xf32> to vector<8x128xf32>
    %187 = arith.addf %185, %186 : vector<8x128xf32>
    %188 = arith.negf %187 : vector<8x128xf32>
    %189 = math.exp %188 : vector<8x128xf32>
    %cst_67 = arith.constant 1.000000e+00 : f32
    %190 = vector.broadcast %cst_67 : f32 to vector<8x128xf32>
    %191 = arith.addf %190, %189 : vector<8x128xf32>
    %192 = arith.divf %190, %191 : vector<8x128xf32>
    %193 = vector.extract_strided_slice %171 {offsets = [0, 256], sizes = [8, 128], strides = [1, 1]} : vector<8x384xf32> to vector<8x128xf32>
    %194 = vector.extract_strided_slice %176 {offsets = [0, 256], sizes = [8, 128], strides = [1, 1]} : vector<8x384xf32> to vector<8x128xf32>
    %195 = arith.mulf %184, %194 : vector<8x128xf32>
    %196 = arith.addf %193, %195 : vector<8x128xf32>
    %197 = math.tanh %196 : vector<8x128xf32>
    %cst_68 = arith.constant 1.000000e+00 : f32
    %198 = vector.broadcast %cst_68 : f32 to vector<8x128xf32>
    %199 = arith.subf %198, %192 : vector<8x128xf32>
    %200 = arith.mulf %199, %197 : vector<8x128xf32>
    %201 = arith.mulf %192, %163 : vector<8x128xf32>
    %202 = arith.addf %200, %201 : vector<8x128xf32>
    %203 = arith.index_cast %c4_i32 : i32 to index
    %c0_69 = arith.constant 0 : index
    %c0_70 = arith.constant 0 : index
    %204 = vector.load %arg6[%203, %c0_69, %c0_70] : memref<8x8x128xf32, #tpu.memory_space<vmem>>, vector<1x8x128xf32>
    %205 = vector.shape_cast %204 : vector<1x8x128xf32> to vector<8x128xf32>
    %206 = vector.shape_cast %202 : vector<8x128xf32> to vector<1x8x128xf32>
    tpu.vector_store %arg6[%203, %c0_69, %c0_70], %206 {strides = array<i32>} : memref<8x8x128xf32, #tpu.memory_space<vmem>>, vector<1x8x128xf32>,
    %c5_i32 = arith.constant 5 : i32
    %c8_i32_71 = arith.constant 8 : i32
    %207 = arith.muli %c5_i32, %c8_i32_71 : i32
    %208 = tpu.assume_multiple %207, 8 : i32
    %209 = arith.index_cast %208 : i32 to index
    %c0_72 = arith.constant 0 : index
    %210 = vector.load %arg8[%209, %c0_72] : memref<64x384xf32, #tpu.memory_space<vmem>>, vector<8x384xf32>
    %c0_73 = arith.constant 0 : index
    %c0_74 = arith.constant 0 : index
    %211 = vector.load %arg3[%c0_73, %c0_74] : memref<128x384xf32, #tpu.memory_space<vmem>>, vector<128x384xf32>
    %cst_75 = arith.constant dense<0.000000e+00> : vector<8x384xf32>
    %212 = tpu.matmul %202, %211, %cst_75 {dimension_numbers = #tpu.dot_dimension_numbers<[1], [0], [0], [1], [0, 0, 1, 1], [], []>} : vector<8x128xf32>, vector<128x384xf32>, vector<8x384xf32> -> vector<8x384xf32>
    %c0_76 = arith.constant 0 : index
    %c0_77 = arith.constant 0 : index
    %213 = vector.load %arg5[%c0_76, %c0_77] : memref<1x384xf32, #tpu.memory_space<vmem>>, vector<1x384xf32>
    %214 = vector.broadcast %213 : vector<1x384xf32> to vector<8x384xf32>
    %215 = arith.addf %212, %214 : vector<8x384xf32>
    %216 = vector.extract_strided_slice %210 {offsets = [0, 0], sizes = [8, 128], strides = [1, 1]} : vector<8x384xf32> to vector<8x128xf32>
    %217 = vector.extract_strided_slice %215 {offsets = [0, 0], sizes = [8, 128], strides = [1, 1]} : vector<8x384xf32> to vector<8x128xf32>
    %218 = arith.addf %216, %217 : vector<8x128xf32>
    %219 = arith.negf %218 : vector<8x128xf32>
    %220 = math.exp %219 : vector<8x128xf32>
    %cst_78 = arith.constant 1.000000e+00 : f32
    %221 = vector.broadcast %cst_78 : f32 to vector<8x128xf32>
    %222 = arith.addf %221, %220 : vector<8x128xf32>
    %223 = arith.divf %221, %222 : vector<8x128xf32>
    %224 = vector.extract_strided_slice %210 {offsets = [0, 128], sizes = [8, 128], strides = [1, 1]} : vector<8x384xf32> to vector<8x128xf32>
    %225 = vector.extract_strided_slice %215 {offsets = [0, 128], sizes = [8, 128], strides = [1, 1]} : vector<8x384xf32> to vector<8x128xf32>
    %226 = arith.addf %224, %225 : vector<8x128xf32>
    %227 = arith.negf %226 : vector<8x128xf32>
    %228 = math.exp %227 : vector<8x128xf32>
    %cst_79 = arith.constant 1.000000e+00 : f32
    %229 = vector.broadcast %cst_79 : f32 to vector<8x128xf32>
    %230 = arith.addf %229, %228 : vector<8x128xf32>
    %231 = arith.divf %229, %230 : vector<8x128xf32>
    %232 = vector.extract_strided_slice %210 {offsets = [0, 256], sizes = [8, 128], strides = [1, 1]} : vector<8x384xf32> to vector<8x128xf32>
    %233 = vector.extract_strided_slice %215 {offsets = [0, 256], sizes = [8, 128], strides = [1, 1]} : vector<8x384xf32> to vector<8x128xf32>
    %234 = arith.mulf %223, %233 : vector<8x128xf32>
    %235 = arith.addf %232, %234 : vector<8x128xf32>
    %236 = math.tanh %235 : vector<8x128xf32>
    %cst_80 = arith.constant 1.000000e+00 : f32
    %237 = vector.broadcast %cst_80 : f32 to vector<8x128xf32>
    %238 = arith.subf %237, %231 : vector<8x128xf32>
    %239 = arith.mulf %238, %236 : vector<8x128xf32>
    %240 = arith.mulf %231, %202 : vector<8x128xf32>
    %241 = arith.addf %239, %240 : vector<8x128xf32>
    %242 = arith.index_cast %c5_i32 : i32 to index
    %c0_81 = arith.constant 0 : index
    %c0_82 = arith.constant 0 : index
    %243 = vector.load %arg6[%242, %c0_81, %c0_82] : memref<8x8x128xf32, #tpu.memory_space<vmem>>, vector<1x8x128xf32>
    %244 = vector.shape_cast %243 : vector<1x8x128xf32> to vector<8x128xf32>
    %245 = vector.shape_cast %241 : vector<8x128xf32> to vector<1x8x128xf32>
    tpu.vector_store %arg6[%242, %c0_81, %c0_82], %245 {strides = array<i32>} : memref<8x8x128xf32, #tpu.memory_space<vmem>>, vector<1x8x128xf32>,
    %c6_i32 = arith.constant 6 : i32
    %c8_i32_83 = arith.constant 8 : i32
    %246 = arith.muli %c6_i32, %c8_i32_83 : i32
    %247 = tpu.assume_multiple %246, 8 : i32
    %248 = arith.index_cast %247 : i32 to index
    %c0_84 = arith.constant 0 : index
    %249 = vector.load %arg8[%248, %c0_84] : memref<64x384xf32, #tpu.memory_space<vmem>>, vector<8x384xf32>
    %c0_85 = arith.constant 0 : index
    %c0_86 = arith.constant 0 : index
    %250 = vector.load %arg3[%c0_85, %c0_86] : memref<128x384xf32, #tpu.memory_space<vmem>>, vector<128x384xf32>
    %cst_87 = arith.constant dense<0.000000e+00> : vector<8x384xf32>
    %251 = tpu.matmul %241, %250, %cst_87 {dimension_numbers = #tpu.dot_dimension_numbers<[1], [0], [0], [1], [0, 0, 1, 1], [], []>} : vector<8x128xf32>, vector<128x384xf32>, vector<8x384xf32> -> vector<8x384xf32>
    %c0_88 = arith.constant 0 : index
    %c0_89 = arith.constant 0 : index
    %252 = vector.load %arg5[%c0_88, %c0_89] : memref<1x384xf32, #tpu.memory_space<vmem>>, vector<1x384xf32>
    %253 = vector.broadcast %252 : vector<1x384xf32> to vector<8x384xf32>
    %254 = arith.addf %251, %253 : vector<8x384xf32>
    %255 = vector.extract_strided_slice %249 {offsets = [0, 0], sizes = [8, 128], strides = [1, 1]} : vector<8x384xf32> to vector<8x128xf32>
    %256 = vector.extract_strided_slice %254 {offsets = [0, 0], sizes = [8, 128], strides = [1, 1]} : vector<8x384xf32> to vector<8x128xf32>
    %257 = arith.addf %255, %256 : vector<8x128xf32>
    %258 = arith.negf %257 : vector<8x128xf32>
    %259 = math.exp %258 : vector<8x128xf32>
    %cst_90 = arith.constant 1.000000e+00 : f32
    %260 = vector.broadcast %cst_90 : f32 to vector<8x128xf32>
    %261 = arith.addf %260, %259 : vector<8x128xf32>
    %262 = arith.divf %260, %261 : vector<8x128xf32>
    %263 = vector.extract_strided_slice %249 {offsets = [0, 128], sizes = [8, 128], strides = [1, 1]} : vector<8x384xf32> to vector<8x128xf32>
    %264 = vector.extract_strided_slice %254 {offsets = [0, 128], sizes = [8, 128], strides = [1, 1]} : vector<8x384xf32> to vector<8x128xf32>
    %265 = arith.addf %263, %264 : vector<8x128xf32>
    %266 = arith.negf %265 : vector<8x128xf32>
    %267 = math.exp %266 : vector<8x128xf32>
    %cst_91 = arith.constant 1.000000e+00 : f32
    %268 = vector.broadcast %cst_91 : f32 to vector<8x128xf32>
    %269 = arith.addf %268, %267 : vector<8x128xf32>
    %270 = arith.divf %268, %269 : vector<8x128xf32>
    %271 = vector.extract_strided_slice %249 {offsets = [0, 256], sizes = [8, 128], strides = [1, 1]} : vector<8x384xf32> to vector<8x128xf32>
    %272 = vector.extract_strided_slice %254 {offsets = [0, 256], sizes = [8, 128], strides = [1, 1]} : vector<8x384xf32> to vector<8x128xf32>
    %273 = arith.mulf %262, %272 : vector<8x128xf32>
    %274 = arith.addf %271, %273 : vector<8x128xf32>
    %275 = math.tanh %274 : vector<8x128xf32>
    %cst_92 = arith.constant 1.000000e+00 : f32
    %276 = vector.broadcast %cst_92 : f32 to vector<8x128xf32>
    %277 = arith.subf %276, %270 : vector<8x128xf32>
    %278 = arith.mulf %277, %275 : vector<8x128xf32>
    %279 = arith.mulf %270, %241 : vector<8x128xf32>
    %280 = arith.addf %278, %279 : vector<8x128xf32>
    %281 = arith.index_cast %c6_i32 : i32 to index
    %c0_93 = arith.constant 0 : index
    %c0_94 = arith.constant 0 : index
    %282 = vector.load %arg6[%281, %c0_93, %c0_94] : memref<8x8x128xf32, #tpu.memory_space<vmem>>, vector<1x8x128xf32>
    %283 = vector.shape_cast %282 : vector<1x8x128xf32> to vector<8x128xf32>
    %284 = vector.shape_cast %280 : vector<8x128xf32> to vector<1x8x128xf32>
    tpu.vector_store %arg6[%281, %c0_93, %c0_94], %284 {strides = array<i32>} : memref<8x8x128xf32, #tpu.memory_space<vmem>>, vector<1x8x128xf32>,
    %c7_i32 = arith.constant 7 : i32
    %c8_i32_95 = arith.constant 8 : i32
    %285 = arith.muli %c7_i32, %c8_i32_95 : i32
    %286 = tpu.assume_multiple %285, 8 : i32
    %287 = arith.index_cast %286 : i32 to index
    %c0_96 = arith.constant 0 : index
    %288 = vector.load %arg8[%287, %c0_96] : memref<64x384xf32, #tpu.memory_space<vmem>>, vector<8x384xf32>
    %c0_97 = arith.constant 0 : index
    %c0_98 = arith.constant 0 : index
    %289 = vector.load %arg3[%c0_97, %c0_98] : memref<128x384xf32, #tpu.memory_space<vmem>>, vector<128x384xf32>
    %cst_99 = arith.constant dense<0.000000e+00> : vector<8x384xf32>
    %290 = tpu.matmul %280, %289, %cst_99 {dimension_numbers = #tpu.dot_dimension_numbers<[1], [0], [0], [1], [0, 0, 1, 1], [], []>} : vector<8x128xf32>, vector<128x384xf32>, vector<8x384xf32> -> vector<8x384xf32>
    %c0_100 = arith.constant 0 : index
    %c0_101 = arith.constant 0 : index
    %291 = vector.load %arg5[%c0_100, %c0_101] : memref<1x384xf32, #tpu.memory_space<vmem>>, vector<1x384xf32>
    %292 = vector.broadcast %291 : vector<1x384xf32> to vector<8x384xf32>
    %293 = arith.addf %290, %292 : vector<8x384xf32>
    %294 = vector.extract_strided_slice %288 {offsets = [0, 0], sizes = [8, 128], strides = [1, 1]} : vector<8x384xf32> to vector<8x128xf32>
    %295 = vector.extract_strided_slice %293 {offsets = [0, 0], sizes = [8, 128], strides = [1, 1]} : vector<8x384xf32> to vector<8x128xf32>
    %296 = arith.addf %294, %295 : vector<8x128xf32>
    %297 = arith.negf %296 : vector<8x128xf32>
    %298 = math.exp %297 : vector<8x128xf32>
    %cst_102 = arith.constant 1.000000e+00 : f32
    %299 = vector.broadcast %cst_102 : f32 to vector<8x128xf32>
    %300 = arith.addf %299, %298 : vector<8x128xf32>
    %301 = arith.divf %299, %300 : vector<8x128xf32>
    %302 = vector.extract_strided_slice %288 {offsets = [0, 128], sizes = [8, 128], strides = [1, 1]} : vector<8x384xf32> to vector<8x128xf32>
    %303 = vector.extract_strided_slice %293 {offsets = [0, 128], sizes = [8, 128], strides = [1, 1]} : vector<8x384xf32> to vector<8x128xf32>
    %304 = arith.addf %302, %303 : vector<8x128xf32>
    %305 = arith.negf %304 : vector<8x128xf32>
    %306 = math.exp %305 : vector<8x128xf32>
    %cst_103 = arith.constant 1.000000e+00 : f32
    %307 = vector.broadcast %cst_103 : f32 to vector<8x128xf32>
    %308 = arith.addf %307, %306 : vector<8x128xf32>
    %309 = arith.divf %307, %308 : vector<8x128xf32>
    %310 = vector.extract_strided_slice %288 {offsets = [0, 256], sizes = [8, 128], strides = [1, 1]} : vector<8x384xf32> to vector<8x128xf32>
    %311 = vector.extract_strided_slice %293 {offsets = [0, 256], sizes = [8, 128], strides = [1, 1]} : vector<8x384xf32> to vector<8x128xf32>
    %312 = arith.mulf %301, %311 : vector<8x128xf32>
    %313 = arith.addf %310, %312 : vector<8x128xf32>
    %314 = math.tanh %313 : vector<8x128xf32>
    %cst_104 = arith.constant 1.000000e+00 : f32
    %315 = vector.broadcast %cst_104 : f32 to vector<8x128xf32>
    %316 = arith.subf %315, %309 : vector<8x128xf32>
    %317 = arith.mulf %316, %314 : vector<8x128xf32>
    %318 = arith.mulf %309, %280 : vector<8x128xf32>
    %319 = arith.addf %317, %318 : vector<8x128xf32>
    %320 = arith.index_cast %c7_i32 : i32 to index
    %c0_105 = arith.constant 0 : index
    %c0_106 = arith.constant 0 : index
    %321 = vector.load %arg6[%320, %c0_105, %c0_106] : memref<8x8x128xf32, #tpu.memory_space<vmem>>, vector<1x8x128xf32>
    %322 = vector.shape_cast %321 : vector<1x8x128xf32> to vector<8x128xf32>
    %323 = vector.shape_cast %319 : vector<8x128xf32> to vector<1x8x128xf32>
    tpu.vector_store %arg6[%320, %c0_105, %c0_106], %323 {strides = array<i32>} : memref<8x8x128xf32, #tpu.memory_space<vmem>>, vector<1x8x128xf32>,
    %c8_i32_107 = arith.constant 8 : i32
    %c0_108 = arith.constant 0 : index
    %c0_109 = arith.constant 0 : index
    %324 = vector.load %arg7[%c0_108, %c0_109] : memref<8x128xf32, #tpu.memory_space<vmem>>, vector<8x128xf32>
    tpu.vector_store %arg7[%c0_108, %c0_109], %319 {strides = array<i32>} : memref<8x128xf32, #tpu.memory_space<vmem>>, vector<8x128xf32>,
    return
  }
  func.func @transform_0(%arg0: i32) -> (i32, i32, i32) {
    %c0_i32 = arith.constant 0 : i32
    %c0_i32_0 = arith.constant 0 : i32
    %c0_i32_1 = arith.constant 0 : i32
    return %arg0, %c0_i32, %c0_i32_0 : i32, i32, i32
  }
  func.func @transform_1(%arg0: i32) -> (i32, i32) {
    %c0_i32 = arith.constant 0 : i32
    %c0_i32_0 = arith.constant 0 : i32
    %c0_i32_1 = arith.constant 0 : i32
    return %c0_i32, %c0_i32_0 : i32, i32
  }
  func.func @transform_2(%arg0: i32) -> (i32, i32) {
    %c0_i32 = arith.constant 0 : i32
    %c0_i32_0 = arith.constant 0 : i32
    %c0_i32_1 = arith.constant 0 : i32
    return %c0_i32, %c0_i32_0 : i32, i32
  }
  func.func @transform_3(%arg0: i32) -> (i32, i32) {
    %c0_i32 = arith.constant 0 : i32
    %c0_i32_0 = arith.constant 0 : i32
    %c0_i32_1 = arith.constant 0 : i32
    return %c0_i32, %c0_i32_0 : i32, i32
  }
  func.func @transform_4(%arg0: i32) -> (i32, i32) {
    %c0_i32 = arith.constant 0 : i32
    %c0_i32_0 = arith.constant 0 : i32
    %c0_i32_1 = arith.constant 0 : i32
    return %c0_i32, %c0_i32_0 : i32, i32
  }
  func.func @transform_5(%arg0: i32) -> (i32, i32, i32) {
    %c0_i32 = arith.constant 0 : i32
    %c0_i32_0 = arith.constant 0 : i32
    %c0_i32_1 = arith.constant 0 : i32
    return %arg0, %c0_i32, %c0_i32_0 : i32, i32, i32
  }
}

</mosaic_0001>

<bundles_post_ra>
// kernel: gru_classifier_forward.3
= control target key start
LH: loop header
LB: loop body
LE: loop exit
PB: predicated region body
PF: predicated region fallthrough
CT: control target
= control target key end

     0   :  { %12 = vsyncpa [#allocation5], 0  ;;  %s2588_s24 = smov [#allocation4]   ;;  %s3773_s0 = inlined_call_operand.vmem [shape: f32[8,8,128], index: 0, kind: input, shape index: {}]   ;;  %s3774_s1 = inlined_call_operand.vmem [shape: f32[128,384], index: 1, kind: input, shape index: {}]   ;;  %s3775_s2 = inlined_call_operand.hbm [shape: f32[128,384], index: 2, kind: input, shape index: {}]   ;;  %s3776_s3 = inlined_call_operand.vmem [shape: f32[1,384], index: 3, kind: input, shape index: {}]   ;;  %s3777_s4 = inlined_call_operand.vmem [shape: f32[1,384], index: 4, kind: input, shape index: {}]   ;;  %s3778_s5 = inlined_call_operand.vmem [shape: f32[128,128], index: 5, kind: input, shape index: {}]   ;;  %s3779_s6 = inlined_call_operand.vmem [shape: f32[1,128], index: 6, kind: input, shape index: {}]   ;;  %s3780_s7 = inlined_call_operand.vmem [shape: f32[8,128], index: 7, kind: output, shape index: {}]  }
   0x1   :  { %s22_s25 = sshll.u32 %s2588_s24, 4  ;;  %s23_s25 = int_to_ptr.vmem [resolvable:$true] %s22_s25 }
   0x2   :  { %s2574_s26 = scalar_lea.vmem %s23_s25, 6144  ;;  %p2579_p1 = scmp.lt.s32.totalorder %s23_s25, %s23_s25 }
   0x3   :  { %p2575_p0 = scmp.ne.s32.totalorder %s23_s25, %s2574_s26  ;;  %p2580_p2 = scmp.lt.s32.totalorder %s2574_s26, %s2574_s26 }
   0x5   :  { %p2581_p3 = por %p2580_p2, %p2579_p1 }
   0x7   :  { %p2582_p4 = pnand %p2581_p3, %p2575_p0 }
   0x9   :  { %2585 = shalt.err (!%p2582_p4)
}
   0xa   :  { %s2589_s27 = smov 384   ;;  %s2590_s28 = smov 24  }
   0xb   :  { %28 = dma.hbm_to_vmem [thread:$0]  %s3775_s2, 6144, %s23_s25, [#allocation5], %s2589_s27, %s2589_s27, %s2590_s28  }
   0xc   :  { %2586 = dma.done.wait [#allocation5], 6144  }
   0xd   :  { %2587 = vsyncadd [#allocation5], 4294961152  ;;  %v3781_v0 = vmov 0.0   ;;  %v99_v1 = vld [vmem:[%s3774_s1 + $0x170] sm:$0xff]  ;;  %v98_v2 = vld [vmem:[%s3774_s1 + $0x168] sm:$0xff]  ;;  %vm2592_vm0 = vmmov 0  }
   0xe   :  { %182 = vmatprep.mubr.f32.mxu0 %v3781_v0  ;;  %v96_v3 = vld [vmem:[%s3774_s1 + $0x158] sm:$0xff]  ;;  %118 = vmatprep.subr.mxu0 %v99_v1  ;;  %v95_v4 = vld [vmem:[%s3774_s1 + $0x150] sm:$0xff]  ;;  %v93_v5 = vld [vmem:[%s3774_s1 + $0x140] sm:$0xff] }
   0xf   :  { %119 = vmatpush1.msra.mxu0 %v98_v2  ;;  %v92_v6 = vld [vmem:[%s3774_s1 + $0x138] sm:$0xff]  ;;  %v90_v7 = vld [vmem:[%s3774_s1 + $0x128] sm:$0xff]  ;;  %v89_v8 = vld [vmem:[%s3774_s1 + $0x120] sm:$0xff] }
  0x10   :  { %120 = vmatprep.subr.mxu0 %v96_v3  ;;  %v87_v9 = vld [vmem:[%s3774_s1 + $0x110] sm:$0xff]  ;;  %v86_v10 = vld [vmem:[%s3774_s1 + $0x108] sm:$0xff]  ;;  %v84_v11 = vld [vmem:[%s3774_s1 + $0xf8] sm:$0xff] }
  0x11   :  { %121 = vmatpush1.msra.mxu0 %v95_v4  ;;  %v83_v12 = vld [vmem:[%s3774_s1 + $0xf0] sm:$0xff]  ;;  %v81_v13 = vld [vmem:[%s3774_s1 + $0xe0] sm:$0xff]  ;;  %v80_v15 = vld [vmem:[%s3774_s1 + $0xd8] sm:$0xff] }
  0x12   :  { %122 = vmatprep.subr.mxu0 %v93_v5  ;;  %v2679_v14 = vld [vmem:[%s3773_s0] sm:$0xff]  ;;  %v100_v16 = vld [vmem:[%s3774_s1 + $0x178] sm:$0xff]  ;;  %v78_v17 = vld [vmem:[%s3774_s1 + $0xc8] sm:$0xff] }
  0x13   :  { %123 = vmatpush1.msra.mxu0 %v92_v6  ;;  %2106 = vmatprep.mubr.f32.mxu1 %v2679_v14  ;;  %v97_v18 = vld [vmem:[%s3774_s1 + $0x160] sm:$0xff]  ;;  %v94_v20 = vld [vmem:[%s3774_s1 + $0x148] sm:$0xff]  ;;  %v75_v21 = vld [vmem:[%s3774_s1 + $0xb0] sm:$0xff] }
  0x14   :  { %124 = vmatprep.subr.mxu0 %v90_v7  ;;  %2074 = vmatprep.subr.mxu1 %v100_v16  ;;  %v77_v19 = vld [vmem:[%s3774_s1 + $0xc0] sm:$0xff]  ;;  %v74_v22 = vld [vmem:[%s3774_s1 + $0xa8] sm:$0xff]  ;;  %v91_v23 = vld [vmem:[%s3774_s1 + $0x130] sm:$0xff] }
  0x15   :  { %125 = vmatpush1.msra.mxu0 %v89_v8  ;;  %2075 = vmatpush3.msra.mxu1 %v100_v16  ;;  %v72_v24 = vld [vmem:[%s3774_s1 + $0x98] sm:$0xff]  ;;  %v71_v25 = vld [vmem:[%s3774_s1 + $0x90] sm:$0xff]  ;;  %v69_v27 = vld [vmem:[%s3774_s1 + $0x80] sm:$0xff] }
  0x16   :  { %126 = vmatprep.subr.mxu0 %v87_v9  ;;  %2076 = vmatprep.subr.mxu1 %v97_v18  ;;  %v88_v26 = vld [vmem:[%s3774_s1 + $0x118] sm:$0xff]  ;;  %v85_v29 = vld [vmem:[%s3774_s1 + $0x100] sm:$0xff]  ;;  %v66_v30 = vld [vmem:[%s3774_s1 + $0x68] sm:$0xff] }
  0x17   :  { %127 = vmatpush1.msra.mxu0 %v86_v10  ;;  %2077 = vmatpush3.msra.mxu1 %v97_v18  ;;  %v68_v28 = vld [vmem:[%s3774_s1 + $0x78] sm:$0xff]  ;;  %v65_v31 = vld [vmem:[%s3774_s1 + $0x60] sm:$0xff]  ;;  %v82_v32 = vld [vmem:[%s3774_s1 + $0xe8] sm:$0xff] }
  0x18   :  { %128 = vmatprep.subr.mxu0 %v84_v11  ;;  %2078 = vmatprep.subr.mxu1 %v94_v20  ;;  %v63_v33 = vld [vmem:[%s3774_s1 + $0x50] sm:$0xff]  ;;  %v62_v34 = vld [vmem:[%s3774_s1 + $0x48] sm:$0xff]  ;;  %v60_v36 = vld [vmem:[%s3774_s1 + $0x38] sm:$0xff] }
  0x19   :  { %129 = vmatpush1.msra.mxu0 %v83_v12  ;;  %2079 = vmatpush3.msra.mxu1 %v94_v20  ;;  %v79_v35 = vld [vmem:[%s3774_s1 + $0xd0] sm:$0xff]  ;;  %v76_v38 = vld [vmem:[%s3774_s1 + $0xb8] sm:$0xff]  ;;  %v57_v39 = vld [vmem:[%s3774_s1 + $0x20] sm:$0xff] }
  0x1a   :  { %130 = vmatprep.subr.mxu0 %v81_v13  ;;  %2080 = vmatprep.subr.mxu1 %v91_v23  ;;  %v59_v37 = vld [vmem:[%s3774_s1 + $0x30] sm:$0xff]  ;;  %v56_v40 = vld [vmem:[%s3774_s1 + $0x18] sm:$0xff]  ;;  %v73_v41 = vld [vmem:[%s3774_s1 + $0xa0] sm:$0xff] }
  0x1b   :  { %131 = vmatpush1.msra.mxu0 %v80_v15  ;;  %2081 = vmatpush3.msra.mxu1 %v91_v23  ;;  %v54_v42 = vld [vmem:[%s3774_s1 + $0x8] sm:$0xff]  ;;  %v53_v43 = vld [vmem:[%s3774_s1] sm:$0xff]  ;;  %v2772_v45 = vld [vmem:[#allocation4 + $0x170] sm:$0xff] }
  0x1c   :  { %132 = vmatprep.subr.mxu0 %v78_v17  ;;  %2082 = vmatprep.subr.mxu1 %v88_v26  ;;  %v70_v44 = vld [vmem:[%s3774_s1 + $0x88] sm:$0xff]  ;;  %3809 = vst [vmem:[#allocation7_spill] sm:$0xff] %v2772_v45  ;;  %v2776_v47 = vld [vmem:[#allocation4 + $0x158] sm:$0xff]  ;;  %v2780_v48 = vld [vmem:[#allocation4 + $0x150] sm:$0xff] }
  0x1d   :  { %133 = vmatpush1.msra.mxu0 %v77_v19  ;;  %2083 = vmatpush3.msra.mxu1 %v88_v26  ;;  %v2774_v46 = vld [vmem:[#allocation4 + $0x168] sm:$0xff]  ;;  %v67_v49 = vld [vmem:[%s3774_s1 + $0x70] sm:$0xff]  ;;  %v2792_v51 = vld [vmem:[#allocation4 + $0x140] sm:$0xff] }
  0x1e   :  { %134 = vmatprep.subr.mxu0 %v75_v21  ;;  %2084 = vmatprep.subr.mxu1 %v85_v29  ;;  %v2790_v50 = vld [vmem:[%s3773_s0 + $0x8] sm:$0xff]  ;;  %v2795_v52 = vld [vmem:[#allocation4 + $0x138] sm:$0xff]  ;;  %v2802_v54 = vld [vmem:[#allocation4 + $0x120] sm:$0xff] }
  0x1f   :  { %135 = vmatpush1.msra.mxu0 %v74_v22  ;;  %2085 = vmatpush3.msra.mxu1 %v85_v29  ;;  %v2798_v53 = vld [vmem:[#allocation4 + $0x128] sm:$0xff]  ;;  %v64_v55 = vld [vmem:[%s3774_s1 + $0x58] sm:$0xff]  ;;  %v2812_v56 = vld [vmem:[%s3773_s0 + $0x10] sm:$0xff] }
  0x20   :  { %136 = vmatprep.subr.mxu0 %v72_v24  ;;  %2086 = vmatprep.subr.mxu1 %v82_v32  ;;  %v2814_v57 = vld [vmem:[#allocation4 + $0x110] sm:$0xff]  ;;  %v2817_v58 = vld [vmem:[#allocation4 + $0x108] sm:$0xff]  ;;  %v2820_v59 = vld [vmem:[#allocation4 + $0xf8] sm:$0xff] }
  0x21   :  { %137 = vmatpush1.msra.mxu0 %v71_v25  ;;  %2087 = vmatpush3.msra.mxu1 %v82_v32  ;;  %v2824_v60 = vld [vmem:[#allocation4 + $0xf0] sm:$0xff]  ;;  %v61_v61 = vld [vmem:[%s3774_s1 + $0x40] sm:$0xff]  ;;  %v2834_v62 = vld [vmem:[%s3773_s0 + $0x18] sm:$0xff] }
  0x22   :  { %138 = vmatprep.subr.mxu0 %v69_v27  ;;  %2088 = vmatprep.subr.mxu1 %v79_v35  ;;  %v2836_v63 = vld [vmem:[#allocation4 + $0xe0] sm:$0xff]  ;;  %v2839_v1 = vld [vmem:[#allocation4 + $0xd8] sm:$0xff]  ;;  %v2842_v2 = vld [vmem:[#allocation4 + $0xc8] sm:$0xff] }
  0x23   :  { %139 = vmatpush1.msra.mxu0 %v68_v28  ;;  %2089 = vmatpush3.msra.mxu1 %v79_v35  ;;  %v2846_v3 = vld [vmem:[#allocation4 + $0xc0] sm:$0xff]  ;;  %v58_v4 = vld [vmem:[%s3774_s1 + $0x28] sm:$0xff]  ;;  %v2858_v6 = vld [vmem:[#allocation4 + $0xb0] sm:$0xff] }
  0x24   :  { %140 = vmatprep.subr.mxu0 %v66_v30  ;;  %2090 = vmatprep.subr.mxu1 %v76_v38  ;;  %v2856_v5 = vld [vmem:[%s3773_s0 + $0x20] sm:$0xff]  ;;  %v2861_v7 = vld [vmem:[#allocation4 + $0xa8] sm:$0xff]  ;;  %v2864_v8 = vld [vmem:[#allocation4 + $0x98] sm:$0xff] }
  0x25   :  { %141 = vmatpush1.msra.mxu0 %v65_v31  ;;  %2091 = vmatpush3.msra.mxu1 %v76_v38  ;;  %v2868_v9 = vld [vmem:[#allocation4 + $0x90] sm:$0xff]  ;;  %v50_v11 = vld [vmem:[%s3773_s0 + $0x28] sm:$0xff]  ;;  %v2878_v12 = vld [vmem:[#allocation4 + $0x80] sm:$0xff] }
  0x26   :  { %142 = vmatprep.subr.mxu0 %v63_v33  ;;  %2092 = vmatprep.subr.mxu1 %v73_v41  ;;  %v55_v10 = vld [vmem:[%s3774_s1 + $0x10] sm:$0xff]  ;;  %v2881_v13 = vld [vmem:[#allocation4 + $0x78] sm:$0xff]  ;;  %v2887_v15 = vld [vmem:[#allocation4 + $0x60] sm:$0xff] }
  0x27   :  { %143 = vmatpush1.msra.mxu0 %v62_v34  ;;  %2093 = vmatpush3.msra.mxu1 %v73_v41  ;;  %v51_v16 = vld [vmem:[%s3773_s0 + $0x30] sm:$0xff]  ;;  %v2897_v18 = vld [vmem:[#allocation4 + $0x48] sm:$0xff]  ;;  %v2900_v19 = vld [vmem:[#allocation4 + $0x38] sm:$0xff] }
  0x28   :  { %144 = vmatprep.subr.mxu0 %v60_v36  ;;  %2094 = vmatprep.subr.mxu1 %v70_v44  ;;  %v2894_v17 = vld [vmem:[#allocation4 + $0x50] sm:$0xff]  ;;  %v2906_v21 = vld [vmem:[#allocation4 + $0x178] sm:$0xff]  ;;  %v2913_v23 = vld [vmem:[#allocation4 + $0x20] sm:$0xff] }
  0x29   :  { %145 = vmatpush1.msra.mxu0 %v59_v37  ;;  %2095 = vmatpush3.msra.mxu1 %v70_v44  ;;  %v2904_v20 = vld [vmem:[#allocation4 + $0x30] sm:$0xff]  ;;  %v52_v22 = vld [vmem:[%s3773_s0 + $0x38] sm:$0xff]  ;;  %3811 = vst [vmem:[#allocation9_spill] sm:$0xff] %v2913_v23  ;;  %v2920_v25 = vld [vmem:[#allocation4 + $0x8] sm:$0xff] }
  0x2a   :  { %146 = vmatprep.subr.mxu0 %v57_v39  ;;  %2096 = vmatprep.subr.mxu1 %v67_v49  ;;  %3810 = vst [vmem:[#allocation8_spill] sm:$0xff] %v2904_v20  ;;  %v2916_v24 = vld [vmem:[#allocation4 + $0x18] sm:$0xff]  ;;  %3813 = vst [vmem:[#allocation11_spill] sm:$0xff] %v2920_v25  ;;  %v2924_v26 = vld [vmem:[#allocation4] sm:$0xff] }
  0x2b   :  { %147 = vmatpush1.msra.mxu0 %v56_v40  ;;  %2097 = vmatpush3.msra.mxu1 %v67_v49  ;;  %3812 = vst [vmem:[#allocation10_spill] sm:$0xff] %v2916_v24  ;;  %3814 = vst [vmem:[#allocation12_spill] sm:$0xff] %v2924_v26  ;;  %v2926_v27 = vld [vmem:[#allocation4 + $0x160] sm:$0xff]  ;;  %v2932_v28 = vld [vmem:[#allocation4 + $0x148] sm:$0xff] }
  0x2c   :  { %148 = vmatprep.subr.mxu0 %v54_v42  ;;  %2098 = vmatprep.subr.mxu1 %v64_v55  ;;  %v2938_v29 = vld [vmem:[#allocation4 + $0x130] sm:$0xff]  ;;  %v2943_v30 = vld [vmem:[#allocation4 + $0x118] sm:$0xff]  ;;  %v2949_v31 = vld [vmem:[#allocation4 + $0x100] sm:$0xff]  ;;  %v103_v42 = vlaneseq }
  0x2d   :  { %149 = vmatpush1.msra.mxu0 %v53_v43  ;;  %2099 = vmatpush3.msra.mxu1 %v64_v55  ;;  %v2955_v32 = vld [vmem:[#allocation4 + $0xe8] sm:$0xff]  ;;  %v2959_v33 = vld [vmem:[#allocation4 + $0xd0] sm:$0xff]  ;;  %v2965_v34 = vld [vmem:[#allocation4 + $0xb8] sm:$0xff] }
  0x2e   :  { %183 = vmatmul.mubr.f32.vlgmr.msra.gmra.mxu0 %v2679_v14  ;;  %432 = vmatprep.subr.mxu0 %v2772_v45  ;;  %v2884_v14 = vld [vmem:[#allocation4 + $0x68] sm:$0xff]  ;;  %v2971_v35 = vld [vmem:[#allocation4 + $0xa0] sm:$0xff]  ;;  %v2983_v37 = vld [vmem:[#allocation4 + $0x70] sm:$0xff]  ;;  %v3066_v43 = vshrl.u32 %v103_v42, 7 }
  0x2f   :  { %433 = vmatpush1.msra.mxu0 %v2774_v46  ;;  %188 = vmatprep.mubr.f32.mxu0 %v3781_v0  ;;  %v2977_v36 = vld [vmem:[#allocation4 + $0x88] sm:$0xff]  ;;  %v2989_v38 = vld [vmem:[#allocation4 + $0x58] sm:$0xff]  ;;  %v2995_v39 = vld [vmem:[#allocation4 + $0x40] sm:$0xff] }
  0x30   :  { %434 = vmatprep.subr.mxu0 %v2776_v47  ;;  %2100 = vmatprep.subr.mxu1 %v61_v61  ;;  %3815 = vst [vmem:[#allocation13_spill] sm:$0xff] %v2995_v39  ;;  %v3001_v40 = vld [vmem:[#allocation4 + $0x28] sm:$0xff]  ;;  %v3007_v41 = vld [vmem:[#allocation4 + $0x10] sm:$0xff]  ;;  %v105_v44 = vsub.s32 0, %v3066_v43  ;;  %v101_v49 = vld [vmem:[%s3776_s3] sm:$0x7] }
  0x31   :  { %435 = vmatpush1.msra.mxu0 %v2780_v48  ;;  %2101 = vmatpush3.msra.mxu1 %v61_v61  ;;  %3816 = vst [vmem:[#allocation14_spill] sm:$0xff] %v3001_v40  ;;  %3817 = vst [vmem:[#allocation15_spill] sm:$0xff] %v3007_v41  ;;  %v109_v55 = vsub.s32 1, %v3066_v43 }
  0x32   :  { %189 = vmatmul.mubr.f32.gmra.mxu0 %v2790_v50  ;;  %436 = vmatprep.subr.mxu0 %v2792_v51  ;;  %v106_v61 = vrot.slane %v101_v49, %v105_v44 }
  0x33   :  { %437 = vmatpush1.msra.mxu0 %v2795_v52  ;;  %194 = vmatprep.mubr.f32.mxu0 %v3781_v0 }
  0x34   :  { %438 = vmatprep.subr.mxu0 %v2798_v53  ;;  %2102 = vmatprep.subr.mxu1 %v58_v4 }
  0x35   :  { %439 = vmatpush1.msra.mxu0 %v2802_v54  ;;  %2103 = vmatpush3.msra.mxu1 %v58_v4  ;;  %v110_v4 = vrot.slane %v101_v49, %v109_v55 }
  0x36   :  { %195 = vmatmul.mubr.f32.gmra.mxu0 %v2812_v56  ;;  %440 = vmatprep.subr.mxu0 %v2814_v57 }
  0x37   :  { %441 = vmatpush1.msra.mxu0 %v2817_v58  ;;  %200 = vmatprep.mubr.f32.mxu0 %v3781_v0 }
  0x38   :  { %442 = vmatprep.subr.mxu0 %v2820_v59  ;;  %2104 = vmatprep.subr.mxu1 %v55_v10 }
  0x39   :  { %443 = vmatpush1.msra.mxu0 %v2824_v60  ;;  %2105 = vmatpush3.msra.mxu1 %v55_v10 }
  0x3a   :  { %201 = vmatmul.mubr.f32.gmra.mxu0 %v2834_v62  ;;  %444 = vmatprep.subr.mxu0 %v2836_v63 }
  0x3b   :  { %445 = vmatpush1.msra.mxu0 %v2839_v1  ;;  %206 = vmatprep.mubr.f32.mxu0 %v3781_v0 }
  0x3c   :  { %446 = vmatprep.subr.mxu0 %v2842_v2  ;;  %2118 = vmatprep.subr.mxu1 %v3781_v0 }
  0x3d   :  { %447 = vmatpush1.msra.mxu0 %v2846_v3  ;;  %2107 = vmatmul.mubr.f32.vlgmr.msra.gmra.mxu1 %v2790_v50 }
  0x3e   :  { %207 = vmatmul.mubr.f32.gmra.mxu0 %v2856_v5  ;;  %448 = vmatprep.subr.mxu0 %v2858_v6 }
  0x3f   :  { %449 = vmatpush1.msra.mxu0 %v2861_v7  ;;  %212 = vmatprep.mubr.f32.mxu0 %v3781_v0 }
  0x40   :  { %450 = vmatprep.subr.mxu0 %v2864_v8  ;;  %2119 = vmatpush3.msra.mxu1 %v2906_v21 }
  0x41   :  { %451 = vmatpush1.msra.mxu0 %v2868_v9  ;;  %2120 = vmatprep.subr.mxu1 %v3781_v0 }
  0x42   :  { %213 = vmatmul.mubr.f32.gmra.mxu0 %v50_v11  ;;  %452 = vmatprep.subr.mxu0 %v2878_v12 }
  0x43   :  { %453 = vmatpush1.msra.mxu0 %v2881_v13  ;;  %218 = vmatprep.mubr.f32.mxu0 %v3781_v0 }
  0x44   :  { %454 = vmatprep.subr.mxu0 %v2884_v14  ;;  %2121 = vmatpush3.msra.mxu1 %v2926_v27 }
  0x45   :  { %455 = vmatpush1.msra.mxu0 %v2887_v15  ;;  %2122 = vmatprep.subr.mxu1 %v3781_v0 }
  0x46   :  { %219 = vmatmul.mubr.f32.gmra.mxu0 %v51_v16  ;;  %456 = vmatprep.subr.mxu0 %v2894_v17 }
  0x47   :  { %457 = vmatpush1.msra.mxu0 %v2897_v18  ;;  %224 = vmatprep.mubr.f32.mxu0 %v3781_v0 }
  0x48   :  { %458 = vmatprep.subr.mxu0 %v2900_v19  ;;  %2123 = vmatpush3.msra.mxu1 %v2932_v28 }
  0x49   :  { %459 = vmatpush1.msra.mxu0 %v2904_v20  ;;  %2109 = vmatprep.mubr.f32.mxu1 %v2812_v56 }
  0x4a   :  { %225 = vmatmul.mubr.f32.gmra.mxu0 %v52_v22  ;;  %460 = vmatprep.subr.mxu0 %v2913_v23 }
  0x4b   :  { %461 = vmatpush1.msra.mxu0 %v2916_v24  ;;  %496 = vmatprep.mubr.f32.mxu0 %v3781_v0 }
  0x4c   :  { %462 = vmatprep.subr.mxu0 %v2920_v25  ;;  %2124 = vmatprep.subr.mxu1 %v3781_v0 }
  0x4d   :  { %463 = vmatpush1.msra.mxu0 %v2924_v26  ;;  %2110 = vmatmul.mubr.f32.gmra.mxu1 %v2834_v62 }
  0x4e   :  { %497 = vmatmul.mubr.f32.vlgmr.msra.gmra.mxu0 %v3781_v0  ;;  %2125 = vmatpush3.msra.mxu1 %v2938_v29 }
  0x4f   :  { %2112 = vmatprep.mubr.f32.mxu1 %v2856_v5  ;;  %2126 = vmatprep.subr.mxu1 %v3781_v0 }
  0x50   :  { %600 = vmatprep.subr.mxu0 %v2772_v45  ;;  %2127 = vmatpush3.msra.mxu1 %v2943_v30 }
  0x51   :  { %601 = vmatpush1.msra.mxu0 %v2774_v46  ;;  %2128 = vmatprep.subr.mxu1 %v3781_v0 }
  0x52   :  { %2113 = vmatmul.mubr.f32.gmra.mxu1 %v50_v11  ;;  %602 = vmatprep.subr.mxu0 %v2776_v47 }
  0x53   :  { %2129 = vmatpush3.msra.mxu1 %v2949_v31  ;;  %2115 = vmatprep.mubr.f32.mxu1 %v51_v16 }
  0x54   :  { %2130 = vmatprep.subr.mxu1 %v3781_v0  ;;  %603 = vmatpush1.msra.mxu0 %v2780_v48 }
  0x55   :  { %2131 = vmatpush3.msra.mxu1 %v2955_v32  ;;  %604 = vmatprep.subr.mxu0 %v2792_v51 }
  0x56   :  { %2132 = vmatprep.subr.mxu1 %v3781_v0  ;;  %2116 = vmatmul.mubr.f32.gmra.mxu1 %v52_v22 }
  0x57   :  { %2133 = vmatpush3.msra.mxu1 %v2959_v33  ;;  %2150 = vmatprep.mubr.msk.f32.mxu1 %vm2592_vm0, %v3781_v0 }
  0x58   :  { %2134 = vmatprep.subr.mxu1 %v3781_v0  ;;  %605 = vmatpush1.msra.mxu0 %v2795_v52 }
  0x59   :  { %2135 = vmatpush3.msra.mxu1 %v2965_v34  ;;  %606 = vmatprep.subr.mxu0 %v2798_v53 }
  0x5a   :  { %2136 = vmatprep.subr.mxu1 %v3781_v0  ;;  %607 = vmatpush1.msra.mxu0 %v2802_v54 }
  0x5b   :  { %2137 = vmatpush3.msra.mxu1 %v2971_v35  ;;  %608 = vmatprep.subr.mxu0 %v2814_v57 }
  0x5c   :  { %2138 = vmatprep.subr.mxu1 %v3781_v0  ;;  %609 = vmatpush1.msra.mxu0 %v2817_v58 }
  0x5d   :  { %2139 = vmatpush3.msra.mxu1 %v2977_v36  ;;  %610 = vmatprep.subr.mxu0 %v2820_v59 }
  0x5e   :  { %2140 = vmatprep.subr.mxu1 %v3781_v0  ;;  %611 = vmatpush1.msra.mxu0 %v2824_v60 }
  0x5f   :  { %2141 = vmatpush3.msra.mxu1 %v2983_v37  ;;  %612 = vmatprep.subr.mxu0 %v2836_v63 }
  0x60   :  { %2142 = vmatprep.subr.mxu1 %v3781_v0  ;;  %613 = vmatpush1.msra.mxu0 %v2839_v1 }
  0x61   :  { %2143 = vmatpush3.msra.mxu1 %v2989_v38  ;;  %614 = vmatprep.subr.mxu0 %v2842_v2 }
  0x62   :  { %2144 = vmatprep.subr.mxu1 %v3781_v0  ;;  %615 = vmatpush1.msra.mxu0 %v2846_v3 }
  0x63   :  { %2145 = vmatpush3.msra.mxu1 %v2995_v39  ;;  %616 = vmatprep.subr.mxu0 %v2858_v6 }
  0x64   :  { %2146 = vmatprep.subr.mxu1 %v3781_v0  ;;  %617 = vmatpush1.msra.mxu0 %v2861_v7 }
  0x65   :  { %2147 = vmatpush3.msra.mxu1 %v3001_v40  ;;  %618 = vmatprep.subr.mxu0 %v2864_v8 }
  0x66   :  { %2148 = vmatprep.subr.mxu1 %v3781_v0  ;;  %619 = vmatpush1.msra.mxu0 %v2868_v9 }
  0x67   :  { %2149 = vmatpush3.msra.mxu1 %v3007_v41  ;;  %620 = vmatprep.subr.mxu0 %v2878_v12 }
  0x68   :  { %2151 = vmatmul.mubr.f32.vlgmr.msra.gmra.mxu1 %v3781_v0  ;;  %2153 = vmatprep.subr.mxu1 %v3781_v0 }
  0x69   :  { %2154 = vmatpush3.msra.mxu1 %v2906_v21  ;;  %621 = vmatpush1.msra.mxu0 %v2881_v13 }
  0x6a   :  { %2155 = vmatprep.subr.mxu1 %v3781_v0  ;;  %622 = vmatprep.subr.mxu0 %v2884_v14 }
  0x6b   :  { %2156 = vmatpush3.msra.mxu1 %v2926_v27  ;;  %623 = vmatpush1.msra.mxu0 %v2887_v15 }
  0x6c   :  { %2157 = vmatprep.subr.mxu1 %v3781_v0  ;;  %624 = vmatprep.subr.mxu0 %v2894_v17 }
  0x6d   :  { %2158 = vmatpush3.msra.mxu1 %v2932_v28  ;;  %625 = vmatpush1.msra.mxu0 %v2897_v18 }
  0x6e   :  { %2159 = vmatprep.subr.mxu1 %v3781_v0  ;;  %626 = vmatprep.subr.mxu0 %v2900_v19 }
  0x6f   :  { %2160 = vmatpush3.msra.mxu1 %v2938_v29  ;;  %627 = vmatpush1.msra.mxu0 %v2904_v20 }
  0x70   :  { %2161 = vmatprep.subr.mxu1 %v3781_v0  ;;  %628 = vmatprep.subr.mxu0 %v2913_v23 }
  0x71   :  { %2162 = vmatpush3.msra.mxu1 %v2943_v30  ;;  %629 = vmatpush1.msra.mxu0 %v2916_v24 }
  0x72   :  { %2163 = vmatprep.subr.mxu1 %v3781_v0  ;;  %630 = vmatprep.subr.mxu0 %v2920_v25 }
  0x73   :  { %2164 = vmatpush3.msra.mxu1 %v2949_v31  ;;  %631 = vmatpush1.msra.mxu0 %v2924_v26 }
  0x74   :  { %2165 = vmatprep.subr.mxu1 %v3781_v0  ;;  %664 = vmatprep.mubr.f32.mxu0 %v3781_v0 }
  0x75   :  { %2166 = vmatpush3.msra.mxu1 %v2955_v32  ;;  %2185 = vmatprep.mubr.msk.f32.mxu1 %vm2592_vm0, %v3781_v0 }
  0x76   :  { %2167 = vmatprep.subr.mxu1 %v3781_v0  ;;  %768 = vmatprep.subr.mxu0 %v2772_v45 }
  0x77   :  { %2168 = vmatpush3.msra.mxu1 %v2959_v33 }
  0x78   :  { %2169 = vmatprep.subr.mxu1 %v3781_v0 }
  0x79   :  { %2170 = vmatpush3.msra.mxu1 %v2965_v34 }
  0x7a   :  { %2171 = vmatprep.subr.mxu1 %v3781_v0 }
  0x7b   :  { %2172 = vmatpush3.msra.mxu1 %v2971_v35 }
  0x7c   :  { %2173 = vmatprep.subr.mxu1 %v3781_v0 }
  0x7d   :  { %2174 = vmatpush3.msra.mxu1 %v2977_v36 }
  0x7e   :  { %2175 = vmatprep.subr.mxu1 %v3781_v0 }
  0x7f   :  { %2176 = vmatpush3.msra.mxu1 %v2983_v37 }
  0x80   :  { %2177 = vmatprep.subr.mxu1 %v3781_v0 }
  0x81   :  { %2178 = vmatpush3.msra.mxu1 %v2989_v38 }
  0x82   :  { %2179 = vmatprep.subr.mxu1 %v3781_v0 }
  0x83   :  { %2180 = vmatpush3.msra.mxu1 %v2995_v39 }
  0x84   :  { %2181 = vmatprep.subr.mxu1 %v3781_v0 }
  0x85   :  { %2182 = vmatpush3.msra.mxu1 %v3001_v40 }
  0x86   :  { %2183 = vmatprep.subr.mxu1 %v3781_v0 }
  0x87   :  { %2184 = vmatpush3.msra.mxu1 %v3007_v41 }
  0x88   :  { %2188 = vmatprep.subr.mxu1 %v3781_v0 }
  0xee   :  { %v184_v50 = vpop.f32.mrf.mxu0 }
  0xf0   :  { %v186_v56 = vpop.f32.mrf.mxu0 }
  0xf2   :  { %v190_v62 = vpop.f32.mrf.mxu0 }
  0xf3   :  { %v3073_v5 = vadd.f32 %v190_v62, %v106_v61 }
  0xf4   :  { %v192_v10 = vpop.f32.mrf.mxu0 }
  0xf5   :  { %3818 = vst [vmem:[#allocation16_spill] sm:$0xff] %v3073_v5  ;;  %v3075_v11 = vadd.f32 %v192_v10, %v110_v4  ;;  %v113_v10 = vsub.s32 2, %v3066_v43 }
  0xf6   :  { %v196_v16 = vpop.f32.mrf.mxu0 }
  0xf7   :  { %3819 = vst [vmem:[#allocation17_spill] sm:$0xff] %v3075_v11  ;;  %v3077_v22 = vadd.f32 %v196_v16, %v106_v61 }
  0xf8   :  { %v198_v42 = vpop.f32.mrf.mxu0 }
  0xf9   :  { %3820 = vst [vmem:[#allocation18_spill] sm:$0xff] %v3077_v22  ;;  %v3079_v0 = vadd.f32 %v198_v42, %v110_v4 }
  0xfa   :  { %v202_v45 = vpop.f32.mrf.mxu0 }
  0xfb   :  { %3821 = vst [vmem:[#allocation19_spill] sm:$0xff] %v3079_v0  ;;  %v3081_v41 = vadd.f32 %v202_v45, %v106_v61  ;;  %v114_v0 = vrot.slane %v101_v49, %v113_v10 }
  0xfc   :  { %v204_v26 = vpop.f32.mrf.mxu0 }
  0xfd   :  { %3822 = vst [vmem:[#allocation20_spill] sm:$0xff] %v3081_v41  ;;  %v3083_v25 = vadd.f32 %v204_v26, %v110_v4 }
  0xfe   :  { %v208_v40 = vpop.f32.mrf.mxu0 }
  0xff   :  { %3823 = vst [vmem:[#allocation21_spill] sm:$0xff] %v3083_v25  ;;  %v3085_v24 = vadd.f32 %v208_v40, %v106_v61  ;;  %v415_v40 = vld [vmem:[%s3777_s4] sm:$0x7] }
 0x100   :  { %v210_v62 = vpop.f32.mrf.mxu0  ;;  %v3110_v23 = vrot.slane %v415_v40, %v109_v55 }
 0x101   :  { %3824 = vst [vmem:[#allocation22_spill] sm:$0xff] %v3085_v24  ;;  %v3087_v5 = vadd.f32 %v210_v62, %v110_v4  ;;  %v2108_v24 = vpop.f32.mrf.mxu1 }
 0x102   :  { %v214_v11 = vpop.f32.mrf.mxu0 }
 0x103   :  { %3825 = vst [vmem:[#allocation23_spill] sm:$0xff] %v3087_v5  ;;  %v3090_v16 = vadd.f32 %v214_v11, %v106_v61  ;;  %v3101_v5 = vadd.f32 %v2108_v24, %v114_v0 }
 0x104   :  { %v216_v22 = vpop.f32.mrf.mxu0 }
 0x105   :  { %3826 = vst [vmem:[#allocation24_spill] sm:$0xff] %v3090_v16  ;;  %v3092_v42 = vadd.f32 %v216_v22, %v110_v4  ;;  %3830 = vst [vmem:[#allocation28_spill] sm:$0xff] %v3101_v5  ;;  %v3105_v16 = vrot.slane %v415_v40, %v105_v44 }
 0x106   :  { %v220_v45 = vpop.f32.mrf.mxu0 }
 0x107   :  { %3827 = vst [vmem:[#allocation25_spill] sm:$0xff] %v3092_v42  ;;  %v3094_v41 = vadd.f32 %v220_v45, %v106_v61  ;;  %3832 = vst [vmem:[#allocation30_spill] sm:$0xff] %v3105_v16  ;;  %v185_v42 = vadd.f32 %v184_v50, %v106_v61 }
 0x108   :  { %v222_v26 = vpop.f32.mrf.mxu0 }
 0x109   :  { %3828 = vst [vmem:[#allocation26_spill] sm:$0xff] %v3094_v41  ;;  %v3099_v62 = vadd.f32 %v222_v26, %v110_v4  ;;  %v297_v41 = vpop.f32.mrf.mxu1 }
 0x10a   :  { %v226_v43 = vpop.f32.mrf.mxu0 }
 0x10b   :  { %3829 = vst [vmem:[#allocation27_spill] sm:$0xff] %v3099_v62  ;;  %v3103_v11 = vadd.f32 %v226_v43, %v106_v61 }
 0x10c   :  { %v228_v22 = vpop.f32.mrf.mxu0 }
 0x10d   :  { %3831 = vst [vmem:[#allocation29_spill] sm:$0xff] %v3103_v11  ;;  %v3107_v49 = vadd.f32 %v228_v22, %v110_v4  ;;  %v2111_v26 = vpop.f32.mrf.mxu1 }
 0x10e   :  { %v498_v45 = vpop.f32.mrf.mxu0  ;;  %v3112_v24 = vadd.f32 %v2111_v26, %v114_v0 }
 0x10f   :  { %3833 = vst [vmem:[#allocation31_spill] sm:$0xff] %v3107_v49  ;;  %v499_v25 = vadd.f32 %v498_v45, %v3105_v16  ;;  %v307_v5 = vpop.f32.mrf.mxu1  ;;  %v187_v49 = vadd.f32 %v186_v56, %v110_v4  ;;  %v3125_v56 = vrot.slane %v415_v40, %v113_v10  ;;  %v3842_v10 = vld [vmem:[#allocation13_spill] sm:$0xff]  ;;  %v3844_v40 = vld [vmem:[#allocation10_spill] sm:$0xff] }
 0x110   :  { %v500_v39 = vpop.f32.mrf.mxu0  ;;  %3834 = vst [vmem:[#allocation32_spill] sm:$0xff] %v3112_v24  ;;  %v3115_v11 = vadd.f32 %v307_v5, %v114_v0  ;;  %v3852_v24 = vld [vmem:[#allocation17_spill] sm:$0xff] }
 0x111   :  { %v573_v62 = vadd.f32 %v499_v25, %v185_v42  ;;  %v501_v44 = vadd.f32 %v500_v39, %v3110_v23 }
 0x112   :  { %3835 = vst [vmem:[#allocation33_spill] sm:$0xff] %v3115_v11  ;;  %v2114_v22 = vpop.f32.mrf.mxu1 }
 0x113   :  { %v1880_v43 = vmul.f32 -1.442695, %v573_v62  ;;  %v3117_v20 = vadd.f32 %v2114_v22, %v114_v0  ;;  %v580_v61 = vadd.f32 %v501_v44, %v187_v49 }
 0x114   :  { %v317_v50 = vpop.f32.mrf.mxu1 }
 0x115   :  { %2438 = vpow2.f32 %v1880_v43  ;;  %3836 = vst [vmem:[#allocation34_spill] sm:$0xff] %v3117_v20  ;;  %v3119_v55 = vadd.f32 %v317_v50, %v114_v0  ;;  %v1881_v42 = vmul.f32 -1.442695, %v580_v61  ;;  %v298_v50 = vadd.f32 %v297_v41, %v114_v0  ;;  %v3841_v41 = vld [vmem:[#allocation8_spill] sm:$0xff] }
 0x116   :  { %v2117_v45 = vpop.f32.mrf.mxu1 }
 0x117   :  { %3837 = vst [vmem:[#allocation35_spill] sm:$0xff] %v3119_v55  ;;  %v3121_v16 = vadd.f32 %v2117_v45, %v114_v0  ;;  %2440 = vpow2.f32 %v1881_v42 }
 0x118   :  { %v327_v25 = vpop.f32.mrf.mxu1 }
 0x119   :  { %3838 = vst [vmem:[#allocation36_spill] sm:$0xff] %v3121_v16  ;;  %v3123_v26 = vadd.f32 %v327_v25, %v114_v0  ;;  %v3840_v0 = vmov 0.0  }
 0x11b   :  { %3839 = vst [vmem:[#allocation37_spill] sm:$0xff] %v3123_v26 }
 0x122   :  { %v2439_v39 = vpop.eup %2438 }
 0x123   :  { %v577_v5 = vadd.f32 1.0, %v2439_v39 }
 0x124   :  { %v2441_v4 = vpop.eup %2440 }
 0x125   :  { %2442 = vrcp.f32 %v577_v5  ;;  %v584_v22 = vadd.f32 1.0, %v2441_v4  ;;  %v3847_v4 = vld [vmem:[#allocation12_spill] sm:$0xff] }
 0x127   :  { %2444 = vrcp.f32 %v584_v22  ;;  %v3849_v22 = vld [vmem:[#allocation7_spill] sm:$0xff] }
 0x128   :  { %v569_v62 = vpop.f32.mrf.mxu1 }
 0x129   :  { %v570_v49 = vadd.f32 %v569_v62, %v3125_v56  ;;  %v3846_v62 = vld [vmem:[#allocation11_spill] sm:$0xff] }
 0x12a   :  { %v2152_v43 = vpop.f32.mrf.mxu1 }
 0x12b   :  { %v3848_v43 = vld [vmem:[#allocation15_spill] sm:$0xff] }
 0x132   :  { %v2443_v44 = vpop.eup %2442 }
 0x133   :  { %v587_v45 = vmul.f32 %v2443_v44, %v570_v49 }
 0x134   :  { %v2445_v61 = vpop.eup %2444 }
 0x135   :  { %v588_v16 = vadd.f32 %v587_v45, %v298_v50  ;;  %v590_v25 = vsub.f32 1.0, %v2445_v61  ;;  %v592_v39 = vmul.f32 0.0, %v2445_v61  ;;  %v3850_v50 = vld [vmem:[#allocation30_spill] sm:$0xff] }
 0x137   :  { %2446 = vtanh.f32 %v588_v16  ;;  %v3843_v16 = vld [vmem:[#allocation9_spill] sm:$0xff] }
 0x144   :  { %v2447_v42 = vpop.eup %2446 }
 0x145   :  { %v591_v26 = vmul.f32 %v2447_v42, %v590_v25  ;;  %v3851_v42 = vld [vmem:[#allocation16_spill] sm:$0xff] }
 0x147   :  { %v3128_v5 = vadd.f32 %v592_v39, %v591_v26  ;;  %v3845_v26 = vld [vmem:[#allocation14_spill] sm:$0xff] }
 0x149   :  { %665 = vmatmul.mubr.f32.vlgmr.msra.gmra.mxu0 %v3128_v5  ;;  %2186 = vmatmul.mubr.f32.vlgmr.msra.gmra.mxu1 %v3128_v5 }
 0x14a   :  { %769 = vmatpush1.msra.mxu0 %v2774_v46  ;;  %2189 = vmatpush3.msra.mxu1 %v2906_v21 }
 0x14b   :  { %770 = vmatprep.subr.mxu0 %v2776_v47  ;;  %2190 = vmatprep.subr.mxu1 %v3840_v0 }
 0x14c   :  { %771 = vmatpush1.msra.mxu0 %v2780_v48  ;;  %2191 = vmatpush3.msra.mxu1 %v2926_v27 }
 0x14d   :  { %772 = vmatprep.subr.mxu0 %v2792_v51  ;;  %2192 = vmatprep.subr.mxu1 %v3840_v0 }
 0x14e   :  { %773 = vmatpush1.msra.mxu0 %v2795_v52  ;;  %2193 = vmatpush3.msra.mxu1 %v2932_v28 }
 0x14f   :  { %774 = vmatprep.subr.mxu0 %v2798_v53  ;;  %2194 = vmatprep.subr.mxu1 %v3840_v0 }
 0x150   :  { %775 = vmatpush1.msra.mxu0 %v2802_v54  ;;  %2195 = vmatpush3.msra.mxu1 %v2938_v29 }
 0x151   :  { %776 = vmatprep.subr.mxu0 %v2814_v57  ;;  %2196 = vmatprep.subr.mxu1 %v3840_v0 }
 0x152   :  { %777 = vmatpush1.msra.mxu0 %v2817_v58  ;;  %2197 = vmatpush3.msra.mxu1 %v2943_v30 }
 0x153   :  { %778 = vmatprep.subr.mxu0 %v2820_v59  ;;  %2198 = vmatprep.subr.mxu1 %v3840_v0 }
 0x154   :  { %779 = vmatpush1.msra.mxu0 %v2824_v60  ;;  %2199 = vmatpush3.msra.mxu1 %v2949_v31 }
 0x155   :  { %780 = vmatprep.subr.mxu0 %v2836_v63  ;;  %2200 = vmatprep.subr.mxu1 %v3840_v0 }
 0x156   :  { %781 = vmatpush1.msra.mxu0 %v2839_v1  ;;  %2201 = vmatpush3.msra.mxu1 %v2955_v32 }
 0x157   :  { %782 = vmatprep.subr.mxu0 %v2842_v2  ;;  %2202 = vmatprep.subr.mxu1 %v3840_v0 }
 0x158   :  { %783 = vmatpush1.msra.mxu0 %v2846_v3  ;;  %2203 = vmatpush3.msra.mxu1 %v2959_v33 }
 0x159   :  { %784 = vmatprep.subr.mxu0 %v2858_v6  ;;  %2204 = vmatprep.subr.mxu1 %v3840_v0 }
 0x15a   :  { %785 = vmatpush1.msra.mxu0 %v2861_v7  ;;  %2205 = vmatpush3.msra.mxu1 %v2965_v34 }
 0x15b   :  { %786 = vmatprep.subr.mxu0 %v2864_v8  ;;  %2206 = vmatprep.subr.mxu1 %v3840_v0 }
 0x15c   :  { %787 = vmatpush1.msra.mxu0 %v2868_v9  ;;  %2207 = vmatpush3.msra.mxu1 %v2971_v35 }
 0x15d   :  { %788 = vmatprep.subr.mxu0 %v2878_v12  ;;  %2208 = vmatprep.subr.mxu1 %v3840_v0 }
 0x15e   :  { %789 = vmatpush1.msra.mxu0 %v2881_v13  ;;  %2209 = vmatpush3.msra.mxu1 %v2977_v36 }
 0x15f   :  { %790 = vmatprep.subr.mxu0 %v2884_v14  ;;  %2210 = vmatprep.subr.mxu1 %v3840_v0 }
 0x160   :  { %791 = vmatpush1.msra.mxu0 %v2887_v15  ;;  %2211 = vmatpush3.msra.mxu1 %v2983_v37 }
 0x161   :  { %792 = vmatprep.subr.mxu0 %v2894_v17  ;;  %2212 = vmatprep.subr.mxu1 %v3840_v0 }
 0x162   :  { %793 = vmatpush1.msra.mxu0 %v2897_v18  ;;  %2213 = vmatpush3.msra.mxu1 %v2989_v38 }
 0x163   :  { %794 = vmatprep.subr.mxu0 %v2900_v19  ;;  %2214 = vmatprep.subr.mxu1 %v3840_v0 }
 0x164   :  { %795 = vmatpush1.msra.mxu0 %v3841_v41  ;;  %2215 = vmatpush3.msra.mxu1 %v3842_v10 }
 0x165   :  { %796 = vmatprep.subr.mxu0 %v3843_v16  ;;  %2216 = vmatprep.subr.mxu1 %v3840_v0 }
 0x166   :  { %797 = vmatpush1.msra.mxu0 %v3844_v40  ;;  %2217 = vmatpush3.msra.mxu1 %v3845_v26 }
 0x167   :  { %798 = vmatprep.subr.mxu0 %v3846_v62  ;;  %2218 = vmatprep.subr.mxu1 %v3840_v0 }
 0x168   :  { %799 = vmatpush1.msra.mxu0 %v3847_v4  ;;  %832 = vmatprep.mubr.f32.mxu0 %v3840_v0 }
 0x169   :  { %2219 = vmatpush3.msra.mxu1 %v3848_v43  ;;  %2220 = vmatprep.mubr.msk.f32.mxu1 %vm2592_vm0, %v3840_v0 }
 0x16a   :  { %936 = vmatprep.subr.mxu0 %v3849_v22  ;;  %2223 = vmatprep.subr.mxu1 %v3840_v0 }
 0x209   :  { %v666_v49 = vpop.f32.mrf.mxu0  ;;  %v737_v44 = vpop.f32.mrf.mxu1 }
 0x20a   :  { %v667_v45 = vadd.f32 %v666_v49, %v3850_v50  ;;  %v738_v40 = vadd.f32 %v737_v44, %v3125_v56 }
 0x20b   :  { %v668_v61 = vpop.f32.mrf.mxu0  ;;  %v2187_v25 = vpop.f32.mrf.mxu1 }
 0x20c   :  { %v741_v39 = vadd.f32 %v667_v45, %v3851_v42  ;;  %v669_v55 = vadd.f32 %v668_v61, %v3110_v23  ;;  %v3853_v25 = vld [vmem:[#allocation28_spill] sm:$0xff] }
 0x20e   :  { %v1882_v20 = vmul.f32 -1.442695, %v741_v39  ;;  %v748_v11 = vadd.f32 %v669_v55, %v3852_v24  ;;  %v3859_v55 = vld [vmem:[#allocation7_spill] sm:$0xff] }
 0x210   :  { %2448 = vpow2.f32 %v1882_v20  ;;  %v1883_v43 = vmul.f32 -1.442695, %v748_v11 }
 0x212   :  { %2450 = vpow2.f32 %v1883_v43 }
 0x21d   :  { %v2449_v4 = vpop.eup %2448 }
 0x21e   :  { %v745_v22 = vadd.f32 1.0, %v2449_v4 }
 0x21f   :  { %v2451_v62 = vpop.eup %2450 }
 0x220   :  { %2452 = vrcp.f32 %v745_v22  ;;  %v752_v26 = vadd.f32 1.0, %v2451_v62  ;;  %v3861_v22 = vld [vmem:[#allocation18_spill] sm:$0xff] }
 0x222   :  { %2454 = vrcp.f32 %v752_v26  ;;  %v3860_v26 = vld [vmem:[#allocation30_spill] sm:$0xff] }
 0x22d   :  { %v2453_v49 = vpop.eup %2452 }
 0x22e   :  { %v755_v50 = vmul.f32 %v2453_v49, %v738_v40 }
 0x22f   :  { %v2455_v42 = vpop.eup %2454 }
 0x230   :  { %v756_v45 = vadd.f32 %v755_v50, %v3853_v25  ;;  %v758_v61 = vsub.f32 1.0, %v2455_v42  ;;  %v760_v11 = vmul.f32 %v2455_v42, %v3128_v5  ;;  %v3862_v25 = vld [vmem:[#allocation19_spill] sm:$0xff] }
 0x232   :  { %2456 = vtanh.f32 %v756_v45 }
 0x23f   :  { %v2457_v20 = vpop.eup %2456 }
 0x240   :  { %v759_v39 = vmul.f32 %v2457_v20, %v758_v61 }
 0x242   :  { %v3206_v24 = vadd.f32 %v760_v11, %v759_v39 }
 0x244   :  { %833 = vmatmul.mubr.f32.vlgmr.msra.gmra.mxu0 %v3206_v24  ;;  %2221 = vmatmul.mubr.f32.vlgmr.msra.gmra.mxu1 %v3206_v24 }
 0x245   :  { %937 = vmatpush1.msra.mxu0 %v2774_v46  ;;  %2224 = vmatpush3.msra.mxu1 %v2906_v21  ;;  %v3854_v46 = vld [vmem:[#allocation10_spill] sm:$0xff] }
 0x246   :  { %938 = vmatprep.subr.mxu0 %v2776_v47  ;;  %2225 = vmatprep.subr.mxu1 %v3840_v0  ;;  %v3855_v47 = vld [vmem:[#allocation14_spill] sm:$0xff] }
 0x247   :  { %939 = vmatpush1.msra.mxu0 %v2780_v48  ;;  %2226 = vmatpush3.msra.mxu1 %v2926_v27  ;;  %v3856_v48 = vld [vmem:[#allocation11_spill] sm:$0xff] }
 0x248   :  { %940 = vmatprep.subr.mxu0 %v2792_v51  ;;  %2227 = vmatprep.subr.mxu1 %v3840_v0  ;;  %v3857_v51 = vld [vmem:[#allocation12_spill] sm:$0xff] }
 0x249   :  { %941 = vmatpush1.msra.mxu0 %v2795_v52  ;;  %2228 = vmatpush3.msra.mxu1 %v2932_v28  ;;  %v3858_v52 = vld [vmem:[#allocation15_spill] sm:$0xff] }
 0x24a   :  { %942 = vmatprep.subr.mxu0 %v2798_v53  ;;  %2229 = vmatprep.subr.mxu1 %v3840_v0 }
 0x24b   :  { %943 = vmatpush1.msra.mxu0 %v2802_v54  ;;  %2230 = vmatpush3.msra.mxu1 %v2938_v29 }
 0x24c   :  { %944 = vmatprep.subr.mxu0 %v2814_v57  ;;  %2231 = vmatprep.subr.mxu1 %v3840_v0 }
 0x24d   :  { %945 = vmatpush1.msra.mxu0 %v2817_v58  ;;  %2232 = vmatpush3.msra.mxu1 %v2943_v30 }
 0x24e   :  { %946 = vmatprep.subr.mxu0 %v2820_v59  ;;  %2233 = vmatprep.subr.mxu1 %v3840_v0 }
 0x24f   :  { %947 = vmatpush1.msra.mxu0 %v2824_v60  ;;  %2234 = vmatpush3.msra.mxu1 %v2949_v31 }
 0x250   :  { %948 = vmatprep.subr.mxu0 %v2836_v63  ;;  %2235 = vmatprep.subr.mxu1 %v3840_v0 }
 0x251   :  { %949 = vmatpush1.msra.mxu0 %v2839_v1  ;;  %2236 = vmatpush3.msra.mxu1 %v2955_v32 }
 0x252   :  { %950 = vmatprep.subr.mxu0 %v2842_v2  ;;  %2237 = vmatprep.subr.mxu1 %v3840_v0 }
 0x253   :  { %951 = vmatpush1.msra.mxu0 %v2846_v3  ;;  %2238 = vmatpush3.msra.mxu1 %v2959_v33 }
 0x254   :  { %952 = vmatprep.subr.mxu0 %v2858_v6  ;;  %2239 = vmatprep.subr.mxu1 %v3840_v0 }
 0x255   :  { %953 = vmatpush1.msra.mxu0 %v2861_v7  ;;  %2240 = vmatpush3.msra.mxu1 %v2965_v34 }
 0x256   :  { %954 = vmatprep.subr.mxu0 %v2864_v8  ;;  %2241 = vmatprep.subr.mxu1 %v3840_v0 }
 0x257   :  { %955 = vmatpush1.msra.mxu0 %v2868_v9  ;;  %2242 = vmatpush3.msra.mxu1 %v2971_v35 }
 0x258   :  { %956 = vmatprep.subr.mxu0 %v2878_v12  ;;  %2243 = vmatprep.subr.mxu1 %v3840_v0 }
 0x259   :  { %957 = vmatpush1.msra.mxu0 %v2881_v13  ;;  %2244 = vmatpush3.msra.mxu1 %v2977_v36 }
 0x25a   :  { %958 = vmatprep.subr.mxu0 %v2884_v14  ;;  %2245 = vmatprep.subr.mxu1 %v3840_v0 }
 0x25b   :  { %959 = vmatpush1.msra.mxu0 %v2887_v15  ;;  %2246 = vmatpush3.msra.mxu1 %v2983_v37 }
 0x25c   :  { %960 = vmatprep.subr.mxu0 %v2894_v17  ;;  %2247 = vmatprep.subr.mxu1 %v3840_v0 }
 0x25d   :  { %961 = vmatpush1.msra.mxu0 %v2897_v18  ;;  %2248 = vmatpush3.msra.mxu1 %v2989_v38 }
 0x25e   :  { %962 = vmatprep.subr.mxu0 %v2900_v19  ;;  %2249 = vmatprep.subr.mxu1 %v3840_v0 }
 0x25f   :  { %963 = vmatpush1.msra.mxu0 %v3841_v41  ;;  %2250 = vmatpush3.msra.mxu1 %v3842_v10 }
 0x260   :  { %964 = vmatprep.subr.mxu0 %v3843_v16  ;;  %2251 = vmatprep.subr.mxu1 %v3840_v0 }
 0x261   :  { %965 = vmatpush1.msra.mxu0 %v3854_v46  ;;  %2252 = vmatpush3.msra.mxu1 %v3855_v47 }
 0x262   :  { %966 = vmatprep.subr.mxu0 %v3856_v48  ;;  %2253 = vmatprep.subr.mxu1 %v3840_v0 }
 0x263   :  { %967 = vmatpush1.msra.mxu0 %v3857_v51  ;;  %1000 = vmatprep.mubr.f32.mxu0 %v3840_v0 }
 0x264   :  { %2254 = vmatpush3.msra.mxu1 %v3858_v52  ;;  %2255 = vmatprep.mubr.msk.f32.mxu1 %vm2592_vm0, %v3840_v0 }
 0x265   :  { %1104 = vmatprep.subr.mxu0 %v3859_v55  ;;  %2258 = vmatprep.subr.mxu1 %v3840_v0 }
 0x304   :  { %v834_v5 = vpop.f32.mrf.mxu0  ;;  %v905_v40 = vpop.f32.mrf.mxu1 }
 0x305   :  { %v835_v62 = vadd.f32 %v834_v5, %v3860_v26  ;;  %v906_v55 = vadd.f32 %v905_v40, %v3125_v56  ;;  %v3292_v40 = vld [vmem:[#allocation4 + $0x158] sm:$0xff] }
 0x306   :  { %v836_v4 = vpop.f32.mrf.mxu0  ;;  %v2222_v43 = vpop.f32.mrf.mxu1 }
 0x307   :  { %v909_v44 = vadd.f32 %v835_v62, %v3861_v22  ;;  %v837_v49 = vadd.f32 %v836_v4, %v3110_v23  ;;  %v3863_v43 = vld [vmem:[#allocation33_spill] sm:$0xff] }
 0x309   :  { %v1884_v50 = vmul.f32 -1.442695, %v909_v44  ;;  %v916_v45 = vadd.f32 %v837_v49, %v3862_v25 }
 0x30b   :  { %2458 = vpow2.f32 %v1884_v50  ;;  %v1885_v42 = vmul.f32 -1.442695, %v916_v45  ;;  %v3288_v45 = vld [vmem:[#allocation4 + $0x168] sm:$0xff] }
 0x30d   :  { %2460 = vpow2.f32 %v1885_v42  ;;  %v3304_v42 = vld [vmem:[#allocation4 + $0x138] sm:$0xff] }
 0x318   :  { %v2459_v61 = vpop.eup %2458 }
 0x319   :  { %v913_v20 = vadd.f32 1.0, %v2459_v61  ;;  %v3394_v61 = vld [vmem:[#allocation4 + $0x128] sm:$0xff] }
 0x31a   :  { %v2461_v39 = vpop.eup %2460 }
 0x31b   :  { %2462 = vrcp.f32 %v913_v20  ;;  %v920_v11 = vadd.f32 1.0, %v2461_v39  ;;  %v3398_v20 = vld [vmem:[#allocation4 + $0x120] sm:$0xff]  ;;  %v3401_v39 = vld [vmem:[#allocation4 + $0x130] sm:$0xff] }
 0x31d   :  { %2464 = vrcp.f32 %v920_v11  ;;  %v3404_v11 = vld [vmem:[#allocation4 + $0x110] sm:$0xff] }
 0x328   :  { %v2463_v5 = vpop.eup %2462 }
 0x329   :  { %v923_v26 = vmul.f32 %v2463_v5, %v906_v55  ;;  %v3408_v55 = vld [vmem:[#allocation4 + $0x108] sm:$0xff]  ;;  %v3411_v5 = vld [vmem:[#allocation4 + $0x118] sm:$0xff] }
 0x32a   :  { %v2465_v22 = vpop.eup %2464 }
 0x32b   :  { %v924_v62 = vadd.f32 %v923_v26, %v3863_v43  ;;  %v926_v4 = vsub.f32 1.0, %v2465_v22  ;;  %v928_v49 = vmul.f32 %v2465_v22, %v3206_v24  ;;  %v3296_v26 = vld [vmem:[#allocation4 + $0x150] sm:$0xff]  ;;  %v3300_v24 = vld [vmem:[#allocation4 + $0x140] sm:$0xff]  ;;  %v3414_v43 = vld [vmem:[#allocation4 + $0xf8] sm:$0xff] }
 0x32c   :  { %v3421_v22 = vld [vmem:[#allocation4 + $0x100] sm:$0xff] }
 0x32d   :  { %2466 = vtanh.f32 %v924_v62  ;;  %v3418_v62 = vld [vmem:[#allocation4 + $0xf0] sm:$0xff] }
 0x33a   :  { %v2467_v44 = vpop.eup %2466 }
 0x33b   :  { %v927_v50 = vmul.f32 %v2467_v44, %v926_v4  ;;  %v3424_v4 = vld [vmem:[#allocation4 + $0xe0] sm:$0xff]  ;;  %v3428_v44 = vld [vmem:[#allocation4 + $0xd8] sm:$0xff] }
 0x33d   :  { %v3284_v25 = vadd.f32 %v928_v49, %v927_v50  ;;  %v3432_v50 = vld [vmem:[#allocation4 + $0xc8] sm:$0xff]  ;;  %v3436_v49 = vld [vmem:[#allocation4 + $0xc0] sm:$0xff] }
 0x33f   :  { %1001 = vmatmul.mubr.f32.vlgmr.msra.gmra.mxu0 %v3284_v25  ;;  %2256 = vmatmul.mubr.f32.vlgmr.msra.gmra.mxu1 %v3284_v25 }
 0x340   :  { %1105 = vmatpush1.msra.mxu0 %v3288_v45  ;;  %2259 = vmatpush3.msra.mxu1 %v2906_v21  ;;  %v3867_v21 = vld [vmem:[#allocation32_spill] sm:$0xff] }
 0x341   :  { %1106 = vmatprep.subr.mxu0 %v3292_v40  ;;  %2260 = vmatprep.subr.mxu1 %v3840_v0 }
 0x342   :  { %1107 = vmatpush1.msra.mxu0 %v3296_v26  ;;  %2261 = vmatpush3.msra.mxu1 %v2926_v27 }
 0x343   :  { %1108 = vmatprep.subr.mxu0 %v3300_v24  ;;  %2262 = vmatprep.subr.mxu1 %v3840_v0 }
 0x344   :  { %1109 = vmatpush1.msra.mxu0 %v3304_v42  ;;  %2263 = vmatpush3.msra.mxu1 %v2932_v28 }
 0x345   :  { %1110 = vmatprep.subr.mxu0 %v2798_v53  ;;  %2264 = vmatprep.subr.mxu1 %v3840_v0  ;;  %v3363_v53 = vld [vmem:[#allocation4 + $0x170] sm:$0xff] }
 0x346   :  { %1111 = vmatpush1.msra.mxu0 %v2802_v54  ;;  %2265 = vmatpush3.msra.mxu1 %v2938_v29 }
 0x347   :  { %1112 = vmatprep.subr.mxu0 %v2814_v57  ;;  %2266 = vmatprep.subr.mxu1 %v3840_v0 }
 0x348   :  { %1113 = vmatpush1.msra.mxu0 %v2817_v58  ;;  %2267 = vmatpush3.msra.mxu1 %v2943_v30  ;;  %v3864_v58 = vld [vmem:[#allocation30_spill] sm:$0xff] }
 0x349   :  { %1114 = vmatprep.subr.mxu0 %v2820_v59  ;;  %2268 = vmatprep.subr.mxu1 %v3840_v0 }
 0x34a   :  { %1115 = vmatpush1.msra.mxu0 %v2824_v60  ;;  %2269 = vmatpush3.msra.mxu1 %v2949_v31 }
 0x34b   :  { %1116 = vmatprep.subr.mxu0 %v2836_v63  ;;  %2270 = vmatprep.subr.mxu1 %v3840_v0 }
 0x34c   :  { %1117 = vmatpush1.msra.mxu0 %v2839_v1  ;;  %2271 = vmatpush3.msra.mxu1 %v2955_v32  ;;  %v3865_v1 = vld [vmem:[#allocation20_spill] sm:$0xff] }
 0x34d   :  { %1118 = vmatprep.subr.mxu0 %v2842_v2  ;;  %2272 = vmatprep.subr.mxu1 %v3840_v0 }
 0x34e   :  { %1119 = vmatpush1.msra.mxu0 %v2846_v3  ;;  %2273 = vmatpush3.msra.mxu1 %v2959_v33 }
 0x34f   :  { %1120 = vmatprep.subr.mxu0 %v2858_v6  ;;  %2274 = vmatprep.subr.mxu1 %v3840_v0 }
 0x350   :  { %1121 = vmatpush1.msra.mxu0 %v2861_v7  ;;  %2275 = vmatpush3.msra.mxu1 %v2965_v34  ;;  %v3866_v7 = vld [vmem:[#allocation21_spill] sm:$0xff] }
 0x351   :  { %1122 = vmatprep.subr.mxu0 %v2864_v8  ;;  %2276 = vmatprep.subr.mxu1 %v3840_v0 }
 0x352   :  { %1123 = vmatpush1.msra.mxu0 %v2868_v9  ;;  %2277 = vmatpush3.msra.mxu1 %v2971_v35 }
 0x353   :  { %1124 = vmatprep.subr.mxu0 %v2878_v12  ;;  %2278 = vmatprep.subr.mxu1 %v3840_v0 }
 0x354   :  { %1125 = vmatpush1.msra.mxu0 %v2881_v13  ;;  %2279 = vmatpush3.msra.mxu1 %v2977_v36 }
 0x355   :  { %1126 = vmatprep.subr.mxu0 %v2884_v14  ;;  %2280 = vmatprep.subr.mxu1 %v3840_v0 }
 0x356   :  { %1127 = vmatpush1.msra.mxu0 %v2887_v15  ;;  %2281 = vmatpush3.msra.mxu1 %v2983_v37 }
 0x357   :  { %1128 = vmatprep.subr.mxu0 %v2894_v17  ;;  %2282 = vmatprep.subr.mxu1 %v3840_v0 }
 0x358   :  { %1129 = vmatpush1.msra.mxu0 %v2897_v18  ;;  %2283 = vmatpush3.msra.mxu1 %v2989_v38 }
 0x359   :  { %1130 = vmatprep.subr.mxu0 %v2900_v19  ;;  %2284 = vmatprep.subr.mxu1 %v3840_v0 }
 0x35a   :  { %1131 = vmatpush1.msra.mxu0 %v3841_v41  ;;  %2285 = vmatpush3.msra.mxu1 %v3842_v10 }
 0x35b   :  { %1132 = vmatprep.subr.mxu0 %v3843_v16  ;;  %2286 = vmatprep.subr.mxu1 %v3840_v0 }
 0x35c   :  { %1133 = vmatpush1.msra.mxu0 %v3854_v46  ;;  %2287 = vmatpush3.msra.mxu1 %v3855_v47  ;;  %v3379_v46 = vld [vmem:[#allocation4 + $0x178] sm:$0xff] }
 0x35d   :  { %1134 = vmatprep.subr.mxu0 %v3856_v48  ;;  %2288 = vmatprep.subr.mxu1 %v3840_v0  ;;  %v3385_v48 = vld [vmem:[#allocation4 + $0x160] sm:$0xff] }
 0x35e   :  { %1135 = vmatpush1.msra.mxu0 %v3857_v51  ;;  %1168 = vmatprep.mubr.f32.mxu0 %v3840_v0  ;;  %v3391_v51 = vld [vmem:[#allocation4 + $0x148] sm:$0xff] }
 0x35f   :  { %2289 = vmatpush3.msra.mxu1 %v3858_v52  ;;  %2290 = vmatprep.mubr.msk.f32.mxu1 %vm2592_vm0, %v3840_v0 }
 0x360   :  { %1272 = vmatprep.subr.mxu0 %v3363_v53  ;;  %2293 = vmatprep.subr.mxu1 %v3840_v0 }
 0x3ff   :  { %v1002_v54 = vpop.f32.mrf.mxu0  ;;  %v1073_v57 = vpop.f32.mrf.mxu1 }
 0x400   :  { %v1003_v59 = vadd.f32 %v1002_v54, %v3864_v58  ;;  %v1074_v17 = vadd.f32 %v1073_v57, %v3125_v56  ;;  %v3444_v54 = vld [vmem:[#allocation4 + $0xa8] sm:$0xff]  ;;  %v3452_v57 = vld [vmem:[#allocation4 + $0x90] sm:$0xff] }
 0x401   :  { %v1004_v60 = vpop.f32.mrf.mxu0  ;;  %v2257_v63 = vpop.f32.mrf.mxu1 }
 0x402   :  { %v1077_v2 = vadd.f32 %v1003_v59, %v3865_v1  ;;  %v1005_v6 = vadd.f32 %v1004_v60, %v3110_v23  ;;  %v3460_v59 = vld [vmem:[#allocation4 + $0x78] sm:$0xff]  ;;  %v3468_v60 = vld [vmem:[#allocation4 + $0x60] sm:$0xff]  ;;  %v3476_v63 = vld [vmem:[#allocation4 + $0x48] sm:$0xff] }
 0x403   :  { %v3484_v1 = vld [vmem:[#allocation4 + $0x30] sm:$0xff] }
 0x404   :  { %v1886_v3 = vmul.f32 -1.442695, %v1077_v2  ;;  %v1084_v8 = vadd.f32 %v1005_v6, %v3866_v7  ;;  %v3492_v2 = vld [vmem:[#allocation4 + $0x18] sm:$0xff] }
 0x405   :  { %3868 = vst [vmem:[#allocation8_spill] sm:$0xff] %v3492_v2 }
 0x406   :  { %2468 = vpow2.f32 %v1886_v3  ;;  %v1887_v9 = vmul.f32 -1.442695, %v1084_v8  ;;  %v3500_v3 = vld [vmem:[#allocation4] sm:$0xff] }
 0x407   :  { %3870 = vst [vmem:[#allocation9_spill] sm:$0xff] %v3500_v3 }
 0x408   :  { %2470 = vpow2.f32 %v1887_v9  ;;  %v3871_v9 = vld [vmem:[#allocation22_spill] sm:$0xff] }
 0x413   :  { %v2469_v12 = vpop.eup %2468 }
 0x414   :  { %v1081_v13 = vadd.f32 1.0, %v2469_v12 }
 0x415   :  { %v2471_v14 = vpop.eup %2470 }
 0x416   :  { %2472 = vrcp.f32 %v1081_v13  ;;  %v1088_v15 = vadd.f32 1.0, %v2471_v14 }
 0x418   :  { %2474 = vrcp.f32 %v1088_v15 }
 0x423   :  { %v2473_v18 = vpop.eup %2472 }
 0x424   :  { %v1091_v19 = vmul.f32 %v2473_v18, %v1074_v17 }
 0x425   :  { %v2475_v28 = vpop.eup %2474 }
 0x426   :  { %v1092_v27 = vadd.f32 %v1091_v19, %v3867_v21  ;;  %v1094_v29 = vsub.f32 1.0, %v2475_v28  ;;  %v1096_v41 = vmul.f32 %v2475_v28, %v3284_v25  ;;  %v3440_v25 = vld [vmem:[#allocation4 + $0xb0] sm:$0xff] }
 0x428   :  { %2476 = vtanh.f32 %v1092_v27 }
 0x435   :  { %v2477_v30 = vpop.eup %2476 }
 0x436   :  { %v1095_v31 = vmul.f32 %v2477_v30, %v1094_v29 }
 0x438   :  { %v3374_v16 = vadd.f32 %v1096_v41, %v1095_v31  ;;  %v3873_v31 = vld [vmem:[#allocation35_spill] sm:$0xff] }
 0x43a   :  { %1169 = vmatmul.mubr.f32.vlgmr.msra.gmra.mxu0 %v3374_v16  ;;  %2291 = vmatmul.mubr.f32.vlgmr.msra.gmra.mxu1 %v3374_v16 }
 0x43b   :  { %1273 = vmatpush1.msra.mxu0 %v3288_v45  ;;  %2294 = vmatpush3.msra.mxu1 %v3379_v46 }
 0x43c   :  { %1274 = vmatprep.subr.mxu0 %v3292_v40  ;;  %2295 = vmatprep.subr.mxu1 %v3840_v0 }
 0x43d   :  { %1275 = vmatpush1.msra.mxu0 %v3296_v26  ;;  %2296 = vmatpush3.msra.mxu1 %v3385_v48 }
 0x43e   :  { %1276 = vmatprep.subr.mxu0 %v3300_v24  ;;  %2297 = vmatprep.subr.mxu1 %v3840_v0 }
 0x43f   :  { %1277 = vmatpush1.msra.mxu0 %v3304_v42  ;;  %2298 = vmatpush3.msra.mxu1 %v3391_v51 }
 0x440   :  { %1278 = vmatprep.subr.mxu0 %v3394_v61  ;;  %2299 = vmatprep.subr.mxu1 %v3840_v0 }
 0x441   :  { %1279 = vmatpush1.msra.mxu0 %v3398_v20  ;;  %2300 = vmatpush3.msra.mxu1 %v3401_v39 }
 0x442   :  { %1280 = vmatprep.subr.mxu0 %v3404_v11  ;;  %2301 = vmatprep.subr.mxu1 %v3840_v0 }
 0x443   :  { %1281 = vmatpush1.msra.mxu0 %v3408_v55  ;;  %2302 = vmatpush3.msra.mxu1 %v3411_v5 }
 0x444   :  { %1282 = vmatprep.subr.mxu0 %v3414_v43  ;;  %2303 = vmatprep.subr.mxu1 %v3840_v0 }
 0x445   :  { %1283 = vmatpush1.msra.mxu0 %v3418_v62  ;;  %2304 = vmatpush3.msra.mxu1 %v3421_v22 }
 0x446   :  { %1284 = vmatprep.subr.mxu0 %v3424_v4  ;;  %2305 = vmatprep.subr.mxu1 %v3840_v0 }
 0x447   :  { %1285 = vmatpush1.msra.mxu0 %v3428_v44  ;;  %2306 = vmatpush3.msra.mxu1 %v2955_v32  ;;  %v3448_v32 = vld [vmem:[#allocation4 + $0x98] sm:$0xff] }
 0x448   :  { %1286 = vmatprep.subr.mxu0 %v3432_v50  ;;  %2307 = vmatprep.subr.mxu1 %v3840_v0 }
 0x449   :  { %1287 = vmatpush1.msra.mxu0 %v3436_v49  ;;  %2308 = vmatpush3.msra.mxu1 %v2959_v33  ;;  %v3456_v33 = vld [vmem:[#allocation4 + $0x80] sm:$0xff] }
 0x44a   :  { %1288 = vmatprep.subr.mxu0 %v3440_v25  ;;  %2309 = vmatprep.subr.mxu1 %v3840_v0 }
 0x44b   :  { %1289 = vmatpush1.msra.mxu0 %v3444_v54  ;;  %2310 = vmatpush3.msra.mxu1 %v2965_v34  ;;  %v3464_v34 = vld [vmem:[#allocation4 + $0x68] sm:$0xff] }
 0x44c   :  { %1290 = vmatprep.subr.mxu0 %v3448_v32  ;;  %2311 = vmatprep.subr.mxu1 %v3840_v0 }
 0x44d   :  { %1291 = vmatpush1.msra.mxu0 %v3452_v57  ;;  %2312 = vmatpush3.msra.mxu1 %v2971_v35  ;;  %v3472_v35 = vld [vmem:[#allocation4 + $0x50] sm:$0xff] }
 0x44e   :  { %1292 = vmatprep.subr.mxu0 %v3456_v33  ;;  %2313 = vmatprep.subr.mxu1 %v3840_v0 }
 0x44f   :  { %1293 = vmatpush1.msra.mxu0 %v3460_v59  ;;  %2314 = vmatpush3.msra.mxu1 %v2977_v36  ;;  %v3480_v36 = vld [vmem:[#allocation4 + $0x38] sm:$0xff] }
 0x450   :  { %1294 = vmatprep.subr.mxu0 %v3464_v34  ;;  %2315 = vmatprep.subr.mxu1 %v3840_v0 }
 0x451   :  { %1295 = vmatpush1.msra.mxu0 %v3468_v60  ;;  %2316 = vmatpush3.msra.mxu1 %v2983_v37  ;;  %v3488_v37 = vld [vmem:[#allocation4 + $0x20] sm:$0xff] }
 0x452   :  { %1296 = vmatprep.subr.mxu0 %v3472_v35  ;;  %2317 = vmatprep.subr.mxu1 %v3840_v0 }
 0x453   :  { %1297 = vmatpush1.msra.mxu0 %v3476_v63  ;;  %2318 = vmatpush3.msra.mxu1 %v2989_v38  ;;  %v3496_v38 = vld [vmem:[#allocation4 + $0x8] sm:$0xff] }
 0x454   :  { %1298 = vmatprep.subr.mxu0 %v3480_v36  ;;  %2319 = vmatprep.subr.mxu1 %v3840_v0  ;;  %3869 = vst [vmem:[#allocation13_spill] sm:$0xff] %v3496_v38 }
 0x455   :  { %1299 = vmatpush1.msra.mxu0 %v3484_v1  ;;  %2320 = vmatpush3.msra.mxu1 %v3842_v10 }
 0x456   :  { %1300 = vmatprep.subr.mxu0 %v3488_v37  ;;  %2321 = vmatprep.subr.mxu1 %v3840_v0 }
 0x457   :  { %1301 = vmatpush1.msra.mxu0 %v3492_v2  ;;  %2322 = vmatpush3.msra.mxu1 %v3855_v47 }
 0x458   :  { %1302 = vmatprep.subr.mxu0 %v3496_v38  ;;  %2323 = vmatprep.subr.mxu1 %v3840_v0 }
 0x459   :  { %1303 = vmatpush1.msra.mxu0 %v3500_v3  ;;  %1336 = vmatprep.mubr.f32.mxu0 %v3840_v0 }
 0x45a   :  { %2324 = vmatpush3.msra.mxu1 %v3858_v52  ;;  %2325 = vmatprep.mubr.msk.f32.mxu1 %vm2592_vm0, %v3840_v0  ;;  %v3872_v52 = vld [vmem:[#allocation23_spill] sm:$0xff] }
 0x45b   :  { %1440 = vmatprep.subr.mxu0 %v3363_v53  ;;  %2328 = vmatprep.subr.mxu1 %v3840_v0 }
 0x4fa   :  { %v1170_v10 = vpop.f32.mrf.mxu0  ;;  %v1241_v47 = vpop.f32.mrf.mxu1 }
 0x4fb   :  { %v1171_v6 = vadd.f32 %v1170_v10, %v3864_v58  ;;  %v1242_v28 = vadd.f32 %v1241_v47, %v3125_v56  ;;  %v3551_v47 = vld [vmem:[#allocation4 + $0xd0] sm:$0xff] }
 0x4fc   :  { %v1172_v7 = vpop.f32.mrf.mxu0  ;;  %v2292_v8 = vpop.f32.mrf.mxu1 }
 0x4fd   :  { %v1245_v12 = vadd.f32 %v1171_v6, %v3871_v9  ;;  %v1173_v14 = vadd.f32 %v1172_v7, %v3110_v23 }
 0x4ff   :  { %v1888_v13 = vmul.f32 -1.442695, %v1245_v12  ;;  %v1252_v15 = vadd.f32 %v1173_v14, %v3872_v52  ;;  %v3563_v14 = vld [vmem:[#allocation4 + $0xa0] sm:$0xff]  ;;  %v3569_v52 = vld [vmem:[#allocation4 + $0x88] sm:$0xff] }
 0x501   :  { %2478 = vpow2.f32 %v1888_v13  ;;  %v1889_v17 = vmul.f32 -1.442695, %v1252_v15  ;;  %v3557_v13 = vld [vmem:[#allocation4 + $0xb8] sm:$0xff]  ;;  %v3575_v15 = vld [vmem:[#allocation4 + $0x70] sm:$0xff] }
 0x503   :  { %2480 = vpow2.f32 %v1889_v17  ;;  %v3581_v17 = vld [vmem:[#allocation4 + $0x58] sm:$0xff] }
 0x50e   :  { %v2479_v18 = vpop.eup %2478 }
 0x50f   :  { %v1249_v19 = vadd.f32 1.0, %v2479_v18  ;;  %v3587_v18 = vld [vmem:[#allocation4 + $0x40] sm:$0xff] }
 0x510   :  { %v2481_v21 = vpop.eup %2480 }
 0x511   :  { %2482 = vrcp.f32 %v1249_v19  ;;  %v1256_v27 = vadd.f32 1.0, %v2481_v21  ;;  %v3593_v19 = vld [vmem:[#allocation4 + $0x28] sm:$0xff]  ;;  %v3600_v21 = vld [vmem:[#allocation4 + $0x10] sm:$0xff] }
 0x512   :  { %3874 = vst [vmem:[#allocation16_spill] sm:$0xff] %v3593_v19  ;;  %3875 = vst [vmem:[#allocation17_spill] sm:$0xff] %v3600_v21 }
 0x513   :  { %2484 = vrcp.f32 %v1256_v27 }
 0x51e   :  { %v2483_v29 = vpop.eup %2482 }
 0x51f   :  { %v1259_v30 = vmul.f32 %v2483_v29, %v1242_v28 }
 0x520   :  { %v2485_v10 = vpop.eup %2484 }
 0x521   :  { %v1260_v41 = vadd.f32 %v1259_v30, %v3873_v31  ;;  %v1262_v6 = vsub.f32 1.0, %v2485_v10  ;;  %v1264_v9 = vmul.f32 %v2485_v10, %v3374_v16  ;;  %v3545_v16 = vld [vmem:[#allocation4 + $0xe8] sm:$0xff] }
 0x523   :  { %2486 = vtanh.f32 %v1260_v41  ;;  %v3876_v41 = vld [vmem:[#allocation24_spill] sm:$0xff] }
 0x530   :  { %v2487_v7 = vpop.eup %2486 }
 0x531   :  { %v1263_v8 = vmul.f32 %v2487_v7, %v1262_v6 }
 0x533   :  { %v3516_v12 = vadd.f32 %v1264_v9, %v1263_v8  ;;  %v3877_v8 = vld [vmem:[#allocation25_spill] sm:$0xff] }
 0x535   :  { %1337 = vmatmul.mubr.f32.vlgmr.msra.gmra.mxu0 %v3516_v12  ;;  %2326 = vmatmul.mubr.f32.vlgmr.msra.gmra.mxu1 %v3516_v12 }
 0x536   :  { %1441 = vmatpush1.msra.mxu0 %v3288_v45  ;;  %2329 = vmatpush3.msra.mxu1 %v3379_v46 }
 0x537   :  { %1442 = vmatprep.subr.mxu0 %v3292_v40  ;;  %2330 = vmatprep.subr.mxu1 %v3840_v0 }
 0x538   :  { %1443 = vmatpush1.msra.mxu0 %v3296_v26  ;;  %2331 = vmatpush3.msra.mxu1 %v3385_v48 }
 0x539   :  { %1444 = vmatprep.subr.mxu0 %v3300_v24  ;;  %2332 = vmatprep.subr.mxu1 %v3840_v0 }
 0x53a   :  { %1445 = vmatpush1.msra.mxu0 %v3304_v42  ;;  %2333 = vmatpush3.msra.mxu1 %v3391_v51 }
 0x53b   :  { %1446 = vmatprep.subr.mxu0 %v3394_v61  ;;  %2334 = vmatprep.subr.mxu1 %v3840_v0 }
 0x53c   :  { %1447 = vmatpush1.msra.mxu0 %v3398_v20  ;;  %2335 = vmatpush3.msra.mxu1 %v3401_v39 }
 0x53d   :  { %1448 = vmatprep.subr.mxu0 %v3404_v11  ;;  %2336 = vmatprep.subr.mxu1 %v3840_v0 }
 0x53e   :  { %1449 = vmatpush1.msra.mxu0 %v3408_v55  ;;  %2337 = vmatpush3.msra.mxu1 %v3411_v5 }
 0x53f   :  { %1450 = vmatprep.subr.mxu0 %v3414_v43  ;;  %2338 = vmatprep.subr.mxu1 %v3840_v0 }
 0x540   :  { %1451 = vmatpush1.msra.mxu0 %v3418_v62  ;;  %2339 = vmatpush3.msra.mxu1 %v3421_v22 }
 0x541   :  { %1452 = vmatprep.subr.mxu0 %v3424_v4  ;;  %2340 = vmatprep.subr.mxu1 %v3840_v0 }
 0x542   :  { %1453 = vmatpush1.msra.mxu0 %v3428_v44  ;;  %2341 = vmatpush3.msra.mxu1 %v3545_v16 }
 0x543   :  { %1454 = vmatprep.subr.mxu0 %v3432_v50  ;;  %2342 = vmatprep.subr.mxu1 %v3840_v0 }
 0x544   :  { %1455 = vmatpush1.msra.mxu0 %v3436_v49  ;;  %2343 = vmatpush3.msra.mxu1 %v3551_v47 }
 0x545   :  { %1456 = vmatprep.subr.mxu0 %v3440_v25  ;;  %2344 = vmatprep.subr.mxu1 %v3840_v0 }
 0x546   :  { %1457 = vmatpush1.msra.mxu0 %v3444_v54  ;;  %2345 = vmatpush3.msra.mxu1 %v3557_v13 }
 0x547   :  { %1458 = vmatprep.subr.mxu0 %v3448_v32  ;;  %2346 = vmatprep.subr.mxu1 %v3840_v0 }
 0x548   :  { %1459 = vmatpush1.msra.mxu0 %v3452_v57  ;;  %2347 = vmatpush3.msra.mxu1 %v3563_v14 }
 0x549   :  { %1460 = vmatprep.subr.mxu0 %v3456_v33  ;;  %2348 = vmatprep.subr.mxu1 %v3840_v0 }
 0x54a   :  { %1461 = vmatpush1.msra.mxu0 %v3460_v59  ;;  %2349 = vmatpush3.msra.mxu1 %v3569_v52 }
 0x54b   :  { %1462 = vmatprep.subr.mxu0 %v3464_v34  ;;  %2350 = vmatprep.subr.mxu1 %v3840_v0 }
 0x54c   :  { %1463 = vmatpush1.msra.mxu0 %v3468_v60  ;;  %2351 = vmatpush3.msra.mxu1 %v3575_v15 }
 0x54d   :  { %1464 = vmatprep.subr.mxu0 %v3472_v35  ;;  %2352 = vmatprep.subr.mxu1 %v3840_v0 }
 0x54e   :  { %1465 = vmatpush1.msra.mxu0 %v3476_v63  ;;  %2353 = vmatpush3.msra.mxu1 %v3581_v17 }
 0x54f   :  { %1466 = vmatprep.subr.mxu0 %v3480_v36  ;;  %2354 = vmatprep.subr.mxu1 %v3840_v0 }
 0x550   :  { %1467 = vmatpush1.msra.mxu0 %v3484_v1  ;;  %2355 = vmatpush3.msra.mxu1 %v3587_v18 }
 0x551   :  { %1468 = vmatprep.subr.mxu0 %v3488_v37  ;;  %2356 = vmatprep.subr.mxu1 %v3840_v0 }
 0x552   :  { %1469 = vmatpush1.msra.mxu0 %v3492_v2  ;;  %2357 = vmatpush3.msra.mxu1 %v3593_v19 }
 0x553   :  { %1470 = vmatprep.subr.mxu0 %v3496_v38  ;;  %2358 = vmatprep.subr.mxu1 %v3840_v0 }
 0x554   :  { %1471 = vmatpush1.msra.mxu0 %v3500_v3  ;;  %1504 = vmatprep.mubr.f32.mxu0 %v3840_v0 }
 0x555   :  { %2359 = vmatpush3.msra.mxu1 %v3600_v21  ;;  %2360 = vmatprep.mubr.msk.f32.mxu1 %vm2592_vm0, %v3840_v0 }
 0x556   :  { %1608 = vmatprep.subr.mxu0 %v3363_v53  ;;  %2363 = vmatprep.subr.mxu1 %v3840_v0 }
 0x5f5   :  { %v1338_v27 = vpop.f32.mrf.mxu0  ;;  %v1409_v28 = vpop.f32.mrf.mxu1 }
 0x5f6   :  { %v1339_v29 = vadd.f32 %v1338_v27, %v3864_v58  ;;  %v1410_v2 = vadd.f32 %v1409_v28, %v3125_v56  ;;  %v1774_v28 = vld [vmem:[%s3778_s5] sm:$0xff] }
 0x5f7   :  { %v1340_v30 = vpop.f32.mrf.mxu0  ;;  %v2327_v31 = vpop.f32.mrf.mxu1 }
 0x5f8   :  { %v1413_v10 = vadd.f32 %v1339_v29, %v3876_v41  ;;  %v1341_v7 = vadd.f32 %v1340_v30, %v3110_v23  ;;  %v3878_v31 = vld [vmem:[#allocation34_spill] sm:$0xff] }
 0x5fa   :  { %v1890_v6 = vmul.f32 -1.442695, %v1413_v10  ;;  %v1420_v9 = vadd.f32 %v1341_v7, %v3877_v8 }
 0x5fc   :  { %2488 = vpow2.f32 %v1890_v6  ;;  %v1891_v21 = vmul.f32 -1.442695, %v1420_v9 }
 0x5fe   :  { %2490 = vpow2.f32 %v1891_v21 }
 0x609   :  { %v2489_v3 = vpop.eup %2488 }
 0x60a   :  { %v1417_v53 = vadd.f32 1.0, %v2489_v3  ;;  %v1785_v3 = vld [vmem:[%s3778_s5 + $0x58] sm:$0xff] }
 0x60b   :  { %v2491_v38 = vpop.eup %2490 }
 0x60c   :  { %2492 = vrcp.f32 %v1417_v53  ;;  %v1424_v19 = vadd.f32 1.0, %v2491_v38  ;;  %v1786_v38 = vld [vmem:[%s3778_s5 + $0x60] sm:$0xff] }
 0x60e   :  { %2494 = vrcp.f32 %v1424_v19  ;;  %v1775_v19 = vld [vmem:[%s3778_s5 + $0x8] sm:$0xff] }
 0x619   :  { %v2493_v27 = vpop.eup %2492 }
 0x61a   :  { %v1427_v58 = vmul.f32 %v2493_v27, %v1410_v2  ;;  %v1787_v2 = vld [vmem:[%s3778_s5 + $0x68] sm:$0xff] }
 0x61b   :  { %v2495_v41 = vpop.eup %2494 }
 0x61c   :  { %v1428_v29 = vadd.f32 %v1427_v58, %v3878_v31  ;;  %v1430_v30 = vsub.f32 1.0, %v2495_v41  ;;  %v1432_v7 = vmul.f32 %v2495_v41, %v3516_v12  ;;  %v1784_v12 = vld [vmem:[%s3778_s5 + $0x50] sm:$0xff] }
 0x61e   :  { %2496 = vtanh.f32 %v1428_v29  ;;  %v3888_v29 = vld [vmem:[#allocation29_spill] sm:$0xff] }
 0x62b   :  { %v2497_v10 = vpop.eup %2496 }
 0x62c   :  { %v1431_v6 = vmul.f32 %v2497_v10, %v1430_v30 }
 0x62e   :  { %v3614_v21 = vadd.f32 %v1432_v7, %v1431_v6  ;;  %v3889_v6 = vld [vmem:[#allocation31_spill] sm:$0xff] }
 0x630   :  { %1505 = vmatmul.mubr.f32.vlgmr.msra.gmra.mxu0 %v3614_v21  ;;  %2361 = vmatmul.mubr.f32.vlgmr.msra.gmra.mxu1 %v3614_v21 }
 0x631   :  { %1609 = vmatpush1.msra.mxu0 %v3288_v45  ;;  %2364 = vmatpush3.msra.mxu1 %v3379_v46  ;;  %v3879_v45 = vld [vmem:[#allocation8_spill] sm:$0xff] }
 0x632   :  { %1610 = vmatprep.subr.mxu0 %v3292_v40  ;;  %2365 = vmatprep.subr.mxu1 %v3840_v0  ;;  %v3880_v40 = vld [vmem:[#allocation16_spill] sm:$0xff] }
 0x633   :  { %1611 = vmatpush1.msra.mxu0 %v3296_v26  ;;  %2366 = vmatpush3.msra.mxu1 %v3385_v48  ;;  %v3881_v26 = vld [vmem:[#allocation13_spill] sm:$0xff]  ;;  %v3884_v48 = vld [vmem:[#allocation30_spill] sm:$0xff] }
 0x634   :  { %1612 = vmatprep.subr.mxu0 %v3300_v24  ;;  %2367 = vmatprep.subr.mxu1 %v3840_v0  ;;  %v3882_v24 = vld [vmem:[#allocation9_spill] sm:$0xff] }
 0x635   :  { %1613 = vmatpush1.msra.mxu0 %v3304_v42  ;;  %2368 = vmatpush3.msra.mxu1 %v3391_v51  ;;  %v3883_v42 = vld [vmem:[#allocation17_spill] sm:$0xff] }
 0x636   :  { %1614 = vmatprep.subr.mxu0 %v3394_v61  ;;  %2369 = vmatprep.subr.mxu1 %v3840_v0 }
 0x637   :  { %1615 = vmatpush1.msra.mxu0 %v3398_v20  ;;  %2370 = vmatpush3.msra.mxu1 %v3401_v39  ;;  %v3885_v39 = vld [vmem:[#allocation26_spill] sm:$0xff] }
 0x638   :  { %1616 = vmatprep.subr.mxu0 %v3404_v11  ;;  %2371 = vmatprep.subr.mxu1 %v3840_v0 }
 0x639   :  { %1617 = vmatpush1.msra.mxu0 %v3408_v55  ;;  %2372 = vmatpush3.msra.mxu1 %v3411_v5 }
 0x63a   :  { %1618 = vmatprep.subr.mxu0 %v3414_v43  ;;  %2373 = vmatprep.subr.mxu1 %v3840_v0  ;;  %v3886_v43 = vld [vmem:[#allocation27_spill] sm:$0xff] }
 0x63b   :  { %1619 = vmatpush1.msra.mxu0 %v3418_v62  ;;  %2374 = vmatpush3.msra.mxu1 %v3421_v22 }
 0x63c   :  { %1620 = vmatprep.subr.mxu0 %v3424_v4  ;;  %2375 = vmatprep.subr.mxu1 %v3840_v0 }
 0x63d   :  { %1621 = vmatpush1.msra.mxu0 %v3428_v44  ;;  %2376 = vmatpush3.msra.mxu1 %v3545_v16  ;;  %v1783_v16 = vld [vmem:[%s3778_s5 + $0x48] sm:$0xff] }
 0x63e   :  { %1622 = vmatprep.subr.mxu0 %v3432_v50  ;;  %2377 = vmatprep.subr.mxu1 %v3840_v0 }
 0x63f   :  { %1623 = vmatpush1.msra.mxu0 %v3436_v49  ;;  %2378 = vmatpush3.msra.mxu1 %v3551_v47  ;;  %v1782_v47 = vld [vmem:[%s3778_s5 + $0x40] sm:$0xff] }
 0x640   :  { %1624 = vmatprep.subr.mxu0 %v3440_v25  ;;  %2379 = vmatprep.subr.mxu1 %v3840_v0 }
 0x641   :  { %1625 = vmatpush1.msra.mxu0 %v3444_v54  ;;  %2380 = vmatpush3.msra.mxu1 %v3557_v13  ;;  %v1781_v13 = vld [vmem:[%s3778_s5 + $0x38] sm:$0xff] }
 0x642   :  { %1626 = vmatprep.subr.mxu0 %v3448_v32  ;;  %2381 = vmatprep.subr.mxu1 %v3840_v0 }
 0x643   :  { %1627 = vmatpush1.msra.mxu0 %v3452_v57  ;;  %2382 = vmatpush3.msra.mxu1 %v3563_v14  ;;  %v3887_v57 = vld [vmem:[#allocation37_spill] sm:$0xff] }
 0x644   :  { %1628 = vmatprep.subr.mxu0 %v3456_v33  ;;  %2383 = vmatprep.subr.mxu1 %v3840_v0  ;;  %v1780_v14 = vld [vmem:[%s3778_s5 + $0x30] sm:$0xff] }
 0x645   :  { %1629 = vmatpush1.msra.mxu0 %v3460_v59  ;;  %2384 = vmatpush3.msra.mxu1 %v3569_v52  ;;  %v1779_v52 = vld [vmem:[%s3778_s5 + $0x28] sm:$0xff] }
 0x646   :  { %1630 = vmatprep.subr.mxu0 %v3464_v34  ;;  %2385 = vmatprep.subr.mxu1 %v3840_v0 }
 0x647   :  { %1631 = vmatpush1.msra.mxu0 %v3468_v60  ;;  %2386 = vmatpush3.msra.mxu1 %v3575_v15  ;;  %v1778_v15 = vld [vmem:[%s3778_s5 + $0x20] sm:$0xff] }
 0x648   :  { %1632 = vmatprep.subr.mxu0 %v3472_v35  ;;  %2387 = vmatprep.subr.mxu1 %v3840_v0 }
 0x649   :  { %1633 = vmatpush1.msra.mxu0 %v3476_v63  ;;  %2388 = vmatpush3.msra.mxu1 %v3581_v17  ;;  %v1777_v17 = vld [vmem:[%s3778_s5 + $0x18] sm:$0xff] }
 0x64a   :  { %1634 = vmatprep.subr.mxu0 %v3480_v36  ;;  %2389 = vmatprep.subr.mxu1 %v3840_v0 }
 0x64b   :  { %1635 = vmatpush1.msra.mxu0 %v3484_v1  ;;  %2390 = vmatpush3.msra.mxu1 %v3587_v18  ;;  %v1789_v1 = vld [vmem:[%s3778_s5 + $0x78] sm:$0xff]  ;;  %v1776_v18 = vld [vmem:[%s3778_s5 + $0x10] sm:$0xff] }
 0x64c   :  { %1636 = vmatprep.subr.mxu0 %v3488_v37  ;;  %2391 = vmatprep.subr.mxu1 %v3840_v0  ;;  %v1788_v37 = vld [vmem:[%s3778_s5 + $0x70] sm:$0xff] }
 0x64d   :  { %1637 = vmatpush1.msra.mxu0 %v3879_v45  ;;  %2392 = vmatpush3.msra.mxu1 %v3880_v40 }
 0x64e   :  { %1638 = vmatprep.subr.mxu0 %v3881_v26  ;;  %2393 = vmatprep.subr.mxu1 %v3840_v0 }
 0x64f   :  { %1639 = vmatpush1.msra.mxu0 %v3882_v24  ;;  %1672 = vmatprep.mubr.f32.mxu0 %v3840_v0 }
 0x650   :  { %2394 = vmatpush3.msra.mxu1 %v3883_v42  ;;  %2395 = vmatprep.mubr.msk.f32.mxu1 %vm2592_vm0, %v3840_v0 }
 0x651   :  { %2398 = vmatprep.subr.mxu0 %v3840_v0 }
 0x6f0   :  { %v1506_v58 = vpop.f32.mrf.mxu0  ;;  %v1577_v46 = vpop.f32.mrf.mxu1 }
 0x6f1   :  { %v1507_v51 = vadd.f32 %v1506_v58, %v3884_v48  ;;  %v1578_v25 = vadd.f32 %v1577_v46, %v3125_v56  ;;  %v3890_v46 = vld [vmem:[#allocation36_spill] sm:$0xff] }
 0x6f2   :  { %v1508_v61 = vpop.f32.mrf.mxu0  ;;  %v2362_v20 = vpop.f32.mrf.mxu1 }
 0x6f3   :  { %v1581_v11 = vadd.f32 %v1507_v51, %v3885_v39  ;;  %v1509_v5 = vadd.f32 %v1508_v61, %v3110_v23 }
 0x6f5   :  { %v1892_v55 = vmul.f32 -1.442695, %v1581_v11  ;;  %v1588_v62 = vadd.f32 %v1509_v5, %v3886_v43 }
 0x6f7   :  { %2498 = vpow2.f32 %v1892_v55  ;;  %v1893_v22 = vmul.f32 -1.442695, %v1588_v62  ;;  %v1896_v55 = vld [vmem:[%s3779_s6] ss:$0 sm:$0xff] }
 0x6f9   :  { %2500 = vpow2.f32 %v1893_v22 }
 0x704   :  { %v2499_v4 = vpop.eup %2498 }
 0x705   :  { %v1585_v44 = vadd.f32 1.0, %v2499_v4 }
 0x706   :  { %v2501_v50 = vpop.eup %2500 }
 0x707   :  { %2502 = vrcp.f32 %v1585_v44  ;;  %v1592_v49 = vadd.f32 1.0, %v2501_v50 }
 0x709   :  { %2504 = vrcp.f32 %v1592_v49 }
 0x714   :  { %v2503_v54 = vpop.eup %2502 }
 0x715   :  { %v1595_v32 = vmul.f32 %v2503_v54, %v1578_v25 }
 0x716   :  { %v2505_v59 = vpop.eup %2504 }
 0x717   :  { %v1596_v33 = vadd.f32 %v1595_v32, %v3887_v57  ;;  %v1598_v34 = vsub.f32 1.0, %v2505_v59  ;;  %v1600_v63 = vmul.f32 %v2505_v59, %v3614_v21 }
 0x719   :  { %2506 = vtanh.f32 %v1596_v33 }
 0x726   :  { %v2507_v60 = vpop.eup %2506 }
 0x727   :  { %v1599_v35 = vmul.f32 %v2507_v60, %v1598_v34 }
 0x729   :  { %v3691_v36 = vadd.f32 %v1600_v63, %v1599_v35 }
 0x72b   :  { %1673 = vmatmul.mubr.f32.vlgmr.msra.gmra.mxu0 %v3691_v36  ;;  %2396 = vmatmul.mubr.f32.vlgmr.msra.gmra.mxu1 %v3691_v36 }
 0x72c   :  { %2430 = vmatprep.mubr.msk.f32.mxu0 %vm2592_vm0, %v3840_v0  ;;  %2399 = vmatpush3.msra.mxu0 %v1789_v1 }
 0x72d   :  { %2400 = vmatprep.subr.mxu0 %v3840_v0 }
 0x72e   :  { %2401 = vmatpush3.msra.mxu0 %v1788_v37 }
 0x72f   :  { %2402 = vmatprep.subr.mxu0 %v3840_v0 }
 0x730   :  { %2403 = vmatpush3.msra.mxu0 %v1787_v2 }
 0x731   :  { %2404 = vmatprep.subr.mxu0 %v3840_v0 }
 0x732   :  { %2405 = vmatpush3.msra.mxu0 %v1786_v38 }
 0x733   :  { %2406 = vmatprep.subr.mxu0 %v3840_v0 }
 0x734   :  { %2407 = vmatpush3.msra.mxu0 %v1785_v3 }
 0x735   :  { %2408 = vmatprep.subr.mxu0 %v3840_v0 }
 0x736   :  { %2409 = vmatpush3.msra.mxu0 %v1784_v12 }
 0x737   :  { %2410 = vmatprep.subr.mxu0 %v3840_v0 }
 0x738   :  { %2411 = vmatpush3.msra.mxu0 %v1783_v16 }
 0x739   :  { %2412 = vmatprep.subr.mxu0 %v3840_v0 }
 0x73a   :  { %2413 = vmatpush3.msra.mxu0 %v1782_v47 }
 0x73b   :  { %2414 = vmatprep.subr.mxu0 %v3840_v0 }
 0x73c   :  { %2415 = vmatpush3.msra.mxu0 %v1781_v13 }
 0x73d   :  { %2416 = vmatprep.subr.mxu0 %v3840_v0 }
 0x73e   :  { %2417 = vmatpush3.msra.mxu0 %v1780_v14 }
 0x73f   :  { %2418 = vmatprep.subr.mxu0 %v3840_v0 }
 0x740   :  { %2419 = vmatpush3.msra.mxu0 %v1779_v52 }
 0x741   :  { %2420 = vmatprep.subr.mxu0 %v3840_v0 }
 0x742   :  { %2421 = vmatpush3.msra.mxu0 %v1778_v15 }
 0x743   :  { %2422 = vmatprep.subr.mxu0 %v3840_v0 }
 0x744   :  { %2423 = vmatpush3.msra.mxu0 %v1777_v17 }
 0x745   :  { %2424 = vmatprep.subr.mxu0 %v3840_v0 }
 0x746   :  { %2425 = vmatpush3.msra.mxu0 %v1776_v18 }
 0x747   :  { %2426 = vmatprep.subr.mxu0 %v3840_v0 }
 0x748   :  { %2427 = vmatpush3.msra.mxu0 %v1775_v19 }
 0x749   :  { %2428 = vmatprep.subr.mxu0 %v3840_v0 }
 0x74a   :  { %2429 = vmatpush3.msra.mxu0 %v1774_v28 }
 0x7eb   :  { %v1674_v8 = vpop.f32.mrf.mxu0  ;;  %v1745_v9 = vpop.f32.mrf.mxu1 }
 0x7ec   :  { %v1675_v53 = vadd.f32 %v1674_v8, %v3884_v48  ;;  %v1746_v24 = vadd.f32 %v1745_v9, %v3125_v56 }
 0x7ed   :  { %v1676_v27 = vpop.f32.mrf.mxu0  ;;  %v2397_v31 = vpop.f32.mrf.mxu1 }
 0x7ee   :  { %v1749_v41 = vadd.f32 %v1675_v53, %v3888_v29  ;;  %v1677_v10 = vadd.f32 %v1676_v27, %v3110_v23 }
 0x7f0   :  { %v1894_v30 = vmul.f32 -1.442695, %v1749_v41  ;;  %v1756_v7 = vadd.f32 %v1677_v10, %v3889_v6 }
 0x7f2   :  { %2508 = vpow2.f32 %v1894_v30  ;;  %v1895_v21 = vmul.f32 -1.442695, %v1756_v7 }
 0x7f4   :  { %2510 = vpow2.f32 %v1895_v21 }
 0x7ff   :  { %v2509_v45 = vpop.eup %2508 }
 0x800   :  { %v1753_v40 = vadd.f32 1.0, %v2509_v45 }
 0x801   :  { %v2511_v0 = vpop.eup %2510 }
 0x802   :  { %2512 = vrcp.f32 %v1753_v40  ;;  %v1760_v26 = vadd.f32 1.0, %v2511_v0 }
 0x804   :  { %2514 = vrcp.f32 %v1760_v26 }
 0x80f   :  { %v2513_v42 = vpop.eup %2512 }
 0x810   :  { %v1763_v58 = vmul.f32 %v2513_v42, %v1746_v24 }
 0x811   :  { %v2515_v51 = vpop.eup %2514 }
 0x812   :  { %v1764_v48 = vadd.f32 %v1763_v58, %v3890_v46  ;;  %v1766_v23 = vsub.f32 1.0, %v2515_v51  ;;  %v1768_v39 = vmul.f32 %v2515_v51, %v3691_v36 }
 0x814   :  { %2516 = vtanh.f32 %v1764_v48 }
 0x821   :  { %v2517_v61 = vpop.eup %2516 }
 0x822   :  { %v1767_v20 = vmul.f32 %v2517_v61, %v1766_v23 }
 0x824   :  { %v1769_v11 = vadd.f32 %v1768_v39, %v1767_v20 }
 0x826   :  { %2431 = vmatmul.mubr.f32.vlgmr.msra.gmra.mxu0 %v1769_v11 }
 0x8e6   :  { %v1863_v5 = vpop.f32.mrf.mxu0 }
 0x8e7   :  { %v1864_v56 = vadd.f32 %v1896_v55, %v1863_v5 }
 0x8e8   :  { %v2432_v43 = vpop.f32.mrf.mxu0 }
 0x8e9   :  { %1867 = vst [vmem:[%s3780_s7] sm:$0xff] %v1864_v56 }
 0x8ea   :  { %1872 = vsyncpa [#allocation5], 1 }

// kernel: gru_classifier_forward.2
= control target key start
LH: loop header
LB: loop body
LE: loop exit
PB: predicated region body
PF: predicated region fallthrough
CT: control target
= control target key end

     0   :  { %10 = vsyncpa [#allocation5], 0  ;;  %s3892_s0 = inlined_call_operand.vmem [shape: f32[8,8,16], index: 0, kind: input, shape index: {}]   ;;  %s3893_s1 = inlined_call_operand.hbm [shape: f32[16,384], index: 1, kind: input, shape index: {}]   ;;  %s3894_s2 = inlined_call_operand.hbm [shape: f32[128,384], index: 2, kind: input, shape index: {}]   ;;  %s3895_s3 = inlined_call_operand.hbm [shape: f32[1,384], index: 3, kind: input, shape index: {}]   ;;  %s3896_s4 = inlined_call_operand.hbm [shape: f32[1,384], index: 4, kind: input, shape index: {}]   ;;  %s3897_s5 = inlined_call_operand.vmem [shape: f32[8,8,128], index: 5, kind: output, shape index: {}]  }
   0x1   :  { %11 = vsyncpa [#allocation7], 0 }
   0x2   :  { %12 = vsyncpa [#allocation10], 0  ;;  %s2924_s18 = smov [#allocation6]   ;;  %s2925_s20 = smov [#allocation4]  }
   0x3   :  { %s32_s19 = sshll.u32 %s2924_s18, 4  ;;  %s20_s21 = sshll.u32 %s2925_s20, 4  ;;  %s33_s19 = int_to_ptr.vmem [resolvable:$true] %s32_s19  ;;  %s21_s21 = int_to_ptr.vmem [resolvable:$true] %s20_s21 }
   0x4   :  { %s2846_s22 = scalar_lea.vmem %s33_s19, 6144  ;;  %p2851_p1 = scmp.lt.s32.totalorder %s33_s19, %s33_s19 }
   0x5   :  { %p2847_p0 = scmp.ne.s32.totalorder %s33_s19, %s2846_s22  ;;  %p2852_p2 = scmp.lt.s32.totalorder %s2846_s22, %s2846_s22 }
   0x7   :  { %p2853_p3 = por %p2852_p2, %p2851_p1 }
   0x9   :  { %p2854_p4 = pnand %p2853_p3, %p2847_p0 }
   0xb   :  { %2857 = shalt.err (!%p2854_p4)
}
   0xc   :  { %s2926_s23 = smov 384   ;;  %s2927_s24 = smov 24  }
   0xd   :  { %38 = dma.hbm_to_vmem [thread:$0]  %s3894_s2, 6144, %s33_s19, [#allocation7], %s2926_s23, %s2926_s23, %s2927_s24  }
   0xe   :  { %s2866_s27 = scalar_lea.vmem %s21_s21, 768  ;;  %p2871_p6 = scmp.lt.s32.totalorder %s21_s21, %s21_s21 }
   0xf   :  { %p2867_p5 = scmp.ne.s32.totalorder %s21_s21, %s2866_s27  ;;  %p2872_p7 = scmp.lt.s32.totalorder %s2866_s27, %s2866_s27 }
  0x11   :  { %p2873_p8 = por %p2872_p7, %p2871_p6 }
  0x13   :  { %p2874_p9 = pnand %p2873_p8, %p2867_p5 }
  0x15   :  { %2877 = shalt.err (!%p2874_p9)
}
  0x16   :  { %26 = dma.hbm_to_vmem [thread:$0]  %s3893_s1, 768, %s21_s21, [#allocation5], %s2926_s23, %s2926_s23, %s2927_s24  }
  0x17   :  { %s2928_s30 = smov [#allocation8]   ;;  %s2929_s7 = smov [#allocation9]  }
  0x18   :  { %s45_s6 = sshll.u32 %s2928_s30, 4  ;;  %s55_s8 = sshll.u32 %s2929_s7, 4  ;;  %s46_s6 = int_to_ptr.vmem [resolvable:$true] %s45_s6  ;;  %s56_s8 = int_to_ptr.vmem [resolvable:$true] %s55_s8 }
  0x19   :  { %s2886_s9 = scalar_lea.vmem %s46_s6, 48  ;;  %s2890_s2 = scalar_lea.vmem %s46_s6, 64 }
  0x1a   :  { %p2887_p10 = scmp.ne.s32.totalorder %s46_s6, %s2886_s9  ;;  %p2891_p11 = scmp.lt.s32.totalorder %s46_s6, %s46_s6 }
  0x1b   :  { %p2892_p12 = scmp.lt.s32.totalorder %s2890_s2, %s2886_s9 }
  0x1d   :  { %p2893_p13 = por %p2892_p12, %p2891_p11 }
  0x1f   :  { %p2894_p0 = pnand %p2893_p13, %p2887_p10 }
  0x21   :  { %2897 = shalt.err (!%p2894_p0)
}
  0x22   :  { %48 = dma.hbm_to_vmem [thread:$0]  %s3895_s3, 48, %s46_s6, [#allocation7]  }
  0x23   :  { %s2906_s12 = scalar_lea.vmem %s56_s8, 48  ;;  %s2910_s1 = scalar_lea.vmem %s56_s8, 64 }
  0x24   :  { %p2907_p1 = scmp.ne.s32.totalorder %s56_s8, %s2906_s12  ;;  %p2911_p2 = scmp.lt.s32.totalorder %s56_s8, %s56_s8 }
  0x25   :  { %p2912_p3 = scmp.lt.s32.totalorder %s2910_s1, %s2906_s12 }
  0x27   :  { %p2913_p4 = por %p2912_p3, %p2911_p2 }
  0x29   :  { %p2914_p5 = pnand %p2913_p4, %p2907_p1 }
  0x2b   :  { %2917 = shalt.err (!%p2914_p5)
}
  0x2c   :  { %58 = dma.hbm_to_vmem [thread:$0]  %s3896_s4, 48, %s56_s8, [#allocation10]  }
  0x2d   :  { %2918 = dma.done.wait [#allocation5], 768  }
  0x2e   :  { %2919 = vsyncadd [#allocation5], 4294966528 }
  0x2f   :  { %2920 = dma.done.wait [#allocation7], 6192  }
  0x30   :  { %2921 = vsyncadd [#allocation7], 4294961104 }
  0x31   :  { %2922 = dma.done.wait [#allocation10], 48  }
  0x32   :  { %2923 = vsyncadd [#allocation10], 4294967248  ;;  %v3898_v0 = vmov 0.0   ;;  %v88_v1 = vld [vmem:[#allocation4 + $0x20] sm:$0xff]  ;;  %v87_v2 = vld [vmem:[#allocation4 + $0x18] sm:$0xff]  ;;  %vm107_vm0 = vcmask 130048   ;;  %v92_v63 = vlaneseq }
  0x33   :  { %196 = vmatprep.mubr.f32.mxu0 %v3898_v0  ;;  %v85_v3 = vld [vmem:[#allocation4 + $0x8] sm:$0xff]  ;;  %160 = vmatprep.subr.mxu0 %v88_v1  ;;  %v84_v4 = vld [vmem:[#allocation4] sm:$0xff]  ;;  %v2981_v7 = vld [vmem:[#allocation6 + $0x168] sm:$0xff]  ;;  %vm2931_vm1 = vmmov 0  }
  0x34   :  { %v76_v5 = vld [vmem:[%s3892_s0] sm:$0xff]  ;;  %161 = vmatpush1.msra.mxu0 %v87_v2  ;;  %v2983_v8 = vld [vmem:[#allocation6 + $0x158] sm:$0xff]  ;;  %v2994_v11 = vld [vmem:[#allocation6 + $0x140] sm:$0xff]  ;;  %v93_v1 = vshrl.u32 %v92_v63, 7 }
  0x35   :  { %v2978_v6 = vld [vmem:[#allocation6 + $0x170] sm:$0xff]  ;;  %2458 = vmatprep.mubr.msk.f32.mxu1 %vm107_vm0, %v76_v5  ;;  %162 = vmatprep.subr.mxu0 %v85_v3  ;;  %v77_v10 = vld [vmem:[%s3892_s0 + $0x8] sm:$0xff]  ;;  %v3000_v13 = vld [vmem:[#allocation6 + $0x128] sm:$0xff] }
  0x36   :  { %163 = vmatpush1.msra.mxu0 %v84_v4  ;;  %v2987_v9 = vld [vmem:[#allocation6 + $0x150] sm:$0xff]  ;;  %v2997_v12 = vld [vmem:[#allocation6 + $0x138] sm:$0xff]  ;;  %v3004_v14 = vld [vmem:[#allocation6 + $0x120] sm:$0xff]  ;;  %v3272_v2 = vsub.s32 0, %v93_v1 }
  0x37   :  { %2269 = vmatmul.mubr.msk.f32.vlgmr.msra.gmra.mxu0 %vm107_vm0, %v76_v5  ;;  %446 = vmatprep.subr.mxu0 %v2978_v6  ;;  %v3011_v15 = vld [vmem:[%s3892_s0 + $0x10] sm:$0xff]  ;;  %v3013_v16 = vld [vmem:[#allocation6 + $0x110] sm:$0xff]  ;;  %v3016_v17 = vld [vmem:[#allocation6 + $0x108] sm:$0xff]  ;;  %v3274_v5 = vsub.s32 1, %v93_v1 }
  0x38   :  { %447 = vmatpush1.msra.mxu0 %v2981_v7  ;;  %202 = vmatprep.mubr.f32.mxu0 %v3898_v0  ;;  %v3019_v18 = vld [vmem:[#allocation6 + $0xf8] sm:$0xff]  ;;  %v3024_v19 = vld [vmem:[#allocation6 + $0xf0] sm:$0xff]  ;;  %v3031_v21 = vld [vmem:[%s3892_s0 + $0x18] sm:$0xff]  ;;  %3942 = vst [vmem:[#allocation22_spill] sm:$0xff] %v3272_v2 }
  0x39   :  { %448 = vmatprep.subr.mxu0 %v2983_v8  ;;  %v89_v20 = vld [vmem:[#allocation4 + $0x28] sm:$0xff]  ;;  %v3033_v22 = vld [vmem:[#allocation6 + $0xe0] sm:$0xff]  ;;  %v3039_v24 = vld [vmem:[#allocation6 + $0xc8] sm:$0xff]  ;;  %3943 = vst [vmem:[#allocation23_spill] sm:$0xff] %v3274_v5 }
  0x3a   :  { %449 = vmatpush1.msra.mxu0 %v2987_v9  ;;  %v3036_v23 = vld [vmem:[#allocation6 + $0xd8] sm:$0xff]  ;;  %2454 = vmatprep.subr.mxu1 %v89_v20  ;;  %v86_v25 = vld [vmem:[#allocation4 + $0x10] sm:$0xff]  ;;  %v3051_v27 = vld [vmem:[%s3892_s0 + $0x20] sm:$0xff] }
  0x3b   :  { %2270 = vmatmul.mubr.msk.f32.gmra.mxu0 %vm107_vm0, %v77_v10  ;;  %450 = vmatprep.subr.mxu0 %v2994_v11  ;;  %v3044_v26 = vld [vmem:[#allocation6 + $0xc0] sm:$0xff]  ;;  %v3053_v28 = vld [vmem:[#allocation6 + $0xb0] sm:$0xff]  ;;  %v3056_v29 = vld [vmem:[#allocation6 + $0xa8] sm:$0xff] }
  0x3c   :  { %451 = vmatpush1.msra.mxu0 %v2997_v12  ;;  %208 = vmatprep.mubr.f32.mxu0 %v3898_v0  ;;  %v3059_v30 = vld [vmem:[#allocation6 + $0x98] sm:$0xff]  ;;  %v3064_v31 = vld [vmem:[#allocation6 + $0x90] sm:$0xff]  ;;  %v3073_v33 = vld [vmem:[#allocation6 + $0x80] sm:$0xff] }
  0x3d   :  { %452 = vmatprep.subr.mxu0 %v3000_v13  ;;  %2455 = vmatpush3.msra.mxu1 %v89_v20  ;;  %v3071_v32 = vld [vmem:[%s3892_s0 + $0x28] sm:$0xff]  ;;  %v3080_v35 = vld [vmem:[#allocation6 + $0x68] sm:$0xff]  ;;  %v3088_v37 = vld [vmem:[#allocation6 + $0x60] sm:$0xff] }
  0x3e   :  { %453 = vmatpush1.msra.mxu0 %v3004_v14  ;;  %2456 = vmatprep.subr.mxu1 %v86_v25  ;;  %v3076_v34 = vld [vmem:[#allocation6 + $0x78] sm:$0xff]  ;;  %v82_v38 = vld [vmem:[%s3892_s0 + $0x30] sm:$0xff]  ;;  %v3095_v39 = vld [vmem:[#allocation6 + $0x50] sm:$0xff] }
  0x3f   :  { %2271 = vmatmul.mubr.msk.f32.gmra.mxu0 %vm107_vm0, %v3011_v15  ;;  %454 = vmatprep.subr.mxu0 %v3013_v16  ;;  %v3083_v36 = vld [vmem:[#allocation6 + $0x178] sm:$0xff]  ;;  %v3098_v40 = vld [vmem:[#allocation6 + $0x48] sm:$0xff]  ;;  %v3105_v42 = vld [vmem:[#allocation6 + $0x160] sm:$0xff] }
  0x40   :  { %455 = vmatpush1.msra.mxu0 %v3016_v17  ;;  %214 = vmatprep.mubr.f32.mxu0 %v3898_v0  ;;  %v3102_v41 = vld [vmem:[#allocation6 + $0x38] sm:$0xff]  ;;  %v3109_v43 = vld [vmem:[#allocation6 + $0x30] sm:$0xff]  ;;  %v83_v44 = vld [vmem:[%s3892_s0 + $0x38] sm:$0xff] }
  0x41   :  { %456 = vmatprep.subr.mxu0 %v3019_v18  ;;  %2457 = vmatpush3.msra.mxu1 %v86_v25  ;;  %3934 = vst [vmem:[#allocation14_spill] sm:$0xff] %v3109_v43  ;;  %v3116_v45 = vld [vmem:[#allocation6 + $0x20] sm:$0xff]  ;;  %v3119_v46 = vld [vmem:[#allocation6 + $0x18] sm:$0xff]  ;;  %v3123_v47 = vld [vmem:[#allocation6 + $0x8] sm:$0xff] }
  0x42   :  { %457 = vmatpush1.msra.mxu0 %v3024_v19  ;;  %2470 = vmatprep.subr.mxu1 %v3898_v0  ;;  %3935 = vst [vmem:[#allocation15_spill] sm:$0xff] %v3116_v45  ;;  %3936 = vst [vmem:[#allocation16_spill] sm:$0xff] %v3119_v46  ;;  %v3126_v48 = vld [vmem:[#allocation6 + $0x148] sm:$0xff]  ;;  %v3130_v49 = vld [vmem:[#allocation6] sm:$0xff] }
  0x43   :  { %2272 = vmatmul.mubr.msk.f32.gmra.mxu0 %vm107_vm0, %v3031_v21  ;;  %458 = vmatprep.subr.mxu0 %v3033_v22  ;;  %3937 = vst [vmem:[#allocation17_spill] sm:$0xff] %v3123_v47  ;;  %3938 = vst [vmem:[#allocation18_spill] sm:$0xff] %v3130_v49  ;;  %v3134_v50 = vld [vmem:[#allocation6 + $0x130] sm:$0xff]  ;;  %v3140_v51 = vld [vmem:[#allocation6 + $0x118] sm:$0xff] }
  0x44   :  { %459 = vmatpush1.msra.mxu0 %v3036_v23  ;;  %220 = vmatprep.mubr.f32.mxu0 %v3898_v0  ;;  %v3145_v52 = vld [vmem:[#allocation6 + $0x100] sm:$0xff]  ;;  %v3152_v53 = vld [vmem:[#allocation6 + $0xe8] sm:$0xff]  ;;  %v3160_v54 = vld [vmem:[#allocation6 + $0xd0] sm:$0xff] }
  0x45   :  { %460 = vmatprep.subr.mxu0 %v3039_v24  ;;  %2459 = vmatmul.mubr.msk.f32.vlgmr.msra.gmra.mxu1 %vm107_vm0, %v77_v10  ;;  %v3166_v55 = vld [vmem:[#allocation6 + $0xb8] sm:$0xff]  ;;  %v3173_v56 = vld [vmem:[#allocation6 + $0xa0] sm:$0xff]  ;;  %v3179_v57 = vld [vmem:[#allocation6 + $0x88] sm:$0xff] }
  0x46   :  { %461 = vmatpush1.msra.mxu0 %v3044_v26  ;;  %2471 = vmatpush3.msra.mxu1 %v3083_v36  ;;  %v3186_v58 = vld [vmem:[#allocation6 + $0x70] sm:$0xff]  ;;  %v3192_v59 = vld [vmem:[#allocation6 + $0x58] sm:$0xff]  ;;  %v3198_v60 = vld [vmem:[#allocation6 + $0x40] sm:$0xff] }
  0x47   :  { %2273 = vmatmul.mubr.msk.f32.gmra.mxu0 %vm107_vm0, %v3051_v27  ;;  %462 = vmatprep.subr.mxu0 %v3053_v28  ;;  %3939 = vst [vmem:[#allocation19_spill] sm:$0xff] %v3198_v60  ;;  %v3204_v61 = vld [vmem:[#allocation6 + $0x28] sm:$0xff]  ;;  %v3210_v62 = vld [vmem:[#allocation6 + $0x10] sm:$0xff]  ;;  %v90_v3 = vld [vmem:[#allocation8] sm:$0x7] }
  0x48   :  { %463 = vmatpush1.msra.mxu0 %v3056_v29  ;;  %226 = vmatprep.mubr.f32.mxu0 %v3898_v0  ;;  %3940 = vst [vmem:[#allocation20_spill] sm:$0xff] %v3204_v61  ;;  %3941 = vst [vmem:[#allocation21_spill] sm:$0xff] %v3210_v62  ;;  %v95_v10 = vrot.slane %v90_v3, %v3272_v2  ;;  %v99_v20 = vrot.slane %v90_v3, %v3274_v5 }
  0x49   :  { %464 = vmatprep.subr.mxu0 %v3059_v30  ;;  %2472 = vmatprep.subr.mxu1 %v3898_v0 }
  0x4a   :  { %465 = vmatpush1.msra.mxu0 %v3064_v31  ;;  %2473 = vmatpush3.msra.mxu1 %v3105_v42 }
  0x4b   :  { %2274 = vmatmul.mubr.msk.f32.gmra.mxu0 %vm107_vm0, %v3071_v32  ;;  %466 = vmatprep.subr.mxu0 %v3073_v33 }
  0x4c   :  { %467 = vmatpush1.msra.mxu0 %v3076_v34  ;;  %232 = vmatprep.mubr.f32.mxu0 %v3898_v0 }
  0x4d   :  { %468 = vmatprep.subr.mxu0 %v3080_v35  ;;  %2474 = vmatprep.subr.mxu1 %v3898_v0 }
  0x4e   :  { %469 = vmatpush1.msra.mxu0 %v3088_v37  ;;  %2475 = vmatpush3.msra.mxu1 %v3126_v48 }
  0x4f   :  { %2275 = vmatmul.mubr.msk.f32.gmra.mxu0 %vm107_vm0, %v82_v38  ;;  %470 = vmatprep.subr.mxu0 %v3095_v39 }
  0x50   :  { %471 = vmatpush1.msra.mxu0 %v3098_v40  ;;  %238 = vmatprep.mubr.f32.mxu0 %v3898_v0 }
  0x51   :  { %472 = vmatprep.subr.mxu0 %v3102_v41  ;;  %2476 = vmatprep.subr.mxu1 %v3898_v0 }
  0x52   :  { %473 = vmatpush1.msra.mxu0 %v3109_v43  ;;  %2477 = vmatpush3.msra.mxu1 %v3134_v50 }
  0x53   :  { %2276 = vmatmul.mubr.msk.f32.gmra.mxu0 %vm107_vm0, %v83_v44  ;;  %474 = vmatprep.subr.mxu0 %v3116_v45 }
  0x54   :  { %475 = vmatpush1.msra.mxu0 %v3119_v46  ;;  %510 = vmatprep.mubr.f32.mxu0 %v3898_v0 }
  0x55   :  { %476 = vmatprep.subr.mxu0 %v3123_v47  ;;  %2478 = vmatprep.subr.mxu1 %v3898_v0 }
  0x56   :  { %477 = vmatpush1.msra.mxu0 %v3130_v49  ;;  %2461 = vmatprep.mubr.msk.f32.mxu1 %vm107_vm0, %v3011_v15 }
  0x57   :  { %511 = vmatmul.mubr.f32.vlgmr.msra.gmra.mxu0 %v3898_v0  ;;  %2479 = vmatpush3.msra.mxu1 %v3140_v51 }
  0x58   :  { %680 = vmatprep.subr.mxu0 %v2978_v6  ;;  %2480 = vmatprep.subr.mxu1 %v3898_v0 }
  0x59   :  { %2462 = vmatmul.mubr.msk.f32.gmra.mxu1 %vm107_vm0, %v3031_v21  ;;  %681 = vmatpush1.msra.mxu0 %v2981_v7 }
  0x5a   :  { %2481 = vmatpush3.msra.mxu1 %v3145_v52  ;;  %2464 = vmatprep.mubr.msk.f32.mxu1 %vm107_vm0, %v3051_v27 }
  0x5b   :  { %2482 = vmatprep.subr.mxu1 %v3898_v0  ;;  %682 = vmatprep.subr.mxu0 %v2983_v8 }
  0x5c   :  { %2483 = vmatpush3.msra.mxu1 %v3152_v53  ;;  %683 = vmatpush1.msra.mxu0 %v2987_v9 }
  0x5d   :  { %2484 = vmatprep.subr.mxu1 %v3898_v0  ;;  %2465 = vmatmul.mubr.msk.f32.gmra.mxu1 %vm107_vm0, %v3071_v32 }
  0x5e   :  { %2485 = vmatpush3.msra.mxu1 %v3160_v54  ;;  %2467 = vmatprep.mubr.msk.f32.mxu1 %vm107_vm0, %v82_v38 }
  0x5f   :  { %2486 = vmatprep.subr.mxu1 %v3898_v0  ;;  %684 = vmatprep.subr.mxu0 %v2994_v11 }
  0x60   :  { %2487 = vmatpush3.msra.mxu1 %v3166_v55  ;;  %685 = vmatpush1.msra.mxu0 %v2997_v12 }
  0x61   :  { %2488 = vmatprep.subr.mxu1 %v3898_v0  ;;  %2468 = vmatmul.mubr.msk.f32.gmra.mxu1 %vm107_vm0, %v83_v44 }
  0x62   :  { %2489 = vmatpush3.msra.mxu1 %v3173_v56  ;;  %2502 = vmatprep.mubr.msk.f32.mxu1 %vm2931_vm1, %v3898_v0 }
  0x63   :  { %2490 = vmatprep.subr.mxu1 %v3898_v0  ;;  %686 = vmatprep.subr.mxu0 %v3000_v13 }
  0x64   :  { %2491 = vmatpush3.msra.mxu1 %v3179_v57  ;;  %687 = vmatpush1.msra.mxu0 %v3004_v14 }
  0x65   :  { %2492 = vmatprep.subr.mxu1 %v3898_v0  ;;  %688 = vmatprep.subr.mxu0 %v3013_v16 }
  0x66   :  { %2493 = vmatpush3.msra.mxu1 %v3186_v58  ;;  %689 = vmatpush1.msra.mxu0 %v3016_v17 }
  0x67   :  { %2494 = vmatprep.subr.mxu1 %v3898_v0  ;;  %690 = vmatprep.subr.mxu0 %v3019_v18 }
  0x68   :  { %2495 = vmatpush3.msra.mxu1 %v3192_v59  ;;  %691 = vmatpush1.msra.mxu0 %v3024_v19 }
  0x69   :  { %2496 = vmatprep.subr.mxu1 %v3898_v0  ;;  %692 = vmatprep.subr.mxu0 %v3033_v22 }
  0x6a   :  { %2497 = vmatpush3.msra.mxu1 %v3198_v60  ;;  %693 = vmatpush1.msra.mxu0 %v3036_v23 }
  0x6b   :  { %2498 = vmatprep.subr.mxu1 %v3898_v0  ;;  %694 = vmatprep.subr.mxu0 %v3039_v24 }
  0x6c   :  { %2499 = vmatpush3.msra.mxu1 %v3204_v61  ;;  %695 = vmatpush1.msra.mxu0 %v3044_v26 }
  0x6d   :  { %2500 = vmatprep.subr.mxu1 %v3898_v0  ;;  %696 = vmatprep.subr.mxu0 %v3053_v28 }
  0x6e   :  { %2501 = vmatpush3.msra.mxu1 %v3210_v62  ;;  %697 = vmatpush1.msra.mxu0 %v3056_v29 }
  0x6f   :  { %2503 = vmatmul.mubr.f32.vlgmr.msra.gmra.mxu1 %v3898_v0  ;;  %2505 = vmatprep.subr.mxu1 %v3898_v0 }
  0x70   :  { %2506 = vmatpush3.msra.mxu1 %v3083_v36  ;;  %698 = vmatprep.subr.mxu0 %v3059_v30 }
  0x71   :  { %2507 = vmatprep.subr.mxu1 %v3898_v0  ;;  %699 = vmatpush1.msra.mxu0 %v3064_v31 }
  0x72   :  { %2508 = vmatpush3.msra.mxu1 %v3105_v42  ;;  %700 = vmatprep.subr.mxu0 %v3073_v33 }
  0x73   :  { %2509 = vmatprep.subr.mxu1 %v3898_v0  ;;  %701 = vmatpush1.msra.mxu0 %v3076_v34 }
  0x74   :  { %2510 = vmatpush3.msra.mxu1 %v3126_v48  ;;  %702 = vmatprep.subr.mxu0 %v3080_v35 }
  0x75   :  { %2511 = vmatprep.subr.mxu1 %v3898_v0  ;;  %703 = vmatpush1.msra.mxu0 %v3088_v37 }
  0x76   :  { %2512 = vmatpush3.msra.mxu1 %v3134_v50  ;;  %704 = vmatprep.subr.mxu0 %v3095_v39 }
  0x77   :  { %2513 = vmatprep.subr.mxu1 %v3898_v0  ;;  %705 = vmatpush1.msra.mxu0 %v3098_v40 }
  0x78   :  { %2514 = vmatpush3.msra.mxu1 %v3140_v51  ;;  %706 = vmatprep.subr.mxu0 %v3102_v41 }
  0x79   :  { %2515 = vmatprep.subr.mxu1 %v3898_v0  ;;  %707 = vmatpush1.msra.mxu0 %v3109_v43 }
  0x7a   :  { %2516 = vmatpush3.msra.mxu1 %v3145_v52  ;;  %708 = vmatprep.subr.mxu0 %v3116_v45  ;;  %v429_v45 = vld [vmem:[#allocation9] sm:$0x7] }
  0x7b   :  { %2517 = vmatprep.subr.mxu1 %v3898_v0  ;;  %709 = vmatpush1.msra.mxu0 %v3119_v46 }
  0x7c   :  { %2518 = vmatpush3.msra.mxu1 %v3152_v53  ;;  %710 = vmatprep.subr.mxu0 %v3123_v47 }
  0x7d   :  { %2519 = vmatprep.subr.mxu1 %v3898_v0  ;;  %711 = vmatpush1.msra.mxu0 %v3130_v49 }
  0x7e   :  { %2520 = vmatpush3.msra.mxu1 %v3160_v54  ;;  %744 = vmatprep.mubr.f32.mxu0 %v3898_v0 }
  0x7f   :  { %2521 = vmatprep.subr.mxu1 %v3898_v0  ;;  %2537 = vmatprep.mubr.msk.f32.mxu1 %vm2931_vm1, %v3898_v0 }
  0x80   :  { %2522 = vmatpush3.msra.mxu1 %v3166_v55  ;;  %915 = vmatprep.subr.mxu0 %v2978_v6 }
  0x81   :  { %2523 = vmatprep.subr.mxu1 %v3898_v0 }
  0x82   :  { %2524 = vmatpush3.msra.mxu1 %v3173_v56 }
  0x83   :  { %2525 = vmatprep.subr.mxu1 %v3898_v0 }
  0x84   :  { %2526 = vmatpush3.msra.mxu1 %v3179_v57 }
  0x85   :  { %2527 = vmatprep.subr.mxu1 %v3898_v0 }
  0x86   :  { %2528 = vmatpush3.msra.mxu1 %v3186_v58 }
  0x87   :  { %2529 = vmatprep.subr.mxu1 %v3898_v0 }
  0x88   :  { %2530 = vmatpush3.msra.mxu1 %v3192_v59 }
  0x89   :  { %2531 = vmatprep.subr.mxu1 %v3898_v0 }
  0x8a   :  { %2532 = vmatpush3.msra.mxu1 %v3198_v60 }
  0x8b   :  { %2533 = vmatprep.subr.mxu1 %v3898_v0 }
  0x8c   :  { %2534 = vmatpush3.msra.mxu1 %v3204_v61 }
  0x8d   :  { %2535 = vmatprep.subr.mxu1 %v3898_v0 }
  0x8e   :  { %2536 = vmatpush3.msra.mxu1 %v3210_v62  ;;  %v3286_v62 = vsub.s32 2, %v93_v1 }
  0x8f   :  { %2540 = vmatprep.subr.mxu1 %v3898_v0 }
  0xf7   :  { %v198_v4 = vpop.f32.mrf.mxu0 }
  0xf9   :  { %v200_v6 = vpop.f32.mrf.mxu0 }
  0xfb   :  { %v204_v15 = vpop.f32.mrf.mxu0 }
  0xfc   :  { %v3278_v21 = vadd.f32 %v204_v15, %v95_v10  ;;  %v103_v15 = vrot.slane %v90_v3, %v3286_v62 }
  0xfd   :  { %v206_v25 = vpop.f32.mrf.mxu0 }
  0xfe   :  { %3944 = vst [vmem:[#allocation24_spill] sm:$0xff] %v3278_v21  ;;  %v3280_v27 = vadd.f32 %v206_v25, %v99_v20 }
  0xff   :  { %v210_v32 = vpop.f32.mrf.mxu0 }
 0x100   :  { %3945 = vst [vmem:[#allocation25_spill] sm:$0xff] %v3280_v27  ;;  %v3282_v38 = vadd.f32 %v210_v32, %v95_v10 }
 0x101   :  { %v212_v44 = vpop.f32.mrf.mxu0 }
 0x102   :  { %3946 = vst [vmem:[#allocation26_spill] sm:$0xff] %v3282_v38  ;;  %v3284_v63 = vadd.f32 %v212_v44, %v99_v20 }
 0x103   :  { %v216_v0 = vpop.f32.mrf.mxu0 }
 0x104   :  { %3947 = vst [vmem:[#allocation27_spill] sm:$0xff] %v3284_v63  ;;  %v3288_v49 = vadd.f32 %v216_v0, %v95_v10 }
 0x105   :  { %v218_v47 = vpop.f32.mrf.mxu0  ;;  %v2460_v32 = vpop.f32.mrf.mxu1 }
 0x106   :  { %3948 = vst [vmem:[#allocation28_spill] sm:$0xff] %v3288_v49  ;;  %v3290_v61 = vadd.f32 %v218_v47, %v99_v20  ;;  %v3297_v44 = vadd.f32 %v2460_v32, %v103_v15 }
 0x107   :  { %v222_v46 = vpop.f32.mrf.mxu0 }
 0x108   :  { %3949 = vst [vmem:[#allocation29_spill] sm:$0xff] %v3290_v61  ;;  %v3293_v21 = vadd.f32 %v222_v46, %v95_v10  ;;  %3952 = vst [vmem:[#allocation32_spill] sm:$0xff] %v3297_v44 }
 0x109   :  { %v224_v25 = vpop.f32.mrf.mxu0 }
 0x10a   :  { %3950 = vst [vmem:[#allocation30_spill] sm:$0xff] %v3293_v21  ;;  %v3295_v27 = vadd.f32 %v224_v25, %v99_v20  ;;  %v434_v25 = vrot.slane %v429_v45, %v3272_v2  ;;  %v201_v2 = vadd.f32 %v200_v6, %v99_v20 }
 0x10b   :  { %v228_v38 = vpop.f32.mrf.mxu0 }
 0x10c   :  { %3951 = vst [vmem:[#allocation31_spill] sm:$0xff] %v3295_v27  ;;  %v3299_v63 = vadd.f32 %v228_v38, %v95_v10 }
 0x10d   :  { %v230_v1 = vpop.f32.mrf.mxu0 }
 0x10e   :  { %3953 = vst [vmem:[#allocation33_spill] sm:$0xff] %v3299_v63  ;;  %v3301_v0 = vadd.f32 %v230_v1, %v99_v20  ;;  %v199_v63 = vadd.f32 %v198_v4, %v95_v10  ;;  %v438_v1 = vrot.slane %v429_v45, %v3274_v5 }
 0x10f   :  { %v234_v49 = vpop.f32.mrf.mxu0 }
 0x110   :  { %3954 = vst [vmem:[#allocation34_spill] sm:$0xff] %v3301_v0  ;;  %v3303_v47 = vadd.f32 %v234_v49, %v95_v10  ;;  %v311_v0 = vpop.f32.mrf.mxu1 }
 0x111   :  { %v236_v61 = vpop.f32.mrf.mxu0 }
 0x112   :  { %3955 = vst [vmem:[#allocation35_spill] sm:$0xff] %v3303_v47  ;;  %v3305_v3 = vadd.f32 %v236_v61, %v99_v20 }
 0x113   :  { %v240_v46 = vpop.f32.mrf.mxu0 }
 0x114   :  { %3956 = vst [vmem:[#allocation36_spill] sm:$0xff] %v3305_v3  ;;  %v3307_v21 = vadd.f32 %v240_v46, %v95_v10 }
 0x115   :  { %v242_v27 = vpop.f32.mrf.mxu0 }
 0x116   :  { %3957 = vst [vmem:[#allocation37_spill] sm:$0xff] %v3307_v21  ;;  %v3310_v32 = vadd.f32 %v242_v27, %v99_v20 }
 0x117   :  { %v512_v38 = vpop.f32.mrf.mxu0 }
 0x118   :  { %3958 = vst [vmem:[#allocation38_spill] sm:$0xff] %v3310_v32  ;;  %v513_v44 = vadd.f32 %v512_v38, %v434_v25 }
 0x119   :  { %v514_v49 = vpop.f32.mrf.mxu0  ;;  %v2463_v60 = vpop.f32.mrf.mxu1 }
 0x11a   :  { %v587_v47 = vadd.f32 %v513_v44, %v199_v63  ;;  %v3313_v43 = vadd.f32 %v2463_v60, %v103_v15  ;;  %v515_v3 = vadd.f32 %v514_v49, %v438_v1  ;;  %v442_v49 = vrot.slane %v429_v45, %v3286_v62 }
 0x11b   :  { %v321_v46 = vpop.f32.mrf.mxu1  ;;  %v3963_v45 = vmov 0.0  }
 0x11c   :  { %v2285_v61 = vmul.f32 -1.442695, %v587_v47  ;;  %v3315_v21 = vadd.f32 %v321_v46, %v103_v15  ;;  %v594_v4 = vadd.f32 %v515_v3, %v201_v2 }
 0x11d   :  { %v2466_v27 = vpop.f32.mrf.mxu1 }
 0x11e   :  { %2758 = vpow2.f32 %v2285_v61  ;;  %v3317_v32 = vadd.f32 %v2466_v27, %v103_v15  ;;  %v2286_v63 = vmul.f32 -1.442695, %v594_v4  ;;  %v312_v27 = vadd.f32 %v311_v0, %v103_v15 }
 0x11f   :  { %v331_v10 = vpop.f32.mrf.mxu1 }
 0x120   :  { %3959 = vst [vmem:[#allocation39_spill] sm:$0xff] %v3317_v32  ;;  %v3319_v25 = vadd.f32 %v331_v10, %v103_v15  ;;  %2760 = vpow2.f32 %v2286_v63  ;;  %v3988_v32 = vld [vmem:[#allocation28_spill] sm:$0xff] }
 0x121   :  { %v2469_v38 = vpop.f32.mrf.mxu1 }
 0x122   :  { %3960 = vst [vmem:[#allocation40_spill] sm:$0xff] %v3319_v25  ;;  %v3321_v5 = vadd.f32 %v2469_v38, %v103_v15 }
 0x123   :  { %v341_v60 = vpop.f32.mrf.mxu1 }
 0x124   :  { %3961 = vst [vmem:[#allocation41_spill] sm:$0xff] %v3321_v5  ;;  %v3323_v44 = vadd.f32 %v341_v60, %v103_v15 }
 0x126   :  { %3962 = vst [vmem:[#allocation42_spill] sm:$0xff] %v3323_v44 }
 0x12b   :  { %v2759_v47 = vpop.eup %2758 }
 0x12c   :  { %v591_v1 = vadd.f32 1.0, %v2759_v47 }
 0x12d   :  { %v2761_v61 = vpop.eup %2760 }
 0x12e   :  { %2762 = vrcp.f32 %v591_v1  ;;  %v598_v2 = vadd.f32 1.0, %v2761_v61 }
 0x12f   :  { %v583_v6 = vpop.f32.mrf.mxu1 }
 0x130   :  { %v584_v3 = vadd.f32 %v583_v6, %v442_v49  ;;  %2764 = vrcp.f32 %v598_v2  ;;  %v3976_v49 = vld [vmem:[#allocation32_spill] sm:$0xff] }
 0x131   :  { %v2504_v20 = vpop.f32.mrf.mxu1 }
 0x13b   :  { %v2763_v46 = vpop.eup %2762 }
 0x13c   :  { %v601_v10 = vmul.f32 %v2763_v46, %v584_v3 }
 0x13d   :  { %v2765_v4 = vpop.eup %2764 }
 0x13e   :  { %v602_v38 = vadd.f32 %v601_v10, %v312_v27  ;;  %v604_v60 = vsub.f32 1.0, %v2765_v4  ;;  %v606_v44 = vmul.f32 0.0, %v2765_v4  ;;  %v3489_v4 = vld [vmem:[#allocation6 + $0xd8] sm:$0xff] }
 0x140   :  { %2766 = vtanh.f32 %v602_v38 }
 0x14d   :  { %v2767_v5 = vpop.eup %2766 }
 0x14e   :  { %v605_v63 = vmul.f32 %v2767_v5, %v604_v60  ;;  %v3492_v60 = vld [vmem:[#allocation6 + $0xc8] sm:$0xff] }
 0x150   :  { %v3326_v47 = vadd.f32 %v606_v44, %v605_v63  ;;  %v3495_v63 = vld [vmem:[#allocation6 + $0xc0] sm:$0xff] }
 0x152   :  { %608 = vst [vmem:[%s3897_s5] sm:$0xff] %v3326_v47  ;;  %745 = vmatmul.mubr.f32.vlgmr.msra.gmra.mxu0 %v3326_v47  ;;  %2538 = vmatmul.mubr.f32.vlgmr.msra.gmra.mxu1 %v3326_v47 }
 0x153   :  { %916 = vmatpush1.msra.mxu0 %v2981_v7  ;;  %2541 = vmatpush3.msra.mxu1 %v3083_v36  ;;  %v3964_v7 = vld [vmem:[#allocation14_spill] sm:$0xff] }
 0x154   :  { %917 = vmatprep.subr.mxu0 %v2983_v8  ;;  %2542 = vmatprep.subr.mxu1 %v3963_v45  ;;  %v3965_v8 = vld [vmem:[#allocation19_spill] sm:$0xff] }
 0x155   :  { %918 = vmatpush1.msra.mxu0 %v2987_v9  ;;  %2543 = vmatpush3.msra.mxu1 %v3105_v42  ;;  %v3966_v9 = vld [vmem:[#allocation15_spill] sm:$0xff] }
 0x156   :  { %919 = vmatprep.subr.mxu0 %v2994_v11  ;;  %2544 = vmatprep.subr.mxu1 %v3963_v45  ;;  %v3967_v11 = vld [vmem:[#allocation16_spill] sm:$0xff] }
 0x157   :  { %920 = vmatpush1.msra.mxu0 %v2997_v12  ;;  %2545 = vmatpush3.msra.mxu1 %v3126_v48  ;;  %v3968_v12 = vld [vmem:[#allocation20_spill] sm:$0xff] }
 0x158   :  { %921 = vmatprep.subr.mxu0 %v3000_v13  ;;  %2546 = vmatprep.subr.mxu1 %v3963_v45  ;;  %v3969_v13 = vld [vmem:[#allocation17_spill] sm:$0xff] }
 0x159   :  { %922 = vmatpush1.msra.mxu0 %v3004_v14  ;;  %2547 = vmatpush3.msra.mxu1 %v3134_v50  ;;  %v3970_v14 = vld [vmem:[#allocation18_spill] sm:$0xff] }
 0x15a   :  { %923 = vmatprep.subr.mxu0 %v3013_v16  ;;  %2548 = vmatprep.subr.mxu1 %v3963_v45  ;;  %v3971_v16 = vld [vmem:[#allocation21_spill] sm:$0xff] }
 0x15b   :  { %924 = vmatpush1.msra.mxu0 %v3016_v17  ;;  %2549 = vmatpush3.msra.mxu1 %v3140_v51  ;;  %v663_v17 = vld [vmem:[#allocation9] sm:$0x7] }
 0x15c   :  { %925 = vmatprep.subr.mxu0 %v3019_v18  ;;  %2550 = vmatprep.subr.mxu1 %v3963_v45  ;;  %v3972_v18 = vld [vmem:[#allocation22_spill] sm:$0xff]  ;;  %v676_v0 = vrot.slane %v663_v17, %v3286_v62 }
 0x15d   :  { %926 = vmatpush1.msra.mxu0 %v3024_v19  ;;  %2551 = vmatpush3.msra.mxu1 %v3145_v52  ;;  %v668_v19 = vrot.slane %v663_v17, %v3972_v18 }
 0x15e   :  { %927 = vmatprep.subr.mxu0 %v3033_v22  ;;  %2552 = vmatprep.subr.mxu1 %v3963_v45 }
 0x15f   :  { %928 = vmatpush1.msra.mxu0 %v3036_v23  ;;  %2553 = vmatpush3.msra.mxu1 %v3152_v53 }
 0x160   :  { %929 = vmatprep.subr.mxu0 %v3039_v24  ;;  %2554 = vmatprep.subr.mxu1 %v3963_v45 }
 0x161   :  { %930 = vmatpush1.msra.mxu0 %v3044_v26  ;;  %2555 = vmatpush3.msra.mxu1 %v3160_v54  ;;  %v3973_v26 = vld [vmem:[#allocation23_spill] sm:$0xff] }
 0x162   :  { %931 = vmatprep.subr.mxu0 %v3053_v28  ;;  %2556 = vmatprep.subr.mxu1 %v3963_v45  ;;  %v672_v28 = vrot.slane %v663_v17, %v3973_v26  ;;  %v3523_v17 = vld [vmem:[#allocation6 + $0x48] sm:$0xff] }
 0x163   :  { %932 = vmatpush1.msra.mxu0 %v3056_v29  ;;  %2557 = vmatpush3.msra.mxu1 %v3166_v55 }
 0x164   :  { %933 = vmatprep.subr.mxu0 %v3059_v30  ;;  %2558 = vmatprep.subr.mxu1 %v3963_v45 }
 0x165   :  { %934 = vmatpush1.msra.mxu0 %v3064_v31  ;;  %2559 = vmatpush3.msra.mxu1 %v3173_v56  ;;  %v3974_v31 = vld [vmem:[#allocation24_spill] sm:$0xff] }
 0x166   :  { %935 = vmatprep.subr.mxu0 %v3073_v33  ;;  %2560 = vmatprep.subr.mxu1 %v3963_v45 }
 0x167   :  { %936 = vmatpush1.msra.mxu0 %v3076_v34  ;;  %2561 = vmatpush3.msra.mxu1 %v3179_v57 }
 0x168   :  { %937 = vmatprep.subr.mxu0 %v3080_v35  ;;  %2562 = vmatprep.subr.mxu1 %v3963_v45 }
 0x169   :  { %938 = vmatpush1.msra.mxu0 %v3088_v37  ;;  %2563 = vmatpush3.msra.mxu1 %v3186_v58  ;;  %v3975_v37 = vld [vmem:[#allocation25_spill] sm:$0xff] }
 0x16a   :  { %939 = vmatprep.subr.mxu0 %v3095_v39  ;;  %2564 = vmatprep.subr.mxu1 %v3963_v45 }
 0x16b   :  { %940 = vmatpush1.msra.mxu0 %v3098_v40  ;;  %2565 = vmatpush3.msra.mxu1 %v3192_v59 }
 0x16c   :  { %941 = vmatprep.subr.mxu0 %v3102_v41  ;;  %2566 = vmatprep.subr.mxu1 %v3963_v45 }
 0x16d   :  { %942 = vmatpush1.msra.mxu0 %v3964_v7  ;;  %2567 = vmatpush3.msra.mxu1 %v3965_v8  ;;  %v3499_v7 = vld [vmem:[#allocation6 + $0xa8] sm:$0xff] }
 0x16e   :  { %943 = vmatprep.subr.mxu0 %v3966_v9  ;;  %2568 = vmatprep.subr.mxu1 %v3963_v45  ;;  %v3505_v9 = vld [vmem:[#allocation6 + $0x90] sm:$0xff] }
 0x16f   :  { %944 = vmatpush1.msra.mxu0 %v3967_v11  ;;  %2569 = vmatpush3.msra.mxu1 %v3968_v12  ;;  %v3508_v11 = vld [vmem:[#allocation6 + $0x80] sm:$0xff] }
 0x170   :  { %945 = vmatprep.subr.mxu0 %v3969_v13  ;;  %2570 = vmatprep.subr.mxu1 %v3963_v45  ;;  %v3514_v13 = vld [vmem:[#allocation6 + $0x68] sm:$0xff] }
 0x171   :  { %946 = vmatpush1.msra.mxu0 %v3970_v14  ;;  %979 = vmatprep.mubr.f32.mxu0 %v3963_v45  ;;  %v3517_v14 = vld [vmem:[#allocation6 + $0x60] sm:$0xff] }
 0x172   :  { %2571 = vmatpush3.msra.mxu1 %v3971_v16  ;;  %2572 = vmatprep.mubr.msk.f32.mxu1 %vm2931_vm1, %v3963_v45 }
 0x173   :  { %2575 = vmatprep.subr.mxu1 %v3963_v45 }
 0x212   :  { %v746_v22 = vpop.f32.mrf.mxu0  ;;  %v817_v23 = vpop.f32.mrf.mxu1 }
 0x213   :  { %v747_v24 = vadd.f32 %v746_v22, %v668_v19  ;;  %v818_v1 = vadd.f32 %v817_v23, %v676_v0  ;;  %v3526_v19 = vld [vmem:[#allocation6 + $0x38] sm:$0xff]  ;;  %v3529_v22 = vld [vmem:[#allocation6 + $0x30] sm:$0xff]  ;;  %v3532_v23 = vld [vmem:[#allocation6 + $0x20] sm:$0xff] }
 0x214   :  { %v748_v29 = vpop.f32.mrf.mxu0  ;;  %v2539_v30 = vpop.f32.mrf.mxu1  ;;  %3978 = vst [vmem:[#allocation19_spill] sm:$0xff] %v3529_v22  ;;  %3979 = vst [vmem:[#allocation15_spill] sm:$0xff] %v3532_v23 }
 0x215   :  { %v821_v33 = vadd.f32 %v747_v24, %v3974_v31  ;;  %v749_v35 = vadd.f32 %v748_v29, %v672_v28  ;;  %v3535_v24 = vld [vmem:[#allocation6 + $0x18] sm:$0xff]  ;;  %v3538_v28 = vld [vmem:[#allocation6 + $0x8] sm:$0xff]  ;;  %v3541_v29 = vld [vmem:[#allocation6] sm:$0xff] }
 0x216   :  { %3980 = vst [vmem:[#allocation16_spill] sm:$0xff] %v3535_v24  ;;  %3981 = vst [vmem:[#allocation20_spill] sm:$0xff] %v3538_v28  ;;  %v898_v30 = vld [vmem:[#allocation9] sm:$0x7] }
 0x217   :  { %v2287_v34 = vmul.f32 -1.442695, %v821_v33  ;;  %v828_v39 = vadd.f32 %v749_v35, %v3975_v37  ;;  %3982 = vst [vmem:[#allocation17_spill] sm:$0xff] %v3541_v29  ;;  %v903_v31 = vrot.slane %v898_v30, %v3972_v18  ;;  %v907_v37 = vrot.slane %v898_v30, %v3973_v26 }
 0x219   :  { %2768 = vpow2.f32 %v2287_v34  ;;  %v2288_v40 = vmul.f32 -1.442695, %v828_v39 }
 0x21b   :  { %2770 = vpow2.f32 %v2288_v40 }
 0x226   :  { %v2769_v41 = vpop.eup %2768 }
 0x227   :  { %v825_v5 = vadd.f32 1.0, %v2769_v41  ;;  %v3983_v41 = vld [vmem:[#allocation26_spill] sm:$0xff] }
 0x228   :  { %v2771_v15 = vpop.eup %2770 }
 0x229   :  { %2772 = vrcp.f32 %v825_v5  ;;  %v832_v44 = vadd.f32 1.0, %v2771_v15 }
 0x22b   :  { %2774 = vrcp.f32 %v832_v44  ;;  %v3984_v44 = vld [vmem:[#allocation27_spill] sm:$0xff] }
 0x236   :  { %v2773_v6 = vpop.eup %2772 }
 0x237   :  { %v835_v20 = vmul.f32 %v2773_v6, %v818_v1 }
 0x238   :  { %v2775_v2 = vpop.eup %2774 }
 0x239   :  { %v836_v61 = vadd.f32 %v835_v20, %v3976_v49  ;;  %v838_v3 = vsub.f32 1.0, %v2775_v2  ;;  %v840_v10 = vmul.f32 %v2775_v2, %v3326_v47  ;;  %v3497_v47 = vld [vmem:[#allocation6 + $0xb0] sm:$0xff]  ;;  %v911_v2 = vrot.slane %v898_v30, %v3286_v62  ;;  %v3605_v30 = vld [vmem:[#allocation6 + $0x148] sm:$0xff] }
 0x23b   :  { %2776 = vtanh.f32 %v836_v61 }
 0x248   :  { %v2777_v46 = vpop.eup %2776 }
 0x249   :  { %v839_v27 = vmul.f32 %v2777_v46, %v838_v3 }
 0x24b   :  { %v3407_v38 = vadd.f32 %v840_v10, %v839_v27 }
 0x24d   :  { %2289 = vst [vmem:[%s3897_s5 + $0x8] sm:$0xff] %v3407_v38  ;;  %980 = vmatmul.mubr.f32.vlgmr.msra.gmra.mxu0 %v3407_v38  ;;  %2573 = vmatmul.mubr.f32.vlgmr.msra.gmra.mxu1 %v3407_v38 }
 0x24e   :  { %2576 = vmatpush3.msra.mxu1 %v3083_v36  ;;  %1214 = vmatprep.mubr.f32.mxu0 %v3963_v45  ;;  %v3450_v36 = vld [vmem:[#allocation6 + $0x170] sm:$0xff] }
 0x24f   :  { %2577 = vmatprep.subr.mxu1 %v3963_v45  ;;  %2607 = vmatprep.mubr.msk.f32.mxu1 %vm2931_vm1, %v3963_v45  ;;  %3977 = vst [vmem:[#allocation14_spill] sm:$0xff] %v3450_v36 }
 0x250   :  { %2578 = vmatpush3.msra.mxu1 %v3105_v42  ;;  %1150 = vmatprep.subr.mxu0 %v3450_v36  ;;  %v3453_v42 = vld [vmem:[#allocation6 + $0x168] sm:$0xff] }
 0x251   :  { %2579 = vmatprep.subr.mxu1 %v3963_v45  ;;  %1151 = vmatpush1.msra.mxu0 %v3453_v42 }
 0x252   :  { %2580 = vmatpush3.msra.mxu1 %v3126_v48  ;;  %v3456_v48 = vld [vmem:[#allocation6 + $0x158] sm:$0xff] }
 0x253   :  { %2581 = vmatprep.subr.mxu1 %v3963_v45  ;;  %1152 = vmatprep.subr.mxu0 %v3456_v48 }
 0x254   :  { %2582 = vmatpush3.msra.mxu1 %v3134_v50  ;;  %v3459_v50 = vld [vmem:[#allocation6 + $0x150] sm:$0xff] }
 0x255   :  { %2583 = vmatprep.subr.mxu1 %v3963_v45  ;;  %1153 = vmatpush1.msra.mxu0 %v3459_v50 }
 0x256   :  { %2584 = vmatpush3.msra.mxu1 %v3140_v51  ;;  %v3462_v51 = vld [vmem:[#allocation6 + $0x140] sm:$0xff] }
 0x257   :  { %2585 = vmatprep.subr.mxu1 %v3963_v45  ;;  %1154 = vmatprep.subr.mxu0 %v3462_v51 }
 0x258   :  { %2586 = vmatpush3.msra.mxu1 %v3145_v52  ;;  %v3465_v52 = vld [vmem:[#allocation6 + $0x138] sm:$0xff] }
 0x259   :  { %2587 = vmatprep.subr.mxu1 %v3963_v45  ;;  %1155 = vmatpush1.msra.mxu0 %v3465_v52 }
 0x25a   :  { %2588 = vmatpush3.msra.mxu1 %v3152_v53  ;;  %v3468_v53 = vld [vmem:[#allocation6 + $0x128] sm:$0xff] }
 0x25b   :  { %2589 = vmatprep.subr.mxu1 %v3963_v45  ;;  %1156 = vmatprep.subr.mxu0 %v3468_v53 }
 0x25c   :  { %2590 = vmatpush3.msra.mxu1 %v3160_v54  ;;  %v3471_v54 = vld [vmem:[#allocation6 + $0x120] sm:$0xff] }
 0x25d   :  { %2591 = vmatprep.subr.mxu1 %v3963_v45  ;;  %1157 = vmatpush1.msra.mxu0 %v3471_v54 }
 0x25e   :  { %2592 = vmatpush3.msra.mxu1 %v3166_v55  ;;  %v3474_v55 = vld [vmem:[#allocation6 + $0x110] sm:$0xff] }
 0x25f   :  { %2593 = vmatprep.subr.mxu1 %v3963_v45  ;;  %1158 = vmatprep.subr.mxu0 %v3474_v55 }
 0x260   :  { %2594 = vmatpush3.msra.mxu1 %v3173_v56  ;;  %v3477_v56 = vld [vmem:[#allocation6 + $0x108] sm:$0xff] }
 0x261   :  { %2595 = vmatprep.subr.mxu1 %v3963_v45  ;;  %1159 = vmatpush1.msra.mxu0 %v3477_v56 }
 0x262   :  { %2596 = vmatpush3.msra.mxu1 %v3179_v57  ;;  %v3480_v57 = vld [vmem:[#allocation6 + $0xf8] sm:$0xff] }
 0x263   :  { %2597 = vmatprep.subr.mxu1 %v3963_v45  ;;  %1160 = vmatprep.subr.mxu0 %v3480_v57 }
 0x264   :  { %2598 = vmatpush3.msra.mxu1 %v3186_v58  ;;  %v3483_v58 = vld [vmem:[#allocation6 + $0xf0] sm:$0xff] }
 0x265   :  { %2599 = vmatprep.subr.mxu1 %v3963_v45  ;;  %1161 = vmatpush1.msra.mxu0 %v3483_v58 }
 0x266   :  { %2600 = vmatpush3.msra.mxu1 %v3192_v59  ;;  %v3486_v59 = vld [vmem:[#allocation6 + $0xe0] sm:$0xff] }
 0x267   :  { %2601 = vmatprep.subr.mxu1 %v3963_v45  ;;  %1162 = vmatprep.subr.mxu0 %v3486_v59 }
 0x268   :  { %2602 = vmatpush3.msra.mxu1 %v3965_v8  ;;  %1163 = vmatpush1.msra.mxu0 %v3489_v4  ;;  %v3502_v8 = vld [vmem:[#allocation6 + $0x98] sm:$0xff] }
 0x269   :  { %2603 = vmatprep.subr.mxu1 %v3963_v45  ;;  %1164 = vmatprep.subr.mxu0 %v3492_v60 }
 0x26a   :  { %2604 = vmatpush3.msra.mxu1 %v3968_v12  ;;  %1165 = vmatpush1.msra.mxu0 %v3495_v63  ;;  %v3511_v12 = vld [vmem:[#allocation6 + $0x78] sm:$0xff] }
 0x26b   :  { %2605 = vmatprep.subr.mxu1 %v3963_v45  ;;  %1166 = vmatprep.subr.mxu0 %v3497_v47 }
 0x26c   :  { %2606 = vmatpush3.msra.mxu1 %v3971_v16  ;;  %1167 = vmatpush1.msra.mxu0 %v3499_v7  ;;  %v3520_v16 = vld [vmem:[#allocation6 + $0x50] sm:$0xff] }
 0x26d   :  { %2610 = vmatprep.subr.mxu1 %v3963_v45  ;;  %1168 = vmatprep.subr.mxu0 %v3502_v8 }
 0x26e   :  { %1169 = vmatpush1.msra.mxu0 %v3505_v9 }
 0x26f   :  { %1170 = vmatprep.subr.mxu0 %v3508_v11 }
 0x270   :  { %1171 = vmatpush1.msra.mxu0 %v3511_v12 }
 0x271   :  { %1172 = vmatprep.subr.mxu0 %v3514_v13 }
 0x272   :  { %1173 = vmatpush1.msra.mxu0 %v3517_v14 }
 0x273   :  { %1174 = vmatprep.subr.mxu0 %v3520_v16 }
 0x274   :  { %1175 = vmatpush1.msra.mxu0 %v3523_v17 }
 0x275   :  { %1176 = vmatprep.subr.mxu0 %v3526_v19 }
 0x276   :  { %1177 = vmatpush1.msra.mxu0 %v3529_v22 }
 0x277   :  { %1178 = vmatprep.subr.mxu0 %v3532_v23 }
 0x278   :  { %1179 = vmatpush1.msra.mxu0 %v3535_v24 }
 0x279   :  { %1180 = vmatprep.subr.mxu0 %v3538_v28 }
 0x27a   :  { %1181 = vmatpush1.msra.mxu0 %v3541_v29 }
 0x27b   :  { %1385 = vmatprep.subr.mxu0 %v3450_v36 }
 0x30d   :  { %v981_v33 = vpop.f32.mrf.mxu0  ;;  %v1052_v34 = vpop.f32.mrf.mxu1 }
 0x30e   :  { %v982_v35 = vadd.f32 %v981_v33, %v903_v31  ;;  %v1053_v46 = vadd.f32 %v1052_v34, %v911_v2  ;;  %v3609_v34 = vld [vmem:[#allocation6 + $0x130] sm:$0xff]  ;;  %v3647_v2 = vld [vmem:[#allocation6 + $0x40] sm:$0xff] }
 0x30f   :  { %v983_v39 = vpop.f32.mrf.mxu0  ;;  %v2574_v40 = vpop.f32.mrf.mxu1  ;;  %3985 = vst [vmem:[#allocation18_spill] sm:$0xff] %v3647_v2 }
 0x310   :  { %v1056_v5 = vadd.f32 %v982_v35, %v3983_v41  ;;  %v984_v0 = vadd.f32 %v983_v39, %v907_v37 }
 0x312   :  { %v2290_v15 = vmul.f32 -1.442695, %v1056_v5  ;;  %v1063_v1 = vadd.f32 %v984_v0, %v3984_v44  ;;  %v3613_v5 = vld [vmem:[#allocation6 + $0x118] sm:$0xff]  ;;  %v3621_v0 = vld [vmem:[#allocation6 + $0xe8] sm:$0xff]  ;;  %v3625_v44 = vld [vmem:[#allocation6 + $0xd0] sm:$0xff] }
 0x314   :  { %2778 = vpow2.f32 %v2290_v15  ;;  %v2291_v6 = vmul.f32 -1.442695, %v1063_v1  ;;  %v3617_v15 = vld [vmem:[#allocation6 + $0x100] sm:$0xff]  ;;  %v3627_v1 = vld [vmem:[#allocation6 + $0xb8] sm:$0xff] }
 0x316   :  { %2780 = vpow2.f32 %v2291_v6  ;;  %v3631_v6 = vld [vmem:[#allocation6 + $0xa0] sm:$0xff] }
 0x321   :  { %v2779_v20 = vpop.eup %2778 }
 0x322   :  { %v1060_v49 = vadd.f32 1.0, %v2779_v20  ;;  %v3635_v20 = vld [vmem:[#allocation6 + $0x88] sm:$0xff] }
 0x323   :  { %v2781_v61 = vpop.eup %2780 }
 0x324   :  { %2782 = vrcp.f32 %v1060_v49  ;;  %v1067_v3 = vadd.f32 1.0, %v2781_v61  ;;  %v3639_v49 = vld [vmem:[#allocation6 + $0x70] sm:$0xff]  ;;  %v3643_v61 = vld [vmem:[#allocation6 + $0x58] sm:$0xff] }
 0x326   :  { %2784 = vrcp.f32 %v1067_v3  ;;  %v3651_v3 = vld [vmem:[#allocation6 + $0x28] sm:$0xff] }
 0x327   :  { %3986 = vst [vmem:[#allocation21_spill] sm:$0xff] %v3651_v3 }
 0x331   :  { %v2783_v27 = vpop.eup %2782 }
 0x332   :  { %v1070_v10 = vmul.f32 %v2783_v27, %v1053_v46  ;;  %v3655_v46 = vld [vmem:[#allocation6 + $0x10] sm:$0xff]  ;;  %v1133_v27 = vld [vmem:[#allocation9] sm:$0x7] }
 0x333   :  { %v2785_v33 = vpop.eup %2784  ;;  %3987 = vst [vmem:[#allocation24_spill] sm:$0xff] %v3655_v46 }
 0x334   :  { %v1071_v31 = vadd.f32 %v1070_v10, %v3315_v21  ;;  %v1073_v35 = vsub.f32 1.0, %v2785_v33  ;;  %v1075_v40 = vmul.f32 %v2785_v33, %v3407_v38  ;;  %v3597_v21 = vld [vmem:[#allocation6 + $0x178] sm:$0xff]  ;;  %v3601_v38 = vld [vmem:[#allocation6 + $0x160] sm:$0xff]  ;;  %v1138_v10 = vrot.slane %v1133_v27, %v3972_v18 }
 0x336   :  { %2786 = vtanh.f32 %v1071_v31 }
 0x343   :  { %v2787_v37 = vpop.eup %2786 }
 0x344   :  { %v1074_v39 = vmul.f32 %v2787_v37, %v1073_v35  ;;  %v1142_v37 = vrot.slane %v1133_v27, %v3973_v26 }
 0x346   :  { %v3554_v41 = vadd.f32 %v1075_v40, %v1074_v39 }
 0x348   :  { %2292 = vst [vmem:[%s3897_s5 + $0x10] sm:$0xff] %v3554_v41  ;;  %1215 = vmatmul.mubr.f32.vlgmr.msra.gmra.mxu0 %v3554_v41  ;;  %2608 = vmatmul.mubr.f32.vlgmr.msra.gmra.mxu1 %v3554_v41 }
 0x349   :  { %1386 = vmatpush1.msra.mxu0 %v3453_v42  ;;  %1449 = vmatprep.mubr.f32.mxu0 %v3963_v45 }
 0x34a   :  { %1387 = vmatprep.subr.mxu0 %v3456_v48  ;;  %2642 = vmatprep.mubr.msk.f32.mxu1 %vm2931_vm1, %v3963_v45 }
 0x34b   :  { %1388 = vmatpush1.msra.mxu0 %v3459_v50  ;;  %2611 = vmatpush3.msra.mxu1 %v3597_v21 }
 0x34c   :  { %1389 = vmatprep.subr.mxu0 %v3462_v51  ;;  %2612 = vmatprep.subr.mxu1 %v3963_v45 }
 0x34d   :  { %1390 = vmatpush1.msra.mxu0 %v3465_v52  ;;  %2613 = vmatpush3.msra.mxu1 %v3601_v38 }
 0x34e   :  { %1391 = vmatprep.subr.mxu0 %v3468_v53  ;;  %2614 = vmatprep.subr.mxu1 %v3963_v45 }
 0x34f   :  { %1392 = vmatpush1.msra.mxu0 %v3471_v54  ;;  %2615 = vmatpush3.msra.mxu1 %v3605_v30 }
 0x350   :  { %1393 = vmatprep.subr.mxu0 %v3474_v55  ;;  %2616 = vmatprep.subr.mxu1 %v3963_v45 }
 0x351   :  { %1394 = vmatpush1.msra.mxu0 %v3477_v56  ;;  %2617 = vmatpush3.msra.mxu1 %v3609_v34 }
 0x352   :  { %1395 = vmatprep.subr.mxu0 %v3480_v57  ;;  %2618 = vmatprep.subr.mxu1 %v3963_v45 }
 0x353   :  { %1396 = vmatpush1.msra.mxu0 %v3483_v58  ;;  %2619 = vmatpush3.msra.mxu1 %v3613_v5 }
 0x354   :  { %1397 = vmatprep.subr.mxu0 %v3486_v59  ;;  %2620 = vmatprep.subr.mxu1 %v3963_v45 }
 0x355   :  { %1398 = vmatpush1.msra.mxu0 %v3489_v4  ;;  %2621 = vmatpush3.msra.mxu1 %v3617_v15 }
 0x356   :  { %1399 = vmatprep.subr.mxu0 %v3492_v60  ;;  %2622 = vmatprep.subr.mxu1 %v3963_v45 }
 0x357   :  { %1400 = vmatpush1.msra.mxu0 %v3495_v63  ;;  %2623 = vmatpush3.msra.mxu1 %v3621_v0 }
 0x358   :  { %1401 = vmatprep.subr.mxu0 %v3497_v47  ;;  %2624 = vmatprep.subr.mxu1 %v3963_v45 }
 0x359   :  { %1402 = vmatpush1.msra.mxu0 %v3499_v7  ;;  %2625 = vmatpush3.msra.mxu1 %v3625_v44 }
 0x35a   :  { %1403 = vmatprep.subr.mxu0 %v3502_v8  ;;  %2626 = vmatprep.subr.mxu1 %v3963_v45 }
 0x35b   :  { %1404 = vmatpush1.msra.mxu0 %v3505_v9  ;;  %2627 = vmatpush3.msra.mxu1 %v3627_v1 }
 0x35c   :  { %1405 = vmatprep.subr.mxu0 %v3508_v11  ;;  %2628 = vmatprep.subr.mxu1 %v3963_v45 }
 0x35d   :  { %1406 = vmatpush1.msra.mxu0 %v3511_v12  ;;  %2629 = vmatpush3.msra.mxu1 %v3631_v6 }
 0x35e   :  { %1407 = vmatprep.subr.mxu0 %v3514_v13  ;;  %2630 = vmatprep.subr.mxu1 %v3963_v45 }
 0x35f   :  { %1408 = vmatpush1.msra.mxu0 %v3517_v14  ;;  %2631 = vmatpush3.msra.mxu1 %v3635_v20 }
 0x360   :  { %1409 = vmatprep.subr.mxu0 %v3520_v16  ;;  %2632 = vmatprep.subr.mxu1 %v3963_v45 }
 0x361   :  { %1410 = vmatpush1.msra.mxu0 %v3523_v17  ;;  %2633 = vmatpush3.msra.mxu1 %v3639_v49 }
 0x362   :  { %1411 = vmatprep.subr.mxu0 %v3526_v19  ;;  %2634 = vmatprep.subr.mxu1 %v3963_v45 }
 0x363   :  { %1412 = vmatpush1.msra.mxu0 %v3529_v22  ;;  %2635 = vmatpush3.msra.mxu1 %v3643_v61 }
 0x364   :  { %1413 = vmatprep.subr.mxu0 %v3532_v23  ;;  %2636 = vmatprep.subr.mxu1 %v3963_v45 }
 0x365   :  { %1414 = vmatpush1.msra.mxu0 %v3535_v24  ;;  %2637 = vmatpush3.msra.mxu1 %v3647_v2  ;;  %v1146_v2 = vrot.slane %v1133_v27, %v3286_v62  ;;  %v1368_v27 = vld [vmem:[#allocation9] sm:$0x7] }
 0x366   :  { %1415 = vmatprep.subr.mxu0 %v3538_v28  ;;  %2638 = vmatprep.subr.mxu1 %v3963_v45  ;;  %v3989_v28 = vld [vmem:[#allocation29_spill] sm:$0xff] }
 0x367   :  { %1416 = vmatpush1.msra.mxu0 %v3541_v29  ;;  %2639 = vmatpush3.msra.mxu1 %v3651_v3 }
 0x368   :  { %1620 = vmatprep.subr.mxu0 %v3450_v36  ;;  %2640 = vmatprep.subr.mxu1 %v3963_v45 }
 0x369   :  { %2641 = vmatpush3.msra.mxu1 %v3655_v46 }
 0x36a   :  { %2645 = vmatprep.subr.mxu1 %v3963_v45 }
 0x408   :  { %v1216_v31 = vpop.f32.mrf.mxu0  ;;  %v1287_v33 = vpop.f32.mrf.mxu1 }
 0x409   :  { %v1217_v35 = vadd.f32 %v1216_v31, %v1138_v10  ;;  %v1288_v31 = vadd.f32 %v1287_v33, %v1146_v2  ;;  %v3997_v2 = vld [vmem:[#allocation24_spill] sm:$0xff]  ;;  %v3999_v33 = vld [vmem:[#allocation22_spill] sm:$0xff] }
 0x40a   :  { %v1218_v39 = vpop.f32.mrf.mxu0  ;;  %v2609_v40 = vpop.f32.mrf.mxu1 }
 0x40b   :  { %v1291_v25 = vadd.f32 %v1217_v35, %v3988_v32  ;;  %v1219_v29 = vadd.f32 %v1218_v39, %v1142_v37  ;;  %v1373_v37 = vrot.slane %v1368_v27, %v3999_v33 }
 0x40d   :  { %v2293_v36 = vmul.f32 -1.442695, %v1291_v25  ;;  %v1298_v3 = vadd.f32 %v1219_v29, %v3989_v28 }
 0x40f   :  { %2788 = vpow2.f32 %v2293_v36  ;;  %v2294_v46 = vmul.f32 -1.442695, %v1298_v3 }
 0x411   :  { %2790 = vpow2.f32 %v2294_v46  ;;  %v3998_v46 = vld [vmem:[#allocation14_spill] sm:$0xff] }
 0x41c   :  { %v2789_v24 = vpop.eup %2788 }
 0x41d   :  { %v1295_v23 = vadd.f32 1.0, %v2789_v24  ;;  %v3995_v24 = vld [vmem:[#allocation20_spill] sm:$0xff] }
 0x41e   :  { %v2791_v18 = vpop.eup %2790 }
 0x41f   :  { %2792 = vrcp.f32 %v1295_v23  ;;  %v1302_v10 = vadd.f32 1.0, %v2791_v18  ;;  %v3991_v18 = vld [vmem:[#allocation18_spill] sm:$0xff]  ;;  %v3994_v23 = vld [vmem:[#allocation21_spill] sm:$0xff] }
 0x421   :  { %2794 = vrcp.f32 %v1302_v10 }
 0x42c   :  { %v2793_v26 = vpop.eup %2792 }
 0x42d   :  { %v1305_v22 = vmul.f32 %v2793_v26, %v1288_v31  ;;  %v3992_v26 = vld [vmem:[#allocation15_spill] sm:$0xff] }
 0x42e   :  { %v2795_v25 = vpop.eup %2794  ;;  %v4000_v31 = vld [vmem:[#allocation23_spill] sm:$0xff] }
 0x42f   :  { %v1306_v32 = vadd.f32 %v1305_v22, %v3313_v43  ;;  %v1308_v36 = vsub.f32 1.0, %v2795_v25  ;;  %v1310_v29 = vmul.f32 %v2795_v25, %v3554_v41  ;;  %v3990_v43 = vld [vmem:[#allocation19_spill] sm:$0xff]  ;;  %v3993_v22 = vld [vmem:[#allocation16_spill] sm:$0xff]  ;;  %v3996_v41 = vld [vmem:[#allocation17_spill] sm:$0xff] }
 0x431   :  { %2796 = vtanh.f32 %v1306_v32  ;;  %v1377_v32 = vrot.slane %v1368_v27, %v4000_v31 }
 0x43e   :  { %v2797_v35 = vpop.eup %2796 }
 0x43f   :  { %v1309_v28 = vmul.f32 %v2797_v35, %v1308_v36  ;;  %v4001_v35 = vld [vmem:[#allocation30_spill] sm:$0xff] }
 0x441   :  { %v3668_v3 = vadd.f32 %v1310_v29, %v1309_v28 }
 0x443   :  { %2295 = vst [vmem:[%s3897_s5 + $0x18] sm:$0xff] %v3668_v3  ;;  %1450 = vmatmul.mubr.f32.vlgmr.msra.gmra.mxu0 %v3668_v3  ;;  %2643 = vmatmul.mubr.f32.vlgmr.msra.gmra.mxu1 %v3668_v3 }
 0x444   :  { %1621 = vmatpush1.msra.mxu0 %v3453_v42  ;;  %2646 = vmatpush3.msra.mxu1 %v3597_v21 }
 0x445   :  { %1622 = vmatprep.subr.mxu0 %v3456_v48  ;;  %2647 = vmatprep.subr.mxu1 %v3963_v45 }
 0x446   :  { %1623 = vmatpush1.msra.mxu0 %v3459_v50  ;;  %2648 = vmatpush3.msra.mxu1 %v3601_v38 }
 0x447   :  { %1624 = vmatprep.subr.mxu0 %v3462_v51  ;;  %2649 = vmatprep.subr.mxu1 %v3963_v45 }
 0x448   :  { %1625 = vmatpush1.msra.mxu0 %v3465_v52  ;;  %2650 = vmatpush3.msra.mxu1 %v3605_v30 }
 0x449   :  { %1626 = vmatprep.subr.mxu0 %v3468_v53  ;;  %2651 = vmatprep.subr.mxu1 %v3963_v45 }
 0x44a   :  { %1627 = vmatpush1.msra.mxu0 %v3471_v54  ;;  %2652 = vmatpush3.msra.mxu1 %v3609_v34 }
 0x44b   :  { %1628 = vmatprep.subr.mxu0 %v3474_v55  ;;  %2653 = vmatprep.subr.mxu1 %v3963_v45 }
 0x44c   :  { %1629 = vmatpush1.msra.mxu0 %v3477_v56  ;;  %2654 = vmatpush3.msra.mxu1 %v3613_v5 }
 0x44d   :  { %1630 = vmatprep.subr.mxu0 %v3480_v57  ;;  %2655 = vmatprep.subr.mxu1 %v3963_v45 }
 0x44e   :  { %1631 = vmatpush1.msra.mxu0 %v3483_v58  ;;  %2656 = vmatpush3.msra.mxu1 %v3617_v15 }
 0x44f   :  { %1632 = vmatprep.subr.mxu0 %v3486_v59  ;;  %2657 = vmatprep.subr.mxu1 %v3963_v45 }
 0x450   :  { %1633 = vmatpush1.msra.mxu0 %v3489_v4  ;;  %2658 = vmatpush3.msra.mxu1 %v3621_v0 }
 0x451   :  { %1634 = vmatprep.subr.mxu0 %v3492_v60  ;;  %2659 = vmatprep.subr.mxu1 %v3963_v45 }
 0x452   :  { %1635 = vmatpush1.msra.mxu0 %v3495_v63  ;;  %2660 = vmatpush3.msra.mxu1 %v3625_v44 }
 0x453   :  { %1636 = vmatprep.subr.mxu0 %v3497_v47  ;;  %2661 = vmatprep.subr.mxu1 %v3963_v45 }
 0x454   :  { %1637 = vmatpush1.msra.mxu0 %v3499_v7  ;;  %2662 = vmatpush3.msra.mxu1 %v3627_v1 }
 0x455   :  { %1638 = vmatprep.subr.mxu0 %v3502_v8  ;;  %2663 = vmatprep.subr.mxu1 %v3963_v45 }
 0x456   :  { %1639 = vmatpush1.msra.mxu0 %v3505_v9  ;;  %2664 = vmatpush3.msra.mxu1 %v3631_v6 }
 0x457   :  { %1640 = vmatprep.subr.mxu0 %v3508_v11  ;;  %2665 = vmatprep.subr.mxu1 %v3963_v45 }
 0x458   :  { %1641 = vmatpush1.msra.mxu0 %v3511_v12  ;;  %2666 = vmatpush3.msra.mxu1 %v3635_v20 }
 0x459   :  { %1642 = vmatprep.subr.mxu0 %v3514_v13  ;;  %2667 = vmatprep.subr.mxu1 %v3963_v45 }
 0x45a   :  { %1643 = vmatpush1.msra.mxu0 %v3517_v14  ;;  %2668 = vmatpush3.msra.mxu1 %v3639_v49 }
 0x45b   :  { %1644 = vmatprep.subr.mxu0 %v3520_v16  ;;  %2669 = vmatprep.subr.mxu1 %v3963_v45 }
 0x45c   :  { %1645 = vmatpush1.msra.mxu0 %v3523_v17  ;;  %2670 = vmatpush3.msra.mxu1 %v3643_v61 }
 0x45d   :  { %1646 = vmatprep.subr.mxu0 %v3526_v19  ;;  %2671 = vmatprep.subr.mxu1 %v3963_v45 }
 0x45e   :  { %1647 = vmatpush1.msra.mxu0 %v3990_v43  ;;  %2672 = vmatpush3.msra.mxu1 %v3991_v18 }
 0x45f   :  { %1648 = vmatprep.subr.mxu0 %v3992_v26  ;;  %2673 = vmatprep.subr.mxu1 %v3963_v45  ;;  %v1381_v26 = vrot.slane %v1368_v27, %v3286_v62  ;;  %v4015_v27 = vld [vmem:[#allocation39_spill] sm:$0xff] }
 0x460   :  { %1649 = vmatpush1.msra.mxu0 %v3993_v22  ;;  %2674 = vmatpush3.msra.mxu1 %v3994_v23 }
 0x461   :  { %1650 = vmatprep.subr.mxu0 %v3995_v24  ;;  %2675 = vmatprep.subr.mxu1 %v3963_v45 }
 0x462   :  { %1651 = vmatpush1.msra.mxu0 %v3996_v41  ;;  %1684 = vmatprep.mubr.f32.mxu0 %v3963_v45  ;;  %v4002_v41 = vld [vmem:[#allocation31_spill] sm:$0xff] }
 0x463   :  { %2676 = vmatpush3.msra.mxu1 %v3997_v2  ;;  %2677 = vmatprep.mubr.msk.f32.mxu1 %vm2931_vm1, %v3963_v45 }
 0x464   :  { %1855 = vmatprep.subr.mxu0 %v3998_v46  ;;  %2680 = vmatprep.subr.mxu1 %v3963_v45 }
 0x503   :  { %v1451_v39 = vpop.f32.mrf.mxu0  ;;  %v1522_v40 = vpop.f32.mrf.mxu1 }
 0x504   :  { %v1452_v10 = vadd.f32 %v1451_v39, %v1373_v37  ;;  %v1523_v39 = vadd.f32 %v1522_v40, %v1381_v26 }
 0x505   :  { %v1453_v25 = vpop.f32.mrf.mxu0  ;;  %v2644_v36 = vpop.f32.mrf.mxu1 }
 0x506   :  { %v1526_v28 = vadd.f32 %v1452_v10, %v4001_v35  ;;  %v1454_v2 = vadd.f32 %v1453_v25, %v1377_v32  ;;  %v4003_v36 = vld [vmem:[#allocation40_spill] sm:$0xff] }
 0x508   :  { %v2296_v29 = vmul.f32 -1.442695, %v1526_v28  ;;  %v1533_v24 = vadd.f32 %v1454_v2, %v4002_v41 }
 0x50a   :  { %2798 = vpow2.f32 %v2296_v29  ;;  %v2297_v46 = vmul.f32 -1.442695, %v1533_v24 }
 0x50c   :  { %2800 = vpow2.f32 %v2297_v46 }
 0x517   :  { %v2799_v23 = vpop.eup %2798 }
 0x518   :  { %v1530_v22 = vadd.f32 1.0, %v2799_v23 }
 0x519   :  { %v2801_v33 = vpop.eup %2800 }
 0x51a   :  { %2802 = vrcp.f32 %v1530_v22  ;;  %v1537_v37 = vadd.f32 1.0, %v2801_v33 }
 0x51c   :  { %2804 = vrcp.f32 %v1537_v37 }
 0x527   :  { %v2803_v31 = vpop.eup %2802 }
 0x528   :  { %v1540_v18 = vmul.f32 %v2803_v31, %v1523_v39  ;;  %v2050_v39 = vld [vmem:[#allocation6 + $0xc8] sm:$0xff] }
 0x529   :  { %v2805_v32 = vpop.eup %2804 }
 0x52a   :  { %v1541_v10 = vadd.f32 %v1540_v18, %v4003_v36  ;;  %v1543_v25 = vsub.f32 1.0, %v2805_v32  ;;  %v1545_v24 = vmul.f32 %v2805_v32, %v3668_v3  ;;  %v2049_v36 = vld [vmem:[#allocation6 + $0xc0] sm:$0xff]  ;;  %v2046_v32 = vld [vmem:[#allocation6 + $0xa8] sm:$0xff] }
 0x52c   :  { %2806 = vtanh.f32 %v1541_v10  ;;  %v2047_v10 = vld [vmem:[#allocation6 + $0xb0] sm:$0xff] }
 0x539   :  { %v2807_v35 = vpop.eup %2806 }
 0x53a   :  { %v1544_v41 = vmul.f32 %v2807_v35, %v1543_v25  ;;  %v2044_v25 = vld [vmem:[#allocation6 + $0x98] sm:$0xff]  ;;  %v2043_v35 = vld [vmem:[#allocation6 + $0x90] sm:$0xff] }
 0x53c   :  { %v3750_v2 = vadd.f32 %v1545_v24, %v1544_v41  ;;  %v2041_v41 = vld [vmem:[#allocation6 + $0x80] sm:$0xff]  ;;  %v2040_v24 = vld [vmem:[#allocation6 + $0x78] sm:$0xff] }
 0x53e   :  { %2298 = vst [vmem:[%s3897_s5 + $0x20] sm:$0xff] %v3750_v2  ;;  %1685 = vmatmul.mubr.f32.vlgmr.msra.gmra.mxu0 %v3750_v2  ;;  %2678 = vmatmul.mubr.f32.vlgmr.msra.gmra.mxu1 %v3750_v2 }
 0x53f   :  { %1856 = vmatpush1.msra.mxu0 %v3453_v42  ;;  %2681 = vmatpush3.msra.mxu1 %v3597_v21  ;;  %v4004_v42 = vld [vmem:[#allocation18_spill] sm:$0xff] }
 0x540   :  { %1857 = vmatprep.subr.mxu0 %v3456_v48  ;;  %2682 = vmatprep.subr.mxu1 %v3963_v45  ;;  %v4005_v48 = vld [vmem:[#allocation15_spill] sm:$0xff] }
 0x541   :  { %1858 = vmatpush1.msra.mxu0 %v3459_v50  ;;  %2683 = vmatpush3.msra.mxu1 %v3601_v38  ;;  %v4006_v50 = vld [vmem:[#allocation16_spill] sm:$0xff] }
 0x542   :  { %1859 = vmatprep.subr.mxu0 %v3462_v51  ;;  %2684 = vmatprep.subr.mxu1 %v3963_v45  ;;  %v4007_v51 = vld [vmem:[#allocation21_spill] sm:$0xff] }
 0x543   :  { %1860 = vmatpush1.msra.mxu0 %v3465_v52  ;;  %2685 = vmatpush3.msra.mxu1 %v3605_v30  ;;  %v4008_v52 = vld [vmem:[#allocation20_spill] sm:$0xff] }
 0x544   :  { %1861 = vmatprep.subr.mxu0 %v3468_v53  ;;  %2686 = vmatprep.subr.mxu1 %v3963_v45  ;;  %v4009_v53 = vld [vmem:[#allocation17_spill] sm:$0xff] }
 0x545   :  { %1862 = vmatpush1.msra.mxu0 %v3471_v54  ;;  %2687 = vmatpush3.msra.mxu1 %v3609_v34  ;;  %v4010_v54 = vld [vmem:[#allocation24_spill] sm:$0xff] }
 0x546   :  { %1863 = vmatprep.subr.mxu0 %v3474_v55  ;;  %2688 = vmatprep.subr.mxu1 %v3963_v45  ;;  %v1603_v55 = vld [vmem:[#allocation9] sm:$0x7] }
 0x547   :  { %1864 = vmatpush1.msra.mxu0 %v3477_v56  ;;  %2689 = vmatpush3.msra.mxu1 %v3613_v5  ;;  %v4011_v56 = vld [vmem:[#allocation22_spill] sm:$0xff] }
 0x548   :  { %1865 = vmatprep.subr.mxu0 %v3480_v57  ;;  %2690 = vmatprep.subr.mxu1 %v3963_v45  ;;  %v1608_v57 = vrot.slane %v1603_v55, %v4011_v56 }
 0x549   :  { %1866 = vmatpush1.msra.mxu0 %v3483_v58  ;;  %2691 = vmatpush3.msra.mxu1 %v3617_v15 }
 0x54a   :  { %1867 = vmatprep.subr.mxu0 %v3486_v59  ;;  %2692 = vmatprep.subr.mxu1 %v3963_v45 }
 0x54b   :  { %1868 = vmatpush1.msra.mxu0 %v3489_v4  ;;  %2693 = vmatpush3.msra.mxu1 %v3621_v0 }
 0x54c   :  { %1869 = vmatprep.subr.mxu0 %v3492_v60  ;;  %2694 = vmatprep.subr.mxu1 %v3963_v45  ;;  %v4012_v60 = vld [vmem:[#allocation23_spill] sm:$0xff] }
 0x54d   :  { %1870 = vmatpush1.msra.mxu0 %v3495_v63  ;;  %2695 = vmatpush3.msra.mxu1 %v3625_v44  ;;  %v1612_v63 = vrot.slane %v1603_v55, %v4012_v60 }
 0x54e   :  { %1871 = vmatprep.subr.mxu0 %v3497_v47  ;;  %2696 = vmatprep.subr.mxu1 %v3963_v45 }
 0x54f   :  { %1872 = vmatpush1.msra.mxu0 %v3499_v7  ;;  %2697 = vmatpush3.msra.mxu1 %v3627_v1 }
 0x550   :  { %1873 = vmatprep.subr.mxu0 %v3502_v8  ;;  %2698 = vmatprep.subr.mxu1 %v3963_v45  ;;  %v4013_v8 = vld [vmem:[#allocation33_spill] sm:$0xff] }
 0x551   :  { %1874 = vmatpush1.msra.mxu0 %v3505_v9  ;;  %2699 = vmatpush3.msra.mxu1 %v3631_v6 }
 0x552   :  { %1875 = vmatprep.subr.mxu0 %v3508_v11  ;;  %2700 = vmatprep.subr.mxu1 %v3963_v45 }
 0x553   :  { %1876 = vmatpush1.msra.mxu0 %v3511_v12  ;;  %2701 = vmatpush3.msra.mxu1 %v3635_v20 }
 0x554   :  { %1877 = vmatprep.subr.mxu0 %v3514_v13  ;;  %2702 = vmatprep.subr.mxu1 %v3963_v45  ;;  %v4014_v13 = vld [vmem:[#allocation34_spill] sm:$0xff] }
 0x555   :  { %1878 = vmatpush1.msra.mxu0 %v3517_v14  ;;  %2703 = vmatpush3.msra.mxu1 %v3639_v49 }
 0x556   :  { %1879 = vmatprep.subr.mxu0 %v3520_v16  ;;  %2704 = vmatprep.subr.mxu1 %v3963_v45 }
 0x557   :  { %1880 = vmatpush1.msra.mxu0 %v3523_v17  ;;  %2705 = vmatpush3.msra.mxu1 %v3643_v61 }
 0x558   :  { %1881 = vmatprep.subr.mxu0 %v3526_v19  ;;  %2706 = vmatprep.subr.mxu1 %v3963_v45 }
 0x559   :  { %1882 = vmatpush1.msra.mxu0 %v3990_v43  ;;  %2707 = vmatpush3.msra.mxu1 %v4004_v42  ;;  %v1616_v43 = vrot.slane %v1603_v55, %v3286_v62  ;;  %v2026_v55 = vld [vmem:[#allocation6 + $0x8] sm:$0xff] }
 0x55a   :  { %1883 = vmatprep.subr.mxu0 %v4005_v48  ;;  %2708 = vmatprep.subr.mxu1 %v3963_v45  ;;  %v2035_v48 = vld [vmem:[#allocation6 + $0x50] sm:$0xff] }
 0x55b   :  { %1884 = vmatpush1.msra.mxu0 %v4006_v50  ;;  %2709 = vmatpush3.msra.mxu1 %v4007_v51  ;;  %v2034_v50 = vld [vmem:[#allocation6 + $0x48] sm:$0xff] }
 0x55c   :  { %1885 = vmatprep.subr.mxu0 %v4008_v52  ;;  %2710 = vmatprep.subr.mxu1 %v3963_v45  ;;  %v2031_v52 = vld [vmem:[#allocation6 + $0x30] sm:$0xff] }
 0x55d   :  { %1886 = vmatpush1.msra.mxu0 %v4009_v53  ;;  %1919 = vmatprep.mubr.f32.mxu0 %v3963_v45  ;;  %v2029_v53 = vld [vmem:[#allocation6 + $0x20] sm:$0xff] }
 0x55e   :  { %2711 = vmatpush3.msra.mxu1 %v4010_v54  ;;  %2712 = vmatprep.mubr.msk.f32.mxu1 %vm2931_vm1, %v3963_v45 }
 0x55f   :  { %2715 = vmatprep.subr.mxu1 %v3963_v45 }
 0x5fe   :  { %v1686_v58 = vpop.f32.mrf.mxu0  ;;  %v1757_v59 = vpop.f32.mrf.mxu1 }
 0x5ff   :  { %v1687_v4 = vadd.f32 %v1686_v58, %v1608_v57  ;;  %v1758_v26 = vadd.f32 %v1757_v59, %v1616_v43  ;;  %v2025_v57 = vld [vmem:[#allocation6] sm:$0xff] }
 0x600   :  { %v1688_v47 = vpop.f32.mrf.mxu0  ;;  %v2679_v7 = vpop.f32.mrf.mxu1  ;;  %v1838_v58 = vld [vmem:[#allocation9] sm:$0x7] }
 0x601   :  { %v1761_v9 = vadd.f32 %v1687_v4, %v4013_v8  ;;  %v1689_v12 = vadd.f32 %v1688_v47, %v1612_v63  ;;  %v1843_v59 = vrot.slane %v1838_v58, %v4011_v56  ;;  %v1847_v7 = vrot.slane %v1838_v58, %v4012_v60 }
 0x603   :  { %v2299_v11 = vmul.f32 -1.442695, %v1761_v9  ;;  %v1768_v14 = vadd.f32 %v1689_v12, %v4014_v13 }
 0x605   :  { %2808 = vpow2.f32 %v2299_v11  ;;  %v2300_v16 = vmul.f32 -1.442695, %v1768_v14  ;;  %v4016_v11 = vld [vmem:[#allocation35_spill] sm:$0xff] }
 0x607   :  { %2810 = vpow2.f32 %v2300_v16  ;;  %v4017_v16 = vld [vmem:[#allocation36_spill] sm:$0xff] }
 0x612   :  { %v2809_v17 = vpop.eup %2808 }
 0x613   :  { %v1765_v19 = vadd.f32 1.0, %v2809_v17 }
 0x614   :  { %v2811_v3 = vpop.eup %2810 }
 0x615   :  { %2812 = vrcp.f32 %v1765_v19  ;;  %v1772_v18 = vadd.f32 1.0, %v2811_v3 }
 0x617   :  { %2814 = vrcp.f32 %v1772_v18 }
 0x622   :  { %v2813_v22 = vpop.eup %2812 }
 0x623   :  { %v1775_v23 = vmul.f32 %v2813_v22, %v1758_v26  ;;  %v1851_v26 = vrot.slane %v1838_v58, %v3286_v62 }
 0x624   :  { %v2815_v40 = vpop.eup %2814 }
 0x625   :  { %v1776_v33 = vadd.f32 %v1775_v23, %v4015_v27  ;;  %v1778_v31 = vsub.f32 1.0, %v2815_v40  ;;  %v1780_v46 = vmul.f32 %v2815_v40, %v3750_v2  ;;  %v2038_v2 = vld [vmem:[#allocation6 + $0x68] sm:$0xff] }
 0x626   :  { %v4018_v40 = vld [vmem:[#allocation42_spill] sm:$0xff] }
 0x627   :  { %2816 = vtanh.f32 %v1776_v33 }
 0x634   :  { %v2817_v28 = vpop.eup %2816 }
 0x635   :  { %v1779_v29 = vmul.f32 %v2817_v28, %v1778_v31 }
 0x637   :  { %v3831_v37 = vadd.f32 %v1780_v46, %v1779_v29 }
 0x639   :  { %2301 = vst [vmem:[%s3897_s5 + $0x28] sm:$0xff] %v3831_v37  ;;  %1920 = vmatmul.mubr.f32.vlgmr.msra.gmra.mxu0 %v3831_v37  ;;  %2713 = vmatmul.mubr.f32.vlgmr.msra.gmra.mxu1 %v3831_v37 }
 0x63a   :  { %2716 = vmatpush3.msra.mxu1 %v3597_v21  ;;  %2154 = vmatprep.mubr.f32.mxu0 %v3963_v45  ;;  %v2071_v21 = vld [vmem:[#allocation6 + $0x170] sm:$0xff] }
 0x63b   :  { %2717 = vmatprep.subr.mxu1 %v3963_v45  ;;  %2747 = vmatprep.mubr.msk.f32.mxu1 %vm2931_vm1, %v3963_v45 }
 0x63c   :  { %2718 = vmatpush3.msra.mxu1 %v3601_v38  ;;  %2090 = vmatprep.subr.mxu0 %v2071_v21  ;;  %v2070_v38 = vld [vmem:[#allocation6 + $0x168] sm:$0xff] }
 0x63d   :  { %2719 = vmatprep.subr.mxu1 %v3963_v45  ;;  %2091 = vmatpush1.msra.mxu0 %v2070_v38 }
 0x63e   :  { %2720 = vmatpush3.msra.mxu1 %v3605_v30  ;;  %v2068_v30 = vld [vmem:[#allocation6 + $0x158] sm:$0xff] }
 0x63f   :  { %2721 = vmatprep.subr.mxu1 %v3963_v45  ;;  %2092 = vmatprep.subr.mxu0 %v2068_v30 }
 0x640   :  { %2722 = vmatpush3.msra.mxu1 %v3609_v34  ;;  %v2067_v34 = vld [vmem:[#allocation6 + $0x150] sm:$0xff] }
 0x641   :  { %2723 = vmatprep.subr.mxu1 %v3963_v45  ;;  %2093 = vmatpush1.msra.mxu0 %v2067_v34  ;;  %v2073_v34 = vld [vmem:[#allocation9] sm:$0x7] }
 0x642   :  { %2724 = vmatpush3.msra.mxu1 %v3613_v5  ;;  %v2065_v5 = vld [vmem:[#allocation6 + $0x140] sm:$0xff] }
 0x643   :  { %2725 = vmatprep.subr.mxu1 %v3963_v45  ;;  %2094 = vmatprep.subr.mxu0 %v2065_v5  ;;  %v2078_v5 = vrot.slane %v2073_v34, %v4011_v56 }
 0x644   :  { %2726 = vmatpush3.msra.mxu1 %v3617_v15  ;;  %v2064_v15 = vld [vmem:[#allocation6 + $0x138] sm:$0xff] }
 0x645   :  { %2727 = vmatprep.subr.mxu1 %v3963_v45  ;;  %2095 = vmatpush1.msra.mxu0 %v2064_v15 }
 0x646   :  { %2728 = vmatpush3.msra.mxu1 %v3621_v0  ;;  %v2062_v0 = vld [vmem:[#allocation6 + $0x128] sm:$0xff] }
 0x647   :  { %2729 = vmatprep.subr.mxu1 %v3963_v45  ;;  %2096 = vmatprep.subr.mxu0 %v2062_v0 }
 0x648   :  { %2730 = vmatpush3.msra.mxu1 %v3625_v44  ;;  %v2061_v44 = vld [vmem:[#allocation6 + $0x120] sm:$0xff] }
 0x649   :  { %2731 = vmatprep.subr.mxu1 %v3963_v45  ;;  %2097 = vmatpush1.msra.mxu0 %v2061_v44 }
 0x64a   :  { %2732 = vmatpush3.msra.mxu1 %v3627_v1  ;;  %v2059_v1 = vld [vmem:[#allocation6 + $0x110] sm:$0xff] }
 0x64b   :  { %2733 = vmatprep.subr.mxu1 %v3963_v45  ;;  %2098 = vmatprep.subr.mxu0 %v2059_v1  ;;  %v2082_v1 = vrot.slane %v2073_v34, %v4012_v60 }
 0x64c   :  { %2734 = vmatpush3.msra.mxu1 %v3631_v6  ;;  %v2056_v6 = vld [vmem:[#allocation6 + $0xf8] sm:$0xff] }
 0x64d   :  { %2735 = vmatprep.subr.mxu1 %v3963_v45 }
 0x64e   :  { %2736 = vmatpush3.msra.mxu1 %v3635_v20  ;;  %v2055_v20 = vld [vmem:[#allocation6 + $0xf0] sm:$0xff] }
 0x64f   :  { %2737 = vmatprep.subr.mxu1 %v3963_v45 }
 0x650   :  { %2738 = vmatpush3.msra.mxu1 %v3639_v49  ;;  %v2053_v49 = vld [vmem:[#allocation6 + $0xe0] sm:$0xff] }
 0x651   :  { %2739 = vmatprep.subr.mxu1 %v3963_v45 }
 0x652   :  { %2740 = vmatpush3.msra.mxu1 %v3643_v61  ;;  %v2052_v61 = vld [vmem:[#allocation6 + $0xd8] sm:$0xff] }
 0x653   :  { %2741 = vmatprep.subr.mxu1 %v3963_v45 }
 0x654   :  { %2742 = vmatpush3.msra.mxu1 %v4004_v42  ;;  %v2037_v42 = vld [vmem:[#allocation6 + $0x60] sm:$0xff] }
 0x655   :  { %2743 = vmatprep.subr.mxu1 %v3963_v45 }
 0x656   :  { %2744 = vmatpush3.msra.mxu1 %v4007_v51  ;;  %v2032_v51 = vld [vmem:[#allocation6 + $0x38] sm:$0xff] }
 0x657   :  { %2745 = vmatprep.subr.mxu1 %v3963_v45  ;;  %v2058_v45 = vld [vmem:[#allocation6 + $0x108] sm:$0xff] }
 0x658   :  { %2746 = vmatpush3.msra.mxu1 %v4010_v54  ;;  %2099 = vmatpush1.msra.mxu0 %v2058_v45  ;;  %v2028_v54 = vld [vmem:[#allocation6 + $0x18] sm:$0xff] }
 0x659   :  { %2100 = vmatprep.subr.mxu0 %v2056_v6 }
 0x65a   :  { %2101 = vmatpush1.msra.mxu0 %v2055_v20  ;;  %v4019_v20 = vld [vmem:[#allocation37_spill] sm:$0xff] }
 0x65b   :  { %2102 = vmatprep.subr.mxu0 %v2053_v49 }
 0x65c   :  { %2103 = vmatpush1.msra.mxu0 %v2052_v61 }
 0x65d   :  { %2104 = vmatprep.subr.mxu0 %v2050_v39  ;;  %v4020_v39 = vld [vmem:[#allocation38_spill] sm:$0xff] }
 0x65e   :  { %2105 = vmatpush1.msra.mxu0 %v2049_v36 }
 0x65f   :  { %2106 = vmatprep.subr.mxu0 %v2047_v10 }
 0x660   :  { %2107 = vmatpush1.msra.mxu0 %v2046_v32 }
 0x661   :  { %2108 = vmatprep.subr.mxu0 %v2044_v25 }
 0x662   :  { %2109 = vmatpush1.msra.mxu0 %v2043_v35  ;;  %v2086_v35 = vrot.slane %v2073_v34, %v3286_v62 }
 0x663   :  { %2110 = vmatprep.subr.mxu0 %v2041_v41 }
 0x664   :  { %2111 = vmatpush1.msra.mxu0 %v2040_v24 }
 0x665   :  { %2112 = vmatprep.subr.mxu0 %v2038_v2 }
 0x666   :  { %2113 = vmatpush1.msra.mxu0 %v2037_v42  ;;  %v4021_v42 = vld [vmem:[#allocation41_spill] sm:$0xff] }
 0x667   :  { %2114 = vmatprep.subr.mxu0 %v2035_v48 }
 0x668   :  { %2115 = vmatpush1.msra.mxu0 %v2034_v50 }
 0x669   :  { %2116 = vmatprep.subr.mxu0 %v2032_v51 }
 0x66a   :  { %2117 = vmatpush1.msra.mxu0 %v2031_v52 }
 0x66b   :  { %2118 = vmatprep.subr.mxu0 %v2029_v53 }
 0x66c   :  { %2119 = vmatpush1.msra.mxu0 %v2028_v54 }
 0x66d   :  { %2120 = vmatprep.subr.mxu0 %v2026_v55 }
 0x66e   :  { %2121 = vmatpush1.msra.mxu0 %v2025_v57 }
 0x6f9   :  { %v1921_v4 = vpop.f32.mrf.mxu0  ;;  %v1992_v63 = vpop.f32.mrf.mxu1 }
 0x6fa   :  { %v1922_v47 = vadd.f32 %v1921_v4, %v1843_v59  ;;  %v1993_v23 = vadd.f32 %v1992_v63, %v1851_v26 }
 0x6fb   :  { %v1923_v8 = vpop.f32.mrf.mxu0  ;;  %v2714_v9 = vpop.f32.mrf.mxu1 }
 0x6fc   :  { %v1996_v12 = vadd.f32 %v1922_v47, %v4016_v11  ;;  %v1924_v14 = vadd.f32 %v1923_v8, %v1847_v7 }
 0x6fe   :  { %v2302_v13 = vmul.f32 -1.442695, %v1996_v12  ;;  %v2003_v17 = vadd.f32 %v1924_v14, %v4017_v16 }
 0x700   :  { %2818 = vpow2.f32 %v2302_v13  ;;  %v2303_v19 = vmul.f32 -1.442695, %v2003_v17 }
 0x702   :  { %2820 = vpow2.f32 %v2303_v19 }
 0x70d   :  { %v2819_v3 = vpop.eup %2818 }
 0x70e   :  { %v2000_v43 = vadd.f32 1.0, %v2819_v3 }
 0x70f   :  { %v2821_v18 = vpop.eup %2820 }
 0x710   :  { %2822 = vrcp.f32 %v2000_v43  ;;  %v2007_v22 = vadd.f32 1.0, %v2821_v18 }
 0x712   :  { %2824 = vrcp.f32 %v2007_v22 }
 0x71d   :  { %v2823_v27 = vpop.eup %2822 }
 0x71e   :  { %v2010_v33 = vmul.f32 %v2823_v27, %v1993_v23 }
 0x71f   :  { %v2825_v28 = vpop.eup %2824 }
 0x720   :  { %v2011_v31 = vadd.f32 %v2010_v33, %v4018_v40  ;;  %v2013_v29 = vsub.f32 1.0, %v2825_v28  ;;  %v2015_v38 = vmul.f32 %v2825_v28, %v3831_v37 }
 0x722   :  { %2826 = vtanh.f32 %v2011_v31 }
 0x72f   :  { %v2827_v46 = vpop.eup %2826 }
 0x730   :  { %v2014_v21 = vmul.f32 %v2827_v46, %v2013_v29 }
 0x732   :  { %v2016_v30 = vadd.f32 %v2015_v38, %v2014_v21 }
 0x734   :  { %2304 = vst [vmem:[%s3897_s5 + $0x30] sm:$0xff] %v2016_v30  ;;  %2155 = vmatmul.mubr.f32.vlgmr.msra.gmra.mxu0 %v2016_v30  ;;  %2748 = vmatmul.mubr.f32.vlgmr.msra.gmra.mxu1 %v2016_v30 }
 0x7f4   :  { %v2156_v15 = vpop.f32.mrf.mxu0  ;;  %v2227_v0 = vpop.f32.mrf.mxu1 }
 0x7f5   :  { %v2157_v44 = vadd.f32 %v2156_v15, %v2078_v5  ;;  %v2228_v24 = vadd.f32 %v2227_v0, %v2086_v35 }
 0x7f6   :  { %v2158_v45 = vpop.f32.mrf.mxu0  ;;  %v2749_v6 = vpop.f32.mrf.mxu1 }
 0x7f7   :  { %v2231_v49 = vadd.f32 %v2157_v44, %v4019_v20  ;;  %v2159_v61 = vadd.f32 %v2158_v45, %v2082_v1 }
 0x7f9   :  { %v2305_v37 = vmul.f32 -1.442695, %v2231_v49  ;;  %v2238_v36 = vadd.f32 %v2159_v61, %v4020_v39 }
 0x7fb   :  { %2828 = vpow2.f32 %v2305_v37  ;;  %v2306_v10 = vmul.f32 -1.442695, %v2238_v36 }
 0x7fd   :  { %2830 = vpow2.f32 %v2306_v10 }
 0x808   :  { %v2829_v32 = vpop.eup %2828 }
 0x809   :  { %v2235_v25 = vadd.f32 1.0, %v2829_v32 }
 0x80a   :  { %v2831_v56 = vpop.eup %2830 }
 0x80b   :  { %2832 = vrcp.f32 %v2235_v25  ;;  %v2242_v41 = vadd.f32 1.0, %v2831_v56 }
 0x80d   :  { %2834 = vrcp.f32 %v2242_v41 }
 0x818   :  { %v2833_v60 = vpop.eup %2832 }
 0x819   :  { %v2245_v2 = vmul.f32 %v2833_v60, %v2228_v24 }
 0x81a   :  { %v2835_v50 = vpop.eup %2834 }
 0x81b   :  { %v2246_v48 = vadd.f32 %v2245_v2, %v4021_v42  ;;  %v2248_v51 = vsub.f32 1.0, %v2835_v50  ;;  %v2250_v54 = vmul.f32 %v2835_v50, %v2016_v30 }
 0x81d   :  { %2836 = vtanh.f32 %v2246_v48 }
 0x82a   :  { %v2837_v52 = vpop.eup %2836 }
 0x82b   :  { %v2249_v53 = vmul.f32 %v2837_v52, %v2248_v51 }
 0x82d   :  { %v2251_v55 = vadd.f32 %v2250_v54, %v2249_v53 }
 0x82f   :  { %2307 = vst [vmem:[%s3897_s5 + $0x38] sm:$0xff] %v2251_v55 }
 0x830   :  { %2259 = vsyncpa [#allocation5], 1 }
 0x831   :  { %2260 = vsyncpa [#allocation7], 1 }
 0x832   :  { %2261 = vsyncpa [#allocation10], 1 }

</bundles_post_ra>
